<compile_context>
chip_gen: v6e
topology: v6e:2x2x1
jax: 0.10.0
libtpu: 0.0.40
codegen_flags: <defaults>
</compile_context>

<pallas_src>
import jax
import jax.numpy as jnp
from jax.experimental import pallas as pl
from jax.experimental.pallas import tpu as pltpu

EPS = 1e-5          # nn.BatchNorm2d default eps
DXS = (-2, -1, 1, 2)   # nonzero horizontal tap offsets
DYS = (-2, -1, 1, 2)   # nonzero vertical tap offsets


def _fold_bn(p):
    """Fold eval-mode BatchNorm into the (bias-free) conv weights: w' = w*s, shift = b - rm*s."""
    def f(w, prefix):
        s = p[prefix + "_g"] * jax.lax.rsqrt(p[prefix + "_rv"] + EPS)
        return w * s[:, None], p[prefix + "_b"] - p[prefix + "_rm"] * s

    w1, t1 = f(p["g1c1_w"], "g1c1_bn")    # GhostConv1.cv1 (1x1), SiLU
    wd1, t2 = f(p["g1dw_w"], "g1dw_bn")   # GhostConv1.cv2 (5x5 dw), SiLU
    w2, t3 = f(p["g2c1_w"], "g2c1_bn")    # GhostConv2.cv1 (1x1), no act
    wd2, t4 = f(p["g2dw_w"], "g2dw_bn")   # GhostConv2.cv2 (5x5 dw), no act
    return w1, t1, wd1, t2, w2, t3, wd2, t4


def ghost_bottleneck(x_nchw, p):
    N, C, H, W = x_nchw.shape
    assert C % 4 == 0, "ghost split requires c2 % 4 == 0"
    cA, cB = C // 4, C // 2
    HW = H * W
    HWp = pl.cdiv(HW, 128) * 128          # lane-dense last dim (pad + slice back)
    f32, bf16 = jnp.float32, jnp.bfloat16

    w1, t1, wd1, t2, w2, t3, wd2, t4 = _fold_bn(p)
    w1 = w1.astype(bf16)                                                   # (cA, C)
    w2s = jnp.stack([w2[:, :cA], w2[:, cA:]]).astype(bf16)                 # (2, cB, cA)
    pa = jnp.concatenate([wd1, t1[:, None], t2[:, None]], 1).astype(f32)   # (cA, 27)
    pb = jnp.concatenate([wd2, t3[:, None], t4[:, None]], 1).astype(f32)   # (cB, 27)

    # Loop-invariant boundary masks: one (1, HWp) row per nonzero dx, then dy.
    pos = jnp.arange(HWp, dtype=jnp.int32)
    col, row = pos % W, pos // W
    mrows = [((col + dx >= 0) & (col + dx < W)) for dx in DXS]
    mrows += [((row + dy >= 0) & (row + dy < H)) for dy in DYS]
    masks = jnp.stack(mrows).astype(f32)                                   # (8, HWp)

    x = x_nchw.reshape(N, C, HW).astype(f32)   # native NCHW, spatial on lanes
    if HWp != HW:
        x = jnp.pad(x, ((0, 0), (0, 0), (0, HWp - HW)))

    # Samples per grid step: keep >= ~512 lanes of work per step while dividing N.
    NB = max(1, min(N, 512 // HWp))
    while N % NB:
        NB -= 1

    def kernel(x_ref, w1_ref, w2_ref, pa_ref, pb_ref, m_ref, o_ref):
        cmask = {dx: m_ref[i:i + 1, :] for i, dx in enumerate(DXS)}
        rmask = {dy: m_ref[4 + i:5 + i, :] for i, dy in enumerate(DYS)}

        def silu(v):
            return v * jax.nn.sigmoid(v)

        def dwconv5x5(y, taps_ref):
            # y: (Cg, HWp). 5x5 depthwise conv, pad=2, on the flattened spatial
            # axis.  Horizontal taps: lane roll + column mask (wrap lanes are
            # always masked).  Per-dy partial sums are rolled vertically once and
            # row-masked once (roll commutes with the elementwise tap combine).
            ycol = {}
            for dx in (-2, -1, 0, 1, 2):
                if dx == 0:
                    ycol[dx] = y
                else:
                    ycol[dx] = pltpu.roll(y, (-dx) % HWp, axis=1) * cmask[dx]
            acc = None
            for dy in (-2, -1, 0, 1, 2):
                part = None
                for dx in (-2, -1, 0, 1, 2):
                    t = (dy + 2) * 5 + (dx + 2)
                    term = ycol[dx] * taps_ref[:, t:t + 1]
                    part = term if part is None else part + term
                if dy != 0:
                    part = pltpu.roll(part, (-(dy * W)) % HWp, axis=1) * rmask[dy]
                acc = part if acc is None else acc + part
            return acc

        for nb in range(NB):               # NB is small and static
            xs = x_ref[nb]                 # (C, HWp) f32

            # --- GhostConv(C -> C/2), act=SiLU ---
            y1 = silu(jnp.dot(w1_ref[...], xs.astype(bf16),
                              preferred_element_type=f32) + pa_ref[:, 25:26])
            y2 = silu(dwconv5x5(y1, pa_ref) + pa_ref[:, 26:27])

            # --- GhostConv(C/2 -> C), act=Identity; channel concat of [y1, y2]
            #     avoided by splitting the pointwise weight into column blocks ---
            z1 = (jnp.dot(w2_ref[0], y1.astype(bf16), preferred_element_type=f32)
                  + jnp.dot(w2_ref[1], y2.astype(bf16), preferred_element_type=f32)
                  + pb_ref[:, 25:26])
            z2 = dwconv5x5(z1, pb_ref) + pb_ref[:, 26:27]

            # --- out = concat([z1, z2], channel) + x : lane-dense stores ---
            o_ref[nb, 0:cB, :] = z1 + xs[0:cB, :]
            o_ref[nb, cB:C, :] = z2 + xs[cB:C, :]

    flops = N * HWp * 2 * (cA * C + cB * cB + 25 * (cA + cB))
    transcendentals = N * 2 * cA * HWp
    bytes_accessed = (8 * N * C * HWp + 2 * (w1.size + w2s.size)
                      + 4 * (pa.size + pb.size + masks.size))

    out = pl.pallas_call(
        kernel,
        out_shape=jax.ShapeDtypeStruct((N, C, HWp), f32),
        grid_spec=pltpu.PrefetchScalarGridSpec(
            num_scalar_prefetch=0,
            grid=(N // NB,),
            in_specs=[
                pl.BlockSpec((NB, C, HWp), lambda n: (n, 0, 0)),
                pl.BlockSpec(w1.shape, lambda n: (0, 0)),
                pl.BlockSpec(w2s.shape, lambda n: (0, 0, 0)),
                pl.BlockSpec(pa.shape, lambda n: (0, 0)),
                pl.BlockSpec(pb.shape, lambda n: (0, 0)),
                pl.BlockSpec(masks.shape, lambda n: (0, 0)),
            ],
            out_specs=pl.BlockSpec((NB, C, HWp), lambda n: (n, 0, 0)),
        ),
        compiler_params=pltpu.CompilerParams(dimension_semantics=("parallel",)),
        cost_estimate=pl.CostEstimate(flops=int(flops),
                                      transcendentals=int(transcendentals),
                                      bytes_accessed=int(bytes_accessed)),
    )(x, w1, w2s, pa, pb, masks)

    return out[:, :, :HW].reshape(N, C, H, W)


def ghost_bottleneck_ref(x, p):
    """Pure-JAX reference (same BN fold, same bf16 rounding of 1x1-conv operands)."""
    w1, t1, wd1, t2, w2, t3, wd2, t4 = _fold_bn(p)
    hp = jax.lax.Precision.HIGHEST
    bf = lambda a: a.astype(jnp.bfloat16).astype(jnp.float32)
    silu = lambda v: v * jax.nn.sigmoid(v)

    def pw(xin, w, t):
        # bf16-rounded operands, f32 accumulation -> matches the kernel's MXU use.
        return jnp.einsum("oc,nchw->nohw", bf(w), bf(xin),
                          precision=hp) + t.reshape(1, -1, 1, 1)

    def dw(xin, w, t):
        k = w.reshape(-1, 1, 5, 5)
        y = jax.lax.conv_general_dilated(
            xin, k, (1, 1), ((2, 2), (2, 2)),
            dimension_numbers=("NCHW", "OIHW", "NCHW"),
            feature_group_count=xin.shape[1], precision=hp)
        return y + t.reshape(1, -1, 1, 1)

    y1 = silu(pw(x, w1, t1))
    y2 = silu(dw(y1, wd1, t2))
    a = jnp.concatenate([y1, y2], axis=1)
    z1 = pw(a, w2, t3)
    z2 = dw(z1, wd2, t4)
    return jnp.concatenate([z1, z2], axis=1) + x


def make_params(key, C):
    assert C % 4 == 0
    cA, cB = C // 4, C // 2
    ks = iter(jax.random.split(key, 32))

    def nrm(shape, scale=1.0):
        return (scale * jax.random.normal(next(ks), shape)).astype(jnp.float32)

    p = {}

    def bn(prefix, c):
        p[prefix + "_g"] = 1.0 + nrm((c,), 0.1)
        p[prefix + "_b"] = nrm((c,), 0.1)
        p[prefix + "_rm"] = nrm((c,), 0.1)
        p[prefix + "_rv"] = 1.0 + jnp.abs(nrm((c,), 0.1))

    p["g1c1_w"] = nrm((cA, C), C ** -0.5)      # Conv2d(C, C/4, 1, bias=False)
    bn("g1c1_bn", cA)
    p["g1dw_w"] = nrm((cA, 25), 0.2)           # Conv2d(C/4, C/4, 5, groups=C/4) -> (C/4, 25)
    bn("g1dw_bn", cA)
    p["g2c1_w"] = nrm((cB, cB), cB ** -0.5)    # Conv2d(C/2, C/2, 1, bias=False)
    bn("g2c1_bn", cB)
    p["g2dw_w"] = nrm((cB, 25), 0.2)           # Conv2d(C/2, C/2, 5, groups=C/2) -> (C/2, 25)
    bn("g2dw_bn", cB)
    return p


if __name__ == "__main__":
    N, C, H, W = 4, 16, 16, 16                 # c1 == c2 == 16, ghost channels 4 / 8
    key = jax.random.PRNGKey(0)
    kx, kp = jax.random.split(key)
    x = jax.random.normal(kx, (N, C, H, W), dtype=jnp.float32)
    params = make_params(kp, C)

    y = jax.block_until_ready(jax.jit(ghost_bottleneck)(x, params))
    y_ref = jax.block_until_ready(ghost_bottleneck_ref(x, params))

    assert y.shape == (N, C, H, W)
    assert bool(jnp.all(jnp.isfinite(y)))
    rel = float(jnp.max(jnp.abs(y - y_ref)) / (jnp.max(jnp.abs(y_ref)) + 1e-6))
    # Everything is f32 except bf16-rounded matmul operands (mirrored in the
    # reference); expected ~1e-6, with up to ~1e-3 only if an activation lands on
    # a bf16 rounding boundary.  Any mask / roll / tap regression is O(1e-1).
    assert rel < 2e-3, f"kernel mismatch vs reference: rel-max-err={rel}"
    print("KERNEL_OK")
</pallas_src>

<mosaic_0001>
module attributes {stable_mosaic.version = 11 : i64} {
  func.func @kernel(%arg0: i32, %arg1: memref<2x16x256xf32, #tpu.memory_space<vmem>>, %arg2: memref<4x16xbf16, #tpu.memory_space<vmem>>, %arg3: memref<2x8x4xbf16, #tpu.memory_space<vmem>>, %arg4: memref<4x27xf32, #tpu.memory_space<vmem>>, %arg5: memref<8x27xf32, #tpu.memory_space<vmem>>, %arg6: memref<8x256xf32, #tpu.memory_space<vmem>>, %arg7: memref<2x16x256xf32, #tpu.memory_space<vmem>>) attributes {dimension_semantics = [#tpu.dimension_semantics<parallel>], iteration_bounds = array<i64: 2>, scalar_prefetch = 0 : i64, scratch_operands = 0 : i64, tpu.core_type = #tpu.core_type<tc>, window_params = [{transform_indices = @transform_0, window_bounds = array<i64: 2, 16, 256>}, {pipeline_mode = #tpu.pipeline_mode<synchronous>, transform_indices = @transform_1, window_bounds = array<i64: 4, 16>}, {pipeline_mode = #tpu.pipeline_mode<synchronous>, transform_indices = @transform_2, window_bounds = array<i64: 2, 8, 4>}, {pipeline_mode = #tpu.pipeline_mode<synchronous>, transform_indices = @transform_3, window_bounds = array<i64: 4, 27>}, {pipeline_mode = #tpu.pipeline_mode<synchronous>, transform_indices = @transform_4, window_bounds = array<i64: 8, 27>}, {pipeline_mode = #tpu.pipeline_mode<synchronous>, transform_indices = @transform_5, window_bounds = array<i64: 8, 256>}, {transform_indices = @transform_6, window_bounds = array<i64: 2, 16, 256>}]} {
    %c0 = arith.constant 0 : index
    %c0_0 = arith.constant 0 : index
    %0 = vector.load %arg6[%c0, %c0_0] : memref<8x256xf32, #tpu.memory_space<vmem>>, vector<1x256xf32>
    %c1 = arith.constant 1 : index
    %c0_1 = arith.constant 0 : index
    %1 = vector.load %arg6[%c1, %c0_1] : memref<8x256xf32, #tpu.memory_space<vmem>>, vector<1x256xf32>
    %c2 = arith.constant 2 : index
    %c0_2 = arith.constant 0 : index
    %2 = vector.load %arg6[%c2, %c0_2] : memref<8x256xf32, #tpu.memory_space<vmem>>, vector<1x256xf32>
    %c3 = arith.constant 3 : index
    %c0_3 = arith.constant 0 : index
    %3 = vector.load %arg6[%c3, %c0_3] : memref<8x256xf32, #tpu.memory_space<vmem>>, vector<1x256xf32>
    %c4 = arith.constant 4 : index
    %c0_4 = arith.constant 0 : index
    %4 = vector.load %arg6[%c4, %c0_4] : memref<8x256xf32, #tpu.memory_space<vmem>>, vector<1x256xf32>
    %c5 = arith.constant 5 : index
    %c0_5 = arith.constant 0 : index
    %5 = vector.load %arg6[%c5, %c0_5] : memref<8x256xf32, #tpu.memory_space<vmem>>, vector<1x256xf32>
    %c6 = arith.constant 6 : index
    %c0_6 = arith.constant 0 : index
    %6 = vector.load %arg6[%c6, %c0_6] : memref<8x256xf32, #tpu.memory_space<vmem>>, vector<1x256xf32>
    %c7 = arith.constant 7 : index
    %c0_7 = arith.constant 0 : index
    %7 = vector.load %arg6[%c7, %c0_7] : memref<8x256xf32, #tpu.memory_space<vmem>>, vector<1x256xf32>
    %c0_8 = arith.constant 0 : index
    %c0_9 = arith.constant 0 : index
    %c0_10 = arith.constant 0 : index
    %8 = vector.load %arg1[%c0_8, %c0_9, %c0_10] : memref<2x16x256xf32, #tpu.memory_space<vmem>>, vector<1x16x256xf32>
    %9 = vector.shape_cast %8 : vector<1x16x256xf32> to vector<16x256xf32>
    %c0_11 = arith.constant 0 : index
    %c0_12 = arith.constant 0 : index
    %10 = vector.load %arg2[%c0_11, %c0_12] : memref<4x16xbf16, #tpu.memory_space<vmem>>, vector<4x16xbf16>
    %11 = arith.truncf %9 : vector<16x256xf32> to vector<16x256xbf16>
    %cst = arith.constant dense<0.000000e+00> : vector<4x256xf32>
    %12 = tpu.matmul %10, %11, %cst {dimension_numbers = #tpu.dot_dimension_numbers<[1], [0], [0], [1], [0, 0, 1, 1], [], []>} : vector<4x16xbf16>, vector<16x256xbf16>, vector<4x256xf32> -> vector<4x256xf32>
    %c0_13 = arith.constant 0 : index
    %c25 = arith.constant 25 : index
    %13 = vector.load %arg4[%c0_13, %c25] : memref<4x27xf32, #tpu.memory_space<vmem>>, vector<4x1xf32>
    %14 = vector.broadcast %13 : vector<4x1xf32> to vector<4x256xf32>
    %15 = arith.addf %12, %14 : vector<4x256xf32>
    %16 = arith.negf %15 : vector<4x256xf32>
    %17 = math.exp %16 : vector<4x256xf32>
    %cst_14 = arith.constant 1.000000e+00 : f32
    %18 = vector.broadcast %cst_14 : f32 to vector<4x256xf32>
    %19 = arith.addf %18, %17 : vector<4x256xf32>
    %20 = arith.divf %18, %19 : vector<4x256xf32>
    %21 = arith.mulf %15, %20 : vector<4x256xf32>
    %c2_i32 = arith.constant 2 : i32
    %22 = tpu.dynamic_rotate %21 by %c2_i32 dim 1 : vector<4x256xf32>, i32 -> vector<4x256xf32>
    %23 = vector.broadcast %0 : vector<1x256xf32> to vector<4x256xf32>
    %24 = arith.mulf %22, %23 : vector<4x256xf32>
    %c1_i32 = arith.constant 1 : i32
    %25 = tpu.dynamic_rotate %21 by %c1_i32 dim 1 : vector<4x256xf32>, i32 -> vector<4x256xf32>
    %26 = vector.broadcast %1 : vector<1x256xf32> to vector<4x256xf32>
    %27 = arith.mulf %25, %26 : vector<4x256xf32>
    %c255_i32 = arith.constant 255 : i32
    %28 = tpu.dynamic_rotate %21 by %c255_i32 dim 1 : vector<4x256xf32>, i32 -> vector<4x256xf32>
    %29 = vector.broadcast %2 : vector<1x256xf32> to vector<4x256xf32>
    %30 = arith.mulf %28, %29 : vector<4x256xf32>
    %c254_i32 = arith.constant 254 : i32
    %31 = tpu.dynamic_rotate %21 by %c254_i32 dim 1 : vector<4x256xf32>, i32 -> vector<4x256xf32>
    %32 = vector.broadcast %3 : vector<1x256xf32> to vector<4x256xf32>
    %33 = arith.mulf %31, %32 : vector<4x256xf32>
    %c0_15 = arith.constant 0 : index
    %c0_16 = arith.constant 0 : index
    %34 = vector.load %arg4[%c0_15, %c0_16] : memref<4x27xf32, #tpu.memory_space<vmem>>, vector<4x1xf32>
    %35 = vector.broadcast %34 : vector<4x1xf32> to vector<4x256xf32>
    %36 = arith.mulf %24, %35 : vector<4x256xf32>
    %c0_17 = arith.constant 0 : index
    %c1_18 = arith.constant 1 : index
    %37 = vector.load %arg4[%c0_17, %c1_18] : memref<4x27xf32, #tpu.memory_space<vmem>>, vector<4x1xf32>
    %38 = vector.broadcast %37 : vector<4x1xf32> to vector<4x256xf32>
    %39 = arith.mulf %27, %38 : vector<4x256xf32>
    %40 = arith.addf %36, %39 : vector<4x256xf32>
    %c0_19 = arith.constant 0 : index
    %c2_20 = arith.constant 2 : index
    %41 = vector.load %arg4[%c0_19, %c2_20] : memref<4x27xf32, #tpu.memory_space<vmem>>, vector<4x1xf32>
    %42 = vector.broadcast %41 : vector<4x1xf32> to vector<4x256xf32>
    %43 = arith.mulf %21, %42 : vector<4x256xf32>
    %44 = arith.addf %40, %43 : vector<4x256xf32>
    %c0_21 = arith.constant 0 : index
    %c3_22 = arith.constant 3 : index
    %45 = vector.load %arg4[%c0_21, %c3_22] : memref<4x27xf32, #tpu.memory_space<vmem>>, vector<4x1xf32>
    %46 = vector.broadcast %45 : vector<4x1xf32> to vector<4x256xf32>
    %47 = arith.mulf %30, %46 : vector<4x256xf32>
    %48 = arith.addf %44, %47 : vector<4x256xf32>
    %c0_23 = arith.constant 0 : index
    %c4_24 = arith.constant 4 : index
    %49 = vector.load %arg4[%c0_23, %c4_24] : memref<4x27xf32, #tpu.memory_space<vmem>>, vector<4x1xf32>
    %50 = vector.broadcast %49 : vector<4x1xf32> to vector<4x256xf32>
    %51 = arith.mulf %33, %50 : vector<4x256xf32>
    %52 = arith.addf %48, %51 : vector<4x256xf32>
    %c32_i32 = arith.constant 32 : i32
    %53 = tpu.dynamic_rotate %52 by %c32_i32 dim 1 : vector<4x256xf32>, i32 -> vector<4x256xf32>
    %54 = vector.broadcast %4 : vector<1x256xf32> to vector<4x256xf32>
    %55 = arith.mulf %53, %54 : vector<4x256xf32>
    %c0_25 = arith.constant 0 : index
    %c5_26 = arith.constant 5 : index
    %56 = vector.load %arg4[%c0_25, %c5_26] : memref<4x27xf32, #tpu.memory_space<vmem>>, vector<4x1xf32>
    %57 = vector.broadcast %56 : vector<4x1xf32> to vector<4x256xf32>
    %58 = arith.mulf %24, %57 : vector<4x256xf32>
    %c0_27 = arith.constant 0 : index
    %c6_28 = arith.constant 6 : index
    %59 = vector.load %arg4[%c0_27, %c6_28] : memref<4x27xf32, #tpu.memory_space<vmem>>, vector<4x1xf32>
    %60 = vector.broadcast %59 : vector<4x1xf32> to vector<4x256xf32>
    %61 = arith.mulf %27, %60 : vector<4x256xf32>
    %62 = arith.addf %58, %61 : vector<4x256xf32>
    %c0_29 = arith.constant 0 : index
    %c7_30 = arith.constant 7 : index
    %63 = vector.load %arg4[%c0_29, %c7_30] : memref<4x27xf32, #tpu.memory_space<vmem>>, vector<4x1xf32>
    %64 = vector.broadcast %63 : vector<4x1xf32> to vector<4x256xf32>
    %65 = arith.mulf %21, %64 : vector<4x256xf32>
    %66 = arith.addf %62, %65 : vector<4x256xf32>
    %c0_31 = arith.constant 0 : index
    %c8 = arith.constant 8 : index
    %67 = vector.load %arg4[%c0_31, %c8] : memref<4x27xf32, #tpu.memory_space<vmem>>, vector<4x1xf32>
    %68 = vector.broadcast %67 : vector<4x1xf32> to vector<4x256xf32>
    %69 = arith.mulf %30, %68 : vector<4x256xf32>
    %70 = arith.addf %66, %69 : vector<4x256xf32>
    %c0_32 = arith.constant 0 : index
    %c9 = arith.constant 9 : index
    %71 = vector.load %arg4[%c0_32, %c9] : memref<4x27xf32, #tpu.memory_space<vmem>>, vector<4x1xf32>
    %72 = vector.broadcast %71 : vector<4x1xf32> to vector<4x256xf32>
    %73 = arith.mulf %33, %72 : vector<4x256xf32>
    %74 = arith.addf %70, %73 : vector<4x256xf32>
    %c16_i32 = arith.constant 16 : i32
    %75 = tpu.dynamic_rotate %74 by %c16_i32 dim 1 : vector<4x256xf32>, i32 -> vector<4x256xf32>
    %76 = vector.broadcast %5 : vector<1x256xf32> to vector<4x256xf32>
    %77 = arith.mulf %75, %76 : vector<4x256xf32>
    %78 = arith.addf %55, %77 : vector<4x256xf32>
    %c0_33 = arith.constant 0 : index
    %c10 = arith.constant 10 : index
    %79 = vector.load %arg4[%c0_33, %c10] : memref<4x27xf32, #tpu.memory_space<vmem>>, vector<4x1xf32>
    %80 = vector.broadcast %79 : vector<4x1xf32> to vector<4x256xf32>
    %81 = arith.mulf %24, %80 : vector<4x256xf32>
    %c0_34 = arith.constant 0 : index
    %c11 = arith.constant 11 : index
    %82 = vector.load %arg4[%c0_34, %c11] : memref<4x27xf32, #tpu.memory_space<vmem>>, vector<4x1xf32>
    %83 = vector.broadcast %82 : vector<4x1xf32> to vector<4x256xf32>
    %84 = arith.mulf %27, %83 : vector<4x256xf32>
    %85 = arith.addf %81, %84 : vector<4x256xf32>
    %c0_35 = arith.constant 0 : index
    %c12 = arith.constant 12 : index
    %86 = vector.load %arg4[%c0_35, %c12] : memref<4x27xf32, #tpu.memory_space<vmem>>, vector<4x1xf32>
    %87 = vector.broadcast %86 : vector<4x1xf32> to vector<4x256xf32>
    %88 = arith.mulf %21, %87 : vector<4x256xf32>
    %89 = arith.addf %85, %88 : vector<4x256xf32>
    %c0_36 = arith.constant 0 : index
    %c13 = arith.constant 13 : index
    %90 = vector.load %arg4[%c0_36, %c13] : memref<4x27xf32, #tpu.memory_space<vmem>>, vector<4x1xf32>
    %91 = vector.broadcast %90 : vector<4x1xf32> to vector<4x256xf32>
    %92 = arith.mulf %30, %91 : vector<4x256xf32>
    %93 = arith.addf %89, %92 : vector<4x256xf32>
    %c0_37 = arith.constant 0 : index
    %c14 = arith.constant 14 : index
    %94 = vector.load %arg4[%c0_37, %c14] : memref<4x27xf32, #tpu.memory_space<vmem>>, vector<4x1xf32>
    %95 = vector.broadcast %94 : vector<4x1xf32> to vector<4x256xf32>
    %96 = arith.mulf %33, %95 : vector<4x256xf32>
    %97 = arith.addf %93, %96 : vector<4x256xf32>
    %98 = arith.addf %78, %97 : vector<4x256xf32>
    %c0_38 = arith.constant 0 : index
    %c15 = arith.constant 15 : index
    %99 = vector.load %arg4[%c0_38, %c15] : memref<4x27xf32, #tpu.memory_space<vmem>>, vector<4x1xf32>
    %100 = vector.broadcast %99 : vector<4x1xf32> to vector<4x256xf32>
    %101 = arith.mulf %24, %100 : vector<4x256xf32>
    %c0_39 = arith.constant 0 : index
    %c16 = arith.constant 16 : index
    %102 = vector.load %arg4[%c0_39, %c16] : memref<4x27xf32, #tpu.memory_space<vmem>>, vector<4x1xf32>
    %103 = vector.broadcast %102 : vector<4x1xf32> to vector<4x256xf32>
    %104 = arith.mulf %27, %103 : vector<4x256xf32>
    %105 = arith.addf %101, %104 : vector<4x256xf32>
    %c0_40 = arith.constant 0 : index
    %c17 = arith.constant 17 : index
    %106 = vector.load %arg4[%c0_40, %c17] : memref<4x27xf32, #tpu.memory_space<vmem>>, vector<4x1xf32>
    %107 = vector.broadcast %106 : vector<4x1xf32> to vector<4x256xf32>
    %108 = arith.mulf %21, %107 : vector<4x256xf32>
    %109 = arith.addf %105, %108 : vector<4x256xf32>
    %c0_41 = arith.constant 0 : index
    %c18 = arith.constant 18 : index
    %110 = vector.load %arg4[%c0_41, %c18] : memref<4x27xf32, #tpu.memory_space<vmem>>, vector<4x1xf32>
    %111 = vector.broadcast %110 : vector<4x1xf32> to vector<4x256xf32>
    %112 = arith.mulf %30, %111 : vector<4x256xf32>
    %113 = arith.addf %109, %112 : vector<4x256xf32>
    %c0_42 = arith.constant 0 : index
    %c19 = arith.constant 19 : index
    %114 = vector.load %arg4[%c0_42, %c19] : memref<4x27xf32, #tpu.memory_space<vmem>>, vector<4x1xf32>
    %115 = vector.broadcast %114 : vector<4x1xf32> to vector<4x256xf32>
    %116 = arith.mulf %33, %115 : vector<4x256xf32>
    %117 = arith.addf %113, %116 : vector<4x256xf32>
    %c240_i32 = arith.constant 240 : i32
    %118 = tpu.dynamic_rotate %117 by %c240_i32 dim 1 : vector<4x256xf32>, i32 -> vector<4x256xf32>
    %119 = vector.broadcast %6 : vector<1x256xf32> to vector<4x256xf32>
    %120 = arith.mulf %118, %119 : vector<4x256xf32>
    %121 = arith.addf %98, %120 : vector<4x256xf32>
    %c0_43 = arith.constant 0 : index
    %c20 = arith.constant 20 : index
    %122 = vector.load %arg4[%c0_43, %c20] : memref<4x27xf32, #tpu.memory_space<vmem>>, vector<4x1xf32>
    %123 = vector.broadcast %122 : vector<4x1xf32> to vector<4x256xf32>
    %124 = arith.mulf %24, %123 : vector<4x256xf32>
    %c0_44 = arith.constant 0 : index
    %c21 = arith.constant 21 : index
    %125 = vector.load %arg4[%c0_44, %c21] : memref<4x27xf32, #tpu.memory_space<vmem>>, vector<4x1xf32>
    %126 = vector.broadcast %125 : vector<4x1xf32> to vector<4x256xf32>
    %127 = arith.mulf %27, %126 : vector<4x256xf32>
    %128 = arith.addf %124, %127 : vector<4x256xf32>
    %c0_45 = arith.constant 0 : index
    %c22 = arith.constant 22 : index
    %129 = vector.load %arg4[%c0_45, %c22] : memref<4x27xf32, #tpu.memory_space<vmem>>, vector<4x1xf32>
    %130 = vector.broadcast %129 : vector<4x1xf32> to vector<4x256xf32>
    %131 = arith.mulf %21, %130 : vector<4x256xf32>
    %132 = arith.addf %128, %131 : vector<4x256xf32>
    %c0_46 = arith.constant 0 : index
    %c23 = arith.constant 23 : index
    %133 = vector.load %arg4[%c0_46, %c23] : memref<4x27xf32, #tpu.memory_space<vmem>>, vector<4x1xf32>
    %134 = vector.broadcast %133 : vector<4x1xf32> to vector<4x256xf32>
    %135 = arith.mulf %30, %134 : vector<4x256xf32>
    %136 = arith.addf %132, %135 : vector<4x256xf32>
    %c0_47 = arith.constant 0 : index
    %c24 = arith.constant 24 : index
    %137 = vector.load %arg4[%c0_47, %c24] : memref<4x27xf32, #tpu.memory_space<vmem>>, vector<4x1xf32>
    %138 = vector.broadcast %137 : vector<4x1xf32> to vector<4x256xf32>
    %139 = arith.mulf %33, %138 : vector<4x256xf32>
    %140 = arith.addf %136, %139 : vector<4x256xf32>
    %c224_i32 = arith.constant 224 : i32
    %141 = tpu.dynamic_rotate %140 by %c224_i32 dim 1 : vector<4x256xf32>, i32 -> vector<4x256xf32>
    %142 = vector.broadcast %7 : vector<1x256xf32> to vector<4x256xf32>
    %143 = arith.mulf %141, %142 : vector<4x256xf32>
    %144 = arith.addf %121, %143 : vector<4x256xf32>
    %c0_48 = arith.constant 0 : index
    %c26 = arith.constant 26 : index
    %145 = vector.load %arg4[%c0_48, %c26] : memref<4x27xf32, #tpu.memory_space<vmem>>, vector<4x1xf32>
    %146 = vector.broadcast %145 : vector<4x1xf32> to vector<4x256xf32>
    %147 = arith.addf %144, %146 : vector<4x256xf32>
    %148 = arith.negf %147 : vector<4x256xf32>
    %149 = math.exp %148 : vector<4x256xf32>
    %cst_49 = arith.constant 1.000000e+00 : f32
    %150 = vector.broadcast %cst_49 : f32 to vector<4x256xf32>
    %151 = arith.addf %150, %149 : vector<4x256xf32>
    %152 = arith.divf %150, %151 : vector<4x256xf32>
    %153 = arith.mulf %147, %152 : vector<4x256xf32>
    %c0_50 = arith.constant 0 : index
    %c0_51 = arith.constant 0 : index
    %c0_52 = arith.constant 0 : index
    %154 = vector.load %arg3[%c0_50, %c0_51, %c0_52] : memref<2x8x4xbf16, #tpu.memory_space<vmem>>, vector<1x8x4xbf16>
    %155 = vector.shape_cast %154 : vector<1x8x4xbf16> to vector<8x4xbf16>
    %156 = arith.truncf %21 : vector<4x256xf32> to vector<4x256xbf16>
    %cst_53 = arith.constant dense<0.000000e+00> : vector<8x256xf32>
    %157 = tpu.matmul %155, %156, %cst_53 {dimension_numbers = #tpu.dot_dimension_numbers<[1], [0], [0], [1], [0, 0, 1, 1], [], []>} : vector<8x4xbf16>, vector<4x256xbf16>, vector<8x256xf32> -> vector<8x256xf32>
    %c1_54 = arith.constant 1 : index
    %c0_55 = arith.constant 0 : index
    %c0_56 = arith.constant 0 : index
    %158 = vector.load %arg3[%c1_54, %c0_55, %c0_56] : memref<2x8x4xbf16, #tpu.memory_space<vmem>>, vector<1x8x4xbf16>
    %159 = vector.shape_cast %158 : vector<1x8x4xbf16> to vector<8x4xbf16>
    %160 = arith.truncf %153 : vector<4x256xf32> to vector<4x256xbf16>
    %cst_57 = arith.constant dense<0.000000e+00> : vector<8x256xf32>
    %161 = tpu.matmul %159, %160, %cst_57 {dimension_numbers = #tpu.dot_dimension_numbers<[1], [0], [0], [1], [0, 0, 1, 1], [], []>} : vector<8x4xbf16>, vector<4x256xbf16>, vector<8x256xf32> -> vector<8x256xf32>
    %162 = arith.addf %157, %161 : vector<8x256xf32>
    %c0_58 = arith.constant 0 : index
    %c25_59 = arith.constant 25 : index
    %163 = vector.load %arg5[%c0_58, %c25_59] : memref<8x27xf32, #tpu.memory_space<vmem>>, vector<8x1xf32>
    %164 = vector.broadcast %163 : vector<8x1xf32> to vector<8x256xf32>
    %165 = arith.addf %162, %164 : vector<8x256xf32>
    %c2_i32_60 = arith.constant 2 : i32
    %166 = tpu.dynamic_rotate %165 by %c2_i32_60 dim 1 : vector<8x256xf32>, i32 -> vector<8x256xf32>
    %167 = vector.broadcast %0 : vector<1x256xf32> to vector<8x256xf32>
    %168 = arith.mulf %166, %167 : vector<8x256xf32>
    %c1_i32_61 = arith.constant 1 : i32
    %169 = tpu.dynamic_rotate %165 by %c1_i32_61 dim 1 : vector<8x256xf32>, i32 -> vector<8x256xf32>
    %170 = vector.broadcast %1 : vector<1x256xf32> to vector<8x256xf32>
    %171 = arith.mulf %169, %170 : vector<8x256xf32>
    %c255_i32_62 = arith.constant 255 : i32
    %172 = tpu.dynamic_rotate %165 by %c255_i32_62 dim 1 : vector<8x256xf32>, i32 -> vector<8x256xf32>
    %173 = vector.broadcast %2 : vector<1x256xf32> to vector<8x256xf32>
    %174 = arith.mulf %172, %173 : vector<8x256xf32>
    %c254_i32_63 = arith.constant 254 : i32
    %175 = tpu.dynamic_rotate %165 by %c254_i32_63 dim 1 : vector<8x256xf32>, i32 -> vector<8x256xf32>
    %176 = vector.broadcast %3 : vector<1x256xf32> to vector<8x256xf32>
    %177 = arith.mulf %175, %176 : vector<8x256xf32>
    %c0_64 = arith.constant 0 : index
    %c0_65 = arith.constant 0 : index
    %178 = vector.load %arg5[%c0_64, %c0_65] : memref<8x27xf32, #tpu.memory_space<vmem>>, vector<8x1xf32>
    %179 = vector.broadcast %178 : vector<8x1xf32> to vector<8x256xf32>
    %180 = arith.mulf %168, %179 : vector<8x256xf32>
    %c0_66 = arith.constant 0 : index
    %c1_67 = arith.constant 1 : index
    %181 = vector.load %arg5[%c0_66, %c1_67] : memref<8x27xf32, #tpu.memory_space<vmem>>, vector<8x1xf32>
    %182 = vector.broadcast %181 : vector<8x1xf32> to vector<8x256xf32>
    %183 = arith.mulf %171, %182 : vector<8x256xf32>
    %184 = arith.addf %180, %183 : vector<8x256xf32>
    %c0_68 = arith.constant 0 : index
    %c2_69 = arith.constant 2 : index
    %185 = vector.load %arg5[%c0_68, %c2_69] : memref<8x27xf32, #tpu.memory_space<vmem>>, vector<8x1xf32>
    %186 = vector.broadcast %185 : vector<8x1xf32> to vector<8x256xf32>
    %187 = arith.mulf %165, %186 : vector<8x256xf32>
    %188 = arith.addf %184, %187 : vector<8x256xf32>
    %c0_70 = arith.constant 0 : index
    %c3_71 = arith.constant 3 : index
    %189 = vector.load %arg5[%c0_70, %c3_71] : memref<8x27xf32, #tpu.memory_space<vmem>>, vector<8x1xf32>
    %190 = vector.broadcast %189 : vector<8x1xf32> to vector<8x256xf32>
    %191 = arith.mulf %174, %190 : vector<8x256xf32>
    %192 = arith.addf %188, %191 : vector<8x256xf32>
    %c0_72 = arith.constant 0 : index
    %c4_73 = arith.constant 4 : index
    %193 = vector.load %arg5[%c0_72, %c4_73] : memref<8x27xf32, #tpu.memory_space<vmem>>, vector<8x1xf32>
    %194 = vector.broadcast %193 : vector<8x1xf32> to vector<8x256xf32>
    %195 = arith.mulf %177, %194 : vector<8x256xf32>
    %196 = arith.addf %192, %195 : vector<8x256xf32>
    %c32_i32_74 = arith.constant 32 : i32
    %197 = tpu.dynamic_rotate %196 by %c32_i32_74 dim 1 : vector<8x256xf32>, i32 -> vector<8x256xf32>
    %198 = vector.broadcast %4 : vector<1x256xf32> to vector<8x256xf32>
    %199 = arith.mulf %197, %198 : vector<8x256xf32>
    %c0_75 = arith.constant 0 : index
    %c5_76 = arith.constant 5 : index
    %200 = vector.load %arg5[%c0_75, %c5_76] : memref<8x27xf32, #tpu.memory_space<vmem>>, vector<8x1xf32>
    %201 = vector.broadcast %200 : vector<8x1xf32> to vector<8x256xf32>
    %202 = arith.mulf %168, %201 : vector<8x256xf32>
    %c0_77 = arith.constant 0 : index
    %c6_78 = arith.constant 6 : index
    %203 = vector.load %arg5[%c0_77, %c6_78] : memref<8x27xf32, #tpu.memory_space<vmem>>, vector<8x1xf32>
    %204 = vector.broadcast %203 : vector<8x1xf32> to vector<8x256xf32>
    %205 = arith.mulf %171, %204 : vector<8x256xf32>
    %206 = arith.addf %202, %205 : vector<8x256xf32>
    %c0_79 = arith.constant 0 : index
    %c7_80 = arith.constant 7 : index
    %207 = vector.load %arg5[%c0_79, %c7_80] : memref<8x27xf32, #tpu.memory_space<vmem>>, vector<8x1xf32>
    %208 = vector.broadcast %207 : vector<8x1xf32> to vector<8x256xf32>
    %209 = arith.mulf %165, %208 : vector<8x256xf32>
    %210 = arith.addf %206, %209 : vector<8x256xf32>
    %c0_81 = arith.constant 0 : index
    %c8_82 = arith.constant 8 : index
    %211 = vector.load %arg5[%c0_81, %c8_82] : memref<8x27xf32, #tpu.memory_space<vmem>>, vector<8x1xf32>
    %212 = vector.broadcast %211 : vector<8x1xf32> to vector<8x256xf32>
    %213 = arith.mulf %174, %212 : vector<8x256xf32>
    %214 = arith.addf %210, %213 : vector<8x256xf32>
    %c0_83 = arith.constant 0 : index
    %c9_84 = arith.constant 9 : index
    %215 = vector.load %arg5[%c0_83, %c9_84] : memref<8x27xf32, #tpu.memory_space<vmem>>, vector<8x1xf32>
    %216 = vector.broadcast %215 : vector<8x1xf32> to vector<8x256xf32>
    %217 = arith.mulf %177, %216 : vector<8x256xf32>
    %218 = arith.addf %214, %217 : vector<8x256xf32>
    %c16_i32_85 = arith.constant 16 : i32
    %219 = tpu.dynamic_rotate %218 by %c16_i32_85 dim 1 : vector<8x256xf32>, i32 -> vector<8x256xf32>
    %220 = vector.broadcast %5 : vector<1x256xf32> to vector<8x256xf32>
    %221 = arith.mulf %219, %220 : vector<8x256xf32>
    %222 = arith.addf %199, %221 : vector<8x256xf32>
    %c0_86 = arith.constant 0 : index
    %c10_87 = arith.constant 10 : index
    %223 = vector.load %arg5[%c0_86, %c10_87] : memref<8x27xf32, #tpu.memory_space<vmem>>, vector<8x1xf32>
    %224 = vector.broadcast %223 : vector<8x1xf32> to vector<8x256xf32>
    %225 = arith.mulf %168, %224 : vector<8x256xf32>
    %c0_88 = arith.constant 0 : index
    %c11_89 = arith.constant 11 : index
    %226 = vector.load %arg5[%c0_88, %c11_89] : memref<8x27xf32, #tpu.memory_space<vmem>>, vector<8x1xf32>
    %227 = vector.broadcast %226 : vector<8x1xf32> to vector<8x256xf32>
    %228 = arith.mulf %171, %227 : vector<8x256xf32>
    %229 = arith.addf %225, %228 : vector<8x256xf32>
    %c0_90 = arith.constant 0 : index
    %c12_91 = arith.constant 12 : index
    %230 = vector.load %arg5[%c0_90, %c12_91] : memref<8x27xf32, #tpu.memory_space<vmem>>, vector<8x1xf32>
    %231 = vector.broadcast %230 : vector<8x1xf32> to vector<8x256xf32>
    %232 = arith.mulf %165, %231 : vector<8x256xf32>
    %233 = arith.addf %229, %232 : vector<8x256xf32>
    %c0_92 = arith.constant 0 : index
    %c13_93 = arith.constant 13 : index
    %234 = vector.load %arg5[%c0_92, %c13_93] : memref<8x27xf32, #tpu.memory_space<vmem>>, vector<8x1xf32>
    %235 = vector.broadcast %234 : vector<8x1xf32> to vector<8x256xf32>
    %236 = arith.mulf %174, %235 : vector<8x256xf32>
    %237 = arith.addf %233, %236 : vector<8x256xf32>
    %c0_94 = arith.constant 0 : index
    %c14_95 = arith.constant 14 : index
    %238 = vector.load %arg5[%c0_94, %c14_95] : memref<8x27xf32, #tpu.memory_space<vmem>>, vector<8x1xf32>
    %239 = vector.broadcast %238 : vector<8x1xf32> to vector<8x256xf32>
    %240 = arith.mulf %177, %239 : vector<8x256xf32>
    %241 = arith.addf %237, %240 : vector<8x256xf32>
    %242 = arith.addf %222, %241 : vector<8x256xf32>
    %c0_96 = arith.constant 0 : index
    %c15_97 = arith.constant 15 : index
    %243 = vector.load %arg5[%c0_96, %c15_97] : memref<8x27xf32, #tpu.memory_space<vmem>>, vector<8x1xf32>
    %244 = vector.broadcast %243 : vector<8x1xf32> to vector<8x256xf32>
    %245 = arith.mulf %168, %244 : vector<8x256xf32>
    %c0_98 = arith.constant 0 : index
    %c16_99 = arith.constant 16 : index
    %246 = vector.load %arg5[%c0_98, %c16_99] : memref<8x27xf32, #tpu.memory_space<vmem>>, vector<8x1xf32>
    %247 = vector.broadcast %246 : vector<8x1xf32> to vector<8x256xf32>
    %248 = arith.mulf %171, %247 : vector<8x256xf32>
    %249 = arith.addf %245, %248 : vector<8x256xf32>
    %c0_100 = arith.constant 0 : index
    %c17_101 = arith.constant 17 : index
    %250 = vector.load %arg5[%c0_100, %c17_101] : memref<8x27xf32, #tpu.memory_space<vmem>>, vector<8x1xf32>
    %251 = vector.broadcast %250 : vector<8x1xf32> to vector<8x256xf32>
    %252 = arith.mulf %165, %251 : vector<8x256xf32>
    %253 = arith.addf %249, %252 : vector<8x256xf32>
    %c0_102 = arith.constant 0 : index
    %c18_103 = arith.constant 18 : index
    %254 = vector.load %arg5[%c0_102, %c18_103] : memref<8x27xf32, #tpu.memory_space<vmem>>, vector<8x1xf32>
    %255 = vector.broadcast %254 : vector<8x1xf32> to vector<8x256xf32>
    %256 = arith.mulf %174, %255 : vector<8x256xf32>
    %257 = arith.addf %253, %256 : vector<8x256xf32>
    %c0_104 = arith.constant 0 : index
    %c19_105 = arith.constant 19 : index
    %258 = vector.load %arg5[%c0_104, %c19_105] : memref<8x27xf32, #tpu.memory_space<vmem>>, vector<8x1xf32>
    %259 = vector.broadcast %258 : vector<8x1xf32> to vector<8x256xf32>
    %260 = arith.mulf %177, %259 : vector<8x256xf32>
    %261 = arith.addf %257, %260 : vector<8x256xf32>
    %c240_i32_106 = arith.constant 240 : i32
    %262 = tpu.dynamic_rotate %261 by %c240_i32_106 dim 1 : vector<8x256xf32>, i32 -> vector<8x256xf32>
    %263 = vector.broadcast %6 : vector<1x256xf32> to vector<8x256xf32>
    %264 = arith.mulf %262, %263 : vector<8x256xf32>
    %265 = arith.addf %242, %264 : vector<8x256xf32>
    %c0_107 = arith.constant 0 : index
    %c20_108 = arith.constant 20 : index
    %266 = vector.load %arg5[%c0_107, %c20_108] : memref<8x27xf32, #tpu.memory_space<vmem>>, vector<8x1xf32>
    %267 = vector.broadcast %266 : vector<8x1xf32> to vector<8x256xf32>
    %268 = arith.mulf %168, %267 : vector<8x256xf32>
    %c0_109 = arith.constant 0 : index
    %c21_110 = arith.constant 21 : index
    %269 = vector.load %arg5[%c0_109, %c21_110] : memref<8x27xf32, #tpu.memory_space<vmem>>, vector<8x1xf32>
    %270 = vector.broadcast %269 : vector<8x1xf32> to vector<8x256xf32>
    %271 = arith.mulf %171, %270 : vector<8x256xf32>
    %272 = arith.addf %268, %271 : vector<8x256xf32>
    %c0_111 = arith.constant 0 : index
    %c22_112 = arith.constant 22 : index
    %273 = vector.load %arg5[%c0_111, %c22_112] : memref<8x27xf32, #tpu.memory_space<vmem>>, vector<8x1xf32>
    %274 = vector.broadcast %273 : vector<8x1xf32> to vector<8x256xf32>
    %275 = arith.mulf %165, %274 : vector<8x256xf32>
    %276 = arith.addf %272, %275 : vector<8x256xf32>
    %c0_113 = arith.constant 0 : index
    %c23_114 = arith.constant 23 : index
    %277 = vector.load %arg5[%c0_113, %c23_114] : memref<8x27xf32, #tpu.memory_space<vmem>>, vector<8x1xf32>
    %278 = vector.broadcast %277 : vector<8x1xf32> to vector<8x256xf32>
    %279 = arith.mulf %174, %278 : vector<8x256xf32>
    %280 = arith.addf %276, %279 : vector<8x256xf32>
    %c0_115 = arith.constant 0 : index
    %c24_116 = arith.constant 24 : index
    %281 = vector.load %arg5[%c0_115, %c24_116] : memref<8x27xf32, #tpu.memory_space<vmem>>, vector<8x1xf32>
    %282 = vector.broadcast %281 : vector<8x1xf32> to vector<8x256xf32>
    %283 = arith.mulf %177, %282 : vector<8x256xf32>
    %284 = arith.addf %280, %283 : vector<8x256xf32>
    %c224_i32_117 = arith.constant 224 : i32
    %285 = tpu.dynamic_rotate %284 by %c224_i32_117 dim 1 : vector<8x256xf32>, i32 -> vector<8x256xf32>
    %286 = vector.broadcast %7 : vector<1x256xf32> to vector<8x256xf32>
    %287 = arith.mulf %285, %286 : vector<8x256xf32>
    %288 = arith.addf %265, %287 : vector<8x256xf32>
    %c0_118 = arith.constant 0 : index
    %c26_119 = arith.constant 26 : index
    %289 = vector.load %arg5[%c0_118, %c26_119] : memref<8x27xf32, #tpu.memory_space<vmem>>, vector<8x1xf32>
    %290 = vector.broadcast %289 : vector<8x1xf32> to vector<8x256xf32>
    %291 = arith.addf %288, %290 : vector<8x256xf32>
    %292 = vector.extract_strided_slice %9 {offsets = [0, 0], sizes = [8, 256], strides = [1, 1]} : vector<16x256xf32> to vector<8x256xf32>
    %293 = arith.addf %165, %292 : vector<8x256xf32>
    %c0_120 = arith.constant 0 : index
    %c0_121 = arith.constant 0 : index
    %c0_122 = arith.constant 0 : index
    %294 = vector.load %arg7[%c0_120, %c0_121, %c0_122] : memref<2x16x256xf32, #tpu.memory_space<vmem>>, vector<1x8x256xf32>
    %295 = vector.shape_cast %294 : vector<1x8x256xf32> to vector<8x256xf32>
    %296 = vector.shape_cast %293 : vector<8x256xf32> to vector<1x8x256xf32>
    tpu.vector_store %arg7[%c0_120, %c0_121, %c0_122], %296 {strides = array<i32>} : memref<2x16x256xf32, #tpu.memory_space<vmem>>, vector<1x8x256xf32>,
    %297 = vector.extract_strided_slice %9 {offsets = [8, 0], sizes = [8, 256], strides = [1, 1]} : vector<16x256xf32> to vector<8x256xf32>
    %298 = arith.addf %291, %297 : vector<8x256xf32>
    %c0_123 = arith.constant 0 : index
    %c8_124 = arith.constant 8 : index
    %c0_125 = arith.constant 0 : index
    %299 = vector.load %arg7[%c0_123, %c8_124, %c0_125] : memref<2x16x256xf32, #tpu.memory_space<vmem>>, vector<1x8x256xf32>
    %300 = vector.shape_cast %299 : vector<1x8x256xf32> to vector<8x256xf32>
    %301 = vector.shape_cast %298 : vector<8x256xf32> to vector<1x8x256xf32>
    tpu.vector_store %arg7[%c0_123, %c8_124, %c0_125], %301 {strides = array<i32>} : memref<2x16x256xf32, #tpu.memory_space<vmem>>, vector<1x8x256xf32>,
    %c1_126 = arith.constant 1 : index
    %c0_127 = arith.constant 0 : index
    %c0_128 = arith.constant 0 : index
    %302 = vector.load %arg1[%c1_126, %c0_127, %c0_128] : memref<2x16x256xf32, #tpu.memory_space<vmem>>, vector<1x16x256xf32>
    %303 = vector.shape_cast %302 : vector<1x16x256xf32> to vector<16x256xf32>
    %c0_129 = arith.constant 0 : index
    %c0_130 = arith.constant 0 : index
    %304 = vector.load %arg2[%c0_129, %c0_130] : memref<4x16xbf16, #tpu.memory_space<vmem>>, vector<4x16xbf16>
    %305 = arith.truncf %303 : vector<16x256xf32> to vector<16x256xbf16>
    %cst_131 = arith.constant dense<0.000000e+00> : vector<4x256xf32>
    %306 = tpu.matmul %304, %305, %cst_131 {dimension_numbers = #tpu.dot_dimension_numbers<[1], [0], [0], [1], [0, 0, 1, 1], [], []>} : vector<4x16xbf16>, vector<16x256xbf16>, vector<4x256xf32> -> vector<4x256xf32>
    %c0_132 = arith.constant 0 : index
    %c25_133 = arith.constant 25 : index
    %307 = vector.load %arg4[%c0_132, %c25_133] : memref<4x27xf32, #tpu.memory_space<vmem>>, vector<4x1xf32>
    %308 = vector.broadcast %307 : vector<4x1xf32> to vector<4x256xf32>
    %309 = arith.addf %306, %308 : vector<4x256xf32>
    %310 = arith.negf %309 : vector<4x256xf32>
    %311 = math.exp %310 : vector<4x256xf32>
    %cst_134 = arith.constant 1.000000e+00 : f32
    %312 = vector.broadcast %cst_134 : f32 to vector<4x256xf32>
    %313 = arith.addf %312, %311 : vector<4x256xf32>
    %314 = arith.divf %312, %313 : vector<4x256xf32>
    %315 = arith.mulf %309, %314 : vector<4x256xf32>
    %c2_i32_135 = arith.constant 2 : i32
    %316 = tpu.dynamic_rotate %315 by %c2_i32_135 dim 1 : vector<4x256xf32>, i32 -> vector<4x256xf32>
    %317 = vector.broadcast %0 : vector<1x256xf32> to vector<4x256xf32>
    %318 = arith.mulf %316, %317 : vector<4x256xf32>
    %c1_i32_136 = arith.constant 1 : i32
    %319 = tpu.dynamic_rotate %315 by %c1_i32_136 dim 1 : vector<4x256xf32>, i32 -> vector<4x256xf32>
    %320 = vector.broadcast %1 : vector<1x256xf32> to vector<4x256xf32>
    %321 = arith.mulf %319, %320 : vector<4x256xf32>
    %c255_i32_137 = arith.constant 255 : i32
    %322 = tpu.dynamic_rotate %315 by %c255_i32_137 dim 1 : vector<4x256xf32>, i32 -> vector<4x256xf32>
    %323 = vector.broadcast %2 : vector<1x256xf32> to vector<4x256xf32>
    %324 = arith.mulf %322, %323 : vector<4x256xf32>
    %c254_i32_138 = arith.constant 254 : i32
    %325 = tpu.dynamic_rotate %315 by %c254_i32_138 dim 1 : vector<4x256xf32>, i32 -> vector<4x256xf32>
    %326 = vector.broadcast %3 : vector<1x256xf32> to vector<4x256xf32>
    %327 = arith.mulf %325, %326 : vector<4x256xf32>
    %c0_139 = arith.constant 0 : index
    %c0_140 = arith.constant 0 : index
    %328 = vector.load %arg4[%c0_139, %c0_140] : memref<4x27xf32, #tpu.memory_space<vmem>>, vector<4x1xf32>
    %329 = vector.broadcast %328 : vector<4x1xf32> to vector<4x256xf32>
    %330 = arith.mulf %318, %329 : vector<4x256xf32>
    %c0_141 = arith.constant 0 : index
    %c1_142 = arith.constant 1 : index
    %331 = vector.load %arg4[%c0_141, %c1_142] : memref<4x27xf32, #tpu.memory_space<vmem>>, vector<4x1xf32>
    %332 = vector.broadcast %331 : vector<4x1xf32> to vector<4x256xf32>
    %333 = arith.mulf %321, %332 : vector<4x256xf32>
    %334 = arith.addf %330, %333 : vector<4x256xf32>
    %c0_143 = arith.constant 0 : index
    %c2_144 = arith.constant 2 : index
    %335 = vector.load %arg4[%c0_143, %c2_144] : memref<4x27xf32, #tpu.memory_space<vmem>>, vector<4x1xf32>
    %336 = vector.broadcast %335 : vector<4x1xf32> to vector<4x256xf32>
    %337 = arith.mulf %315, %336 : vector<4x256xf32>
    %338 = arith.addf %334, %337 : vector<4x256xf32>
    %c0_145 = arith.constant 0 : index
    %c3_146 = arith.constant 3 : index
    %339 = vector.load %arg4[%c0_145, %c3_146] : memref<4x27xf32, #tpu.memory_space<vmem>>, vector<4x1xf32>
    %340 = vector.broadcast %339 : vector<4x1xf32> to vector<4x256xf32>
    %341 = arith.mulf %324, %340 : vector<4x256xf32>
    %342 = arith.addf %338, %341 : vector<4x256xf32>
    %c0_147 = arith.constant 0 : index
    %c4_148 = arith.constant 4 : index
    %343 = vector.load %arg4[%c0_147, %c4_148] : memref<4x27xf32, #tpu.memory_space<vmem>>, vector<4x1xf32>
    %344 = vector.broadcast %343 : vector<4x1xf32> to vector<4x256xf32>
    %345 = arith.mulf %327, %344 : vector<4x256xf32>
    %346 = arith.addf %342, %345 : vector<4x256xf32>
    %c32_i32_149 = arith.constant 32 : i32
    %347 = tpu.dynamic_rotate %346 by %c32_i32_149 dim 1 : vector<4x256xf32>, i32 -> vector<4x256xf32>
    %348 = vector.broadcast %4 : vector<1x256xf32> to vector<4x256xf32>
    %349 = arith.mulf %347, %348 : vector<4x256xf32>
    %c0_150 = arith.constant 0 : index
    %c5_151 = arith.constant 5 : index
    %350 = vector.load %arg4[%c0_150, %c5_151] : memref<4x27xf32, #tpu.memory_space<vmem>>, vector<4x1xf32>
    %351 = vector.broadcast %350 : vector<4x1xf32> to vector<4x256xf32>
    %352 = arith.mulf %318, %351 : vector<4x256xf32>
    %c0_152 = arith.constant 0 : index
    %c6_153 = arith.constant 6 : index
    %353 = vector.load %arg4[%c0_152, %c6_153] : memref<4x27xf32, #tpu.memory_space<vmem>>, vector<4x1xf32>
    %354 = vector.broadcast %353 : vector<4x1xf32> to vector<4x256xf32>
    %355 = arith.mulf %321, %354 : vector<4x256xf32>
    %356 = arith.addf %352, %355 : vector<4x256xf32>
    %c0_154 = arith.constant 0 : index
    %c7_155 = arith.constant 7 : index
    %357 = vector.load %arg4[%c0_154, %c7_155] : memref<4x27xf32, #tpu.memory_space<vmem>>, vector<4x1xf32>
    %358 = vector.broadcast %357 : vector<4x1xf32> to vector<4x256xf32>
    %359 = arith.mulf %315, %358 : vector<4x256xf32>
    %360 = arith.addf %356, %359 : vector<4x256xf32>
    %c0_156 = arith.constant 0 : index
    %c8_157 = arith.constant 8 : index
    %361 = vector.load %arg4[%c0_156, %c8_157] : memref<4x27xf32, #tpu.memory_space<vmem>>, vector<4x1xf32>
    %362 = vector.broadcast %361 : vector<4x1xf32> to vector<4x256xf32>
    %363 = arith.mulf %324, %362 : vector<4x256xf32>
    %364 = arith.addf %360, %363 : vector<4x256xf32>
    %c0_158 = arith.constant 0 : index
    %c9_159 = arith.constant 9 : index
    %365 = vector.load %arg4[%c0_158, %c9_159] : memref<4x27xf32, #tpu.memory_space<vmem>>, vector<4x1xf32>
    %366 = vector.broadcast %365 : vector<4x1xf32> to vector<4x256xf32>
    %367 = arith.mulf %327, %366 : vector<4x256xf32>
    %368 = arith.addf %364, %367 : vector<4x256xf32>
    %c16_i32_160 = arith.constant 16 : i32
    %369 = tpu.dynamic_rotate %368 by %c16_i32_160 dim 1 : vector<4x256xf32>, i32 -> vector<4x256xf32>
    %370 = vector.broadcast %5 : vector<1x256xf32> to vector<4x256xf32>
    %371 = arith.mulf %369, %370 : vector<4x256xf32>
    %372 = arith.addf %349, %371 : vector<4x256xf32>
    %c0_161 = arith.constant 0 : index
    %c10_162 = arith.constant 10 : index
    %373 = vector.load %arg4[%c0_161, %c10_162] : memref<4x27xf32, #tpu.memory_space<vmem>>, vector<4x1xf32>
    %374 = vector.broadcast %373 : vector<4x1xf32> to vector<4x256xf32>
    %375 = arith.mulf %318, %374 : vector<4x256xf32>
    %c0_163 = arith.constant 0 : index
    %c11_164 = arith.constant 11 : index
    %376 = vector.load %arg4[%c0_163, %c11_164] : memref<4x27xf32, #tpu.memory_space<vmem>>, vector<4x1xf32>
    %377 = vector.broadcast %376 : vector<4x1xf32> to vector<4x256xf32>
    %378 = arith.mulf %321, %377 : vector<4x256xf32>
    %379 = arith.addf %375, %378 : vector<4x256xf32>
    %c0_165 = arith.constant 0 : index
    %c12_166 = arith.constant 12 : index
    %380 = vector.load %arg4[%c0_165, %c12_166] : memref<4x27xf32, #tpu.memory_space<vmem>>, vector<4x1xf32>
    %381 = vector.broadcast %380 : vector<4x1xf32> to vector<4x256xf32>
    %382 = arith.mulf %315, %381 : vector<4x256xf32>
    %383 = arith.addf %379, %382 : vector<4x256xf32>
    %c0_167 = arith.constant 0 : index
    %c13_168 = arith.constant 13 : index
    %384 = vector.load %arg4[%c0_167, %c13_168] : memref<4x27xf32, #tpu.memory_space<vmem>>, vector<4x1xf32>
    %385 = vector.broadcast %384 : vector<4x1xf32> to vector<4x256xf32>
    %386 = arith.mulf %324, %385 : vector<4x256xf32>
    %387 = arith.addf %383, %386 : vector<4x256xf32>
    %c0_169 = arith.constant 0 : index
    %c14_170 = arith.constant 14 : index
    %388 = vector.load %arg4[%c0_169, %c14_170] : memref<4x27xf32, #tpu.memory_space<vmem>>, vector<4x1xf32>
    %389 = vector.broadcast %388 : vector<4x1xf32> to vector<4x256xf32>
    %390 = arith.mulf %327, %389 : vector<4x256xf32>
    %391 = arith.addf %387, %390 : vector<4x256xf32>
    %392 = arith.addf %372, %391 : vector<4x256xf32>
    %c0_171 = arith.constant 0 : index
    %c15_172 = arith.constant 15 : index
    %393 = vector.load %arg4[%c0_171, %c15_172] : memref<4x27xf32, #tpu.memory_space<vmem>>, vector<4x1xf32>
    %394 = vector.broadcast %393 : vector<4x1xf32> to vector<4x256xf32>
    %395 = arith.mulf %318, %394 : vector<4x256xf32>
    %c0_173 = arith.constant 0 : index
    %c16_174 = arith.constant 16 : index
    %396 = vector.load %arg4[%c0_173, %c16_174] : memref<4x27xf32, #tpu.memory_space<vmem>>, vector<4x1xf32>
    %397 = vector.broadcast %396 : vector<4x1xf32> to vector<4x256xf32>
    %398 = arith.mulf %321, %397 : vector<4x256xf32>
    %399 = arith.addf %395, %398 : vector<4x256xf32>
    %c0_175 = arith.constant 0 : index
    %c17_176 = arith.constant 17 : index
    %400 = vector.load %arg4[%c0_175, %c17_176] : memref<4x27xf32, #tpu.memory_space<vmem>>, vector<4x1xf32>
    %401 = vector.broadcast %400 : vector<4x1xf32> to vector<4x256xf32>
    %402 = arith.mulf %315, %401 : vector<4x256xf32>
    %403 = arith.addf %399, %402 : vector<4x256xf32>
    %c0_177 = arith.constant 0 : index
    %c18_178 = arith.constant 18 : index
    %404 = vector.load %arg4[%c0_177, %c18_178] : memref<4x27xf32, #tpu.memory_space<vmem>>, vector<4x1xf32>
    %405 = vector.broadcast %404 : vector<4x1xf32> to vector<4x256xf32>
    %406 = arith.mulf %324, %405 : vector<4x256xf32>
    %407 = arith.addf %403, %406 : vector<4x256xf32>
    %c0_179 = arith.constant 0 : index
    %c19_180 = arith.constant 19 : index
    %408 = vector.load %arg4[%c0_179, %c19_180] : memref<4x27xf32, #tpu.memory_space<vmem>>, vector<4x1xf32>
    %409 = vector.broadcast %408 : vector<4x1xf32> to vector<4x256xf32>
    %410 = arith.mulf %327, %409 : vector<4x256xf32>
    %411 = arith.addf %407, %410 : vector<4x256xf32>
    %c240_i32_181 = arith.constant 240 : i32
    %412 = tpu.dynamic_rotate %411 by %c240_i32_181 dim 1 : vector<4x256xf32>, i32 -> vector<4x256xf32>
    %413 = vector.broadcast %6 : vector<1x256xf32> to vector<4x256xf32>
    %414 = arith.mulf %412, %413 : vector<4x256xf32>
    %415 = arith.addf %392, %414 : vector<4x256xf32>
    %c0_182 = arith.constant 0 : index
    %c20_183 = arith.constant 20 : index
    %416 = vector.load %arg4[%c0_182, %c20_183] : memref<4x27xf32, #tpu.memory_space<vmem>>, vector<4x1xf32>
    %417 = vector.broadcast %416 : vector<4x1xf32> to vector<4x256xf32>
    %418 = arith.mulf %318, %417 : vector<4x256xf32>
    %c0_184 = arith.constant 0 : index
    %c21_185 = arith.constant 21 : index
    %419 = vector.load %arg4[%c0_184, %c21_185] : memref<4x27xf32, #tpu.memory_space<vmem>>, vector<4x1xf32>
    %420 = vector.broadcast %419 : vector<4x1xf32> to vector<4x256xf32>
    %421 = arith.mulf %321, %420 : vector<4x256xf32>
    %422 = arith.addf %418, %421 : vector<4x256xf32>
    %c0_186 = arith.constant 0 : index
    %c22_187 = arith.constant 22 : index
    %423 = vector.load %arg4[%c0_186, %c22_187] : memref<4x27xf32, #tpu.memory_space<vmem>>, vector<4x1xf32>
    %424 = vector.broadcast %423 : vector<4x1xf32> to vector<4x256xf32>
    %425 = arith.mulf %315, %424 : vector<4x256xf32>
    %426 = arith.addf %422, %425 : vector<4x256xf32>
    %c0_188 = arith.constant 0 : index
    %c23_189 = arith.constant 23 : index
    %427 = vector.load %arg4[%c0_188, %c23_189] : memref<4x27xf32, #tpu.memory_space<vmem>>, vector<4x1xf32>
    %428 = vector.broadcast %427 : vector<4x1xf32> to vector<4x256xf32>
    %429 = arith.mulf %324, %428 : vector<4x256xf32>
    %430 = arith.addf %426, %429 : vector<4x256xf32>
    %c0_190 = arith.constant 0 : index
    %c24_191 = arith.constant 24 : index
    %431 = vector.load %arg4[%c0_190, %c24_191] : memref<4x27xf32, #tpu.memory_space<vmem>>, vector<4x1xf32>
    %432 = vector.broadcast %431 : vector<4x1xf32> to vector<4x256xf32>
    %433 = arith.mulf %327, %432 : vector<4x256xf32>
    %434 = arith.addf %430, %433 : vector<4x256xf32>
    %c224_i32_192 = arith.constant 224 : i32
    %435 = tpu.dynamic_rotate %434 by %c224_i32_192 dim 1 : vector<4x256xf32>, i32 -> vector<4x256xf32>
    %436 = vector.broadcast %7 : vector<1x256xf32> to vector<4x256xf32>
    %437 = arith.mulf %435, %436 : vector<4x256xf32>
    %438 = arith.addf %415, %437 : vector<4x256xf32>
    %c0_193 = arith.constant 0 : index
    %c26_194 = arith.constant 26 : index
    %439 = vector.load %arg4[%c0_193, %c26_194] : memref<4x27xf32, #tpu.memory_space<vmem>>, vector<4x1xf32>
    %440 = vector.broadcast %439 : vector<4x1xf32> to vector<4x256xf32>
    %441 = arith.addf %438, %440 : vector<4x256xf32>
    %442 = arith.negf %441 : vector<4x256xf32>
    %443 = math.exp %442 : vector<4x256xf32>
    %cst_195 = arith.constant 1.000000e+00 : f32
    %444 = vector.broadcast %cst_195 : f32 to vector<4x256xf32>
    %445 = arith.addf %444, %443 : vector<4x256xf32>
    %446 = arith.divf %444, %445 : vector<4x256xf32>
    %447 = arith.mulf %441, %446 : vector<4x256xf32>
    %c0_196 = arith.constant 0 : index
    %c0_197 = arith.constant 0 : index
    %c0_198 = arith.constant 0 : index
    %448 = vector.load %arg3[%c0_196, %c0_197, %c0_198] : memref<2x8x4xbf16, #tpu.memory_space<vmem>>, vector<1x8x4xbf16>
    %449 = vector.shape_cast %448 : vector<1x8x4xbf16> to vector<8x4xbf16>
    %450 = arith.truncf %315 : vector<4x256xf32> to vector<4x256xbf16>
    %cst_199 = arith.constant dense<0.000000e+00> : vector<8x256xf32>
    %451 = tpu.matmul %449, %450, %cst_199 {dimension_numbers = #tpu.dot_dimension_numbers<[1], [0], [0], [1], [0, 0, 1, 1], [], []>} : vector<8x4xbf16>, vector<4x256xbf16>, vector<8x256xf32> -> vector<8x256xf32>
    %c1_200 = arith.constant 1 : index
    %c0_201 = arith.constant 0 : index
    %c0_202 = arith.constant 0 : index
    %452 = vector.load %arg3[%c1_200, %c0_201, %c0_202] : memref<2x8x4xbf16, #tpu.memory_space<vmem>>, vector<1x8x4xbf16>
    %453 = vector.shape_cast %452 : vector<1x8x4xbf16> to vector<8x4xbf16>
    %454 = arith.truncf %447 : vector<4x256xf32> to vector<4x256xbf16>
    %cst_203 = arith.constant dense<0.000000e+00> : vector<8x256xf32>
    %455 = tpu.matmul %453, %454, %cst_203 {dimension_numbers = #tpu.dot_dimension_numbers<[1], [0], [0], [1], [0, 0, 1, 1], [], []>} : vector<8x4xbf16>, vector<4x256xbf16>, vector<8x256xf32> -> vector<8x256xf32>
    %456 = arith.addf %451, %455 : vector<8x256xf32>
    %c0_204 = arith.constant 0 : index
    %c25_205 = arith.constant 25 : index
    %457 = vector.load %arg5[%c0_204, %c25_205] : memref<8x27xf32, #tpu.memory_space<vmem>>, vector<8x1xf32>
    %458 = vector.broadcast %457 : vector<8x1xf32> to vector<8x256xf32>
    %459 = arith.addf %456, %458 : vector<8x256xf32>
    %c2_i32_206 = arith.constant 2 : i32
    %460 = tpu.dynamic_rotate %459 by %c2_i32_206 dim 1 : vector<8x256xf32>, i32 -> vector<8x256xf32>
    %461 = vector.broadcast %0 : vector<1x256xf32> to vector<8x256xf32>
    %462 = arith.mulf %460, %461 : vector<8x256xf32>
    %c1_i32_207 = arith.constant 1 : i32
    %463 = tpu.dynamic_rotate %459 by %c1_i32_207 dim 1 : vector<8x256xf32>, i32 -> vector<8x256xf32>
    %464 = vector.broadcast %1 : vector<1x256xf32> to vector<8x256xf32>
    %465 = arith.mulf %463, %464 : vector<8x256xf32>
    %c255_i32_208 = arith.constant 255 : i32
    %466 = tpu.dynamic_rotate %459 by %c255_i32_208 dim 1 : vector<8x256xf32>, i32 -> vector<8x256xf32>
    %467 = vector.broadcast %2 : vector<1x256xf32> to vector<8x256xf32>
    %468 = arith.mulf %466, %467 : vector<8x256xf32>
    %c254_i32_209 = arith.constant 254 : i32
    %469 = tpu.dynamic_rotate %459 by %c254_i32_209 dim 1 : vector<8x256xf32>, i32 -> vector<8x256xf32>
    %470 = vector.broadcast %3 : vector<1x256xf32> to vector<8x256xf32>
    %471 = arith.mulf %469, %470 : vector<8x256xf32>
    %c0_210 = arith.constant 0 : index
    %c0_211 = arith.constant 0 : index
    %472 = vector.load %arg5[%c0_210, %c0_211] : memref<8x27xf32, #tpu.memory_space<vmem>>, vector<8x1xf32>
    %473 = vector.broadcast %472 : vector<8x1xf32> to vector<8x256xf32>
    %474 = arith.mulf %462, %473 : vector<8x256xf32>
    %c0_212 = arith.constant 0 : index
    %c1_213 = arith.constant 1 : index
    %475 = vector.load %arg5[%c0_212, %c1_213] : memref<8x27xf32, #tpu.memory_space<vmem>>, vector<8x1xf32>
    %476 = vector.broadcast %475 : vector<8x1xf32> to vector<8x256xf32>
    %477 = arith.mulf %465, %476 : vector<8x256xf32>
    %478 = arith.addf %474, %477 : vector<8x256xf32>
    %c0_214 = arith.constant 0 : index
    %c2_215 = arith.constant 2 : index
    %479 = vector.load %arg5[%c0_214, %c2_215] : memref<8x27xf32, #tpu.memory_space<vmem>>, vector<8x1xf32>
    %480 = vector.broadcast %479 : vector<8x1xf32> to vector<8x256xf32>
    %481 = arith.mulf %459, %480 : vector<8x256xf32>
    %482 = arith.addf %478, %481 : vector<8x256xf32>
    %c0_216 = arith.constant 0 : index
    %c3_217 = arith.constant 3 : index
    %483 = vector.load %arg5[%c0_216, %c3_217] : memref<8x27xf32, #tpu.memory_space<vmem>>, vector<8x1xf32>
    %484 = vector.broadcast %483 : vector<8x1xf32> to vector<8x256xf32>
    %485 = arith.mulf %468, %484 : vector<8x256xf32>
    %486 = arith.addf %482, %485 : vector<8x256xf32>
    %c0_218 = arith.constant 0 : index
    %c4_219 = arith.constant 4 : index
    %487 = vector.load %arg5[%c0_218, %c4_219] : memref<8x27xf32, #tpu.memory_space<vmem>>, vector<8x1xf32>
    %488 = vector.broadcast %487 : vector<8x1xf32> to vector<8x256xf32>
    %489 = arith.mulf %471, %488 : vector<8x256xf32>
    %490 = arith.addf %486, %489 : vector<8x256xf32>
    %c32_i32_220 = arith.constant 32 : i32
    %491 = tpu.dynamic_rotate %490 by %c32_i32_220 dim 1 : vector<8x256xf32>, i32 -> vector<8x256xf32>
    %492 = vector.broadcast %4 : vector<1x256xf32> to vector<8x256xf32>
    %493 = arith.mulf %491, %492 : vector<8x256xf32>
    %c0_221 = arith.constant 0 : index
    %c5_222 = arith.constant 5 : index
    %494 = vector.load %arg5[%c0_221, %c5_222] : memref<8x27xf32, #tpu.memory_space<vmem>>, vector<8x1xf32>
    %495 = vector.broadcast %494 : vector<8x1xf32> to vector<8x256xf32>
    %496 = arith.mulf %462, %495 : vector<8x256xf32>
    %c0_223 = arith.constant 0 : index
    %c6_224 = arith.constant 6 : index
    %497 = vector.load %arg5[%c0_223, %c6_224] : memref<8x27xf32, #tpu.memory_space<vmem>>, vector<8x1xf32>
    %498 = vector.broadcast %497 : vector<8x1xf32> to vector<8x256xf32>
    %499 = arith.mulf %465, %498 : vector<8x256xf32>
    %500 = arith.addf %496, %499 : vector<8x256xf32>
    %c0_225 = arith.constant 0 : index
    %c7_226 = arith.constant 7 : index
    %501 = vector.load %arg5[%c0_225, %c7_226] : memref<8x27xf32, #tpu.memory_space<vmem>>, vector<8x1xf32>
    %502 = vector.broadcast %501 : vector<8x1xf32> to vector<8x256xf32>
    %503 = arith.mulf %459, %502 : vector<8x256xf32>
    %504 = arith.addf %500, %503 : vector<8x256xf32>
    %c0_227 = arith.constant 0 : index
    %c8_228 = arith.constant 8 : index
    %505 = vector.load %arg5[%c0_227, %c8_228] : memref<8x27xf32, #tpu.memory_space<vmem>>, vector<8x1xf32>
    %506 = vector.broadcast %505 : vector<8x1xf32> to vector<8x256xf32>
    %507 = arith.mulf %468, %506 : vector<8x256xf32>
    %508 = arith.addf %504, %507 : vector<8x256xf32>
    %c0_229 = arith.constant 0 : index
    %c9_230 = arith.constant 9 : index
    %509 = vector.load %arg5[%c0_229, %c9_230] : memref<8x27xf32, #tpu.memory_space<vmem>>, vector<8x1xf32>
    %510 = vector.broadcast %509 : vector<8x1xf32> to vector<8x256xf32>
    %511 = arith.mulf %471, %510 : vector<8x256xf32>
    %512 = arith.addf %508, %511 : vector<8x256xf32>
    %c16_i32_231 = arith.constant 16 : i32
    %513 = tpu.dynamic_rotate %512 by %c16_i32_231 dim 1 : vector<8x256xf32>, i32 -> vector<8x256xf32>
    %514 = vector.broadcast %5 : vector<1x256xf32> to vector<8x256xf32>
    %515 = arith.mulf %513, %514 : vector<8x256xf32>
    %516 = arith.addf %493, %515 : vector<8x256xf32>
    %c0_232 = arith.constant 0 : index
    %c10_233 = arith.constant 10 : index
    %517 = vector.load %arg5[%c0_232, %c10_233] : memref<8x27xf32, #tpu.memory_space<vmem>>, vector<8x1xf32>
    %518 = vector.broadcast %517 : vector<8x1xf32> to vector<8x256xf32>
    %519 = arith.mulf %462, %518 : vector<8x256xf32>
    %c0_234 = arith.constant 0 : index
    %c11_235 = arith.constant 11 : index
    %520 = vector.load %arg5[%c0_234, %c11_235] : memref<8x27xf32, #tpu.memory_space<vmem>>, vector<8x1xf32>
    %521 = vector.broadcast %520 : vector<8x1xf32> to vector<8x256xf32>
    %522 = arith.mulf %465, %521 : vector<8x256xf32>
    %523 = arith.addf %519, %522 : vector<8x256xf32>
    %c0_236 = arith.constant 0 : index
    %c12_237 = arith.constant 12 : index
    %524 = vector.load %arg5[%c0_236, %c12_237] : memref<8x27xf32, #tpu.memory_space<vmem>>, vector<8x1xf32>
    %525 = vector.broadcast %524 : vector<8x1xf32> to vector<8x256xf32>
    %526 = arith.mulf %459, %525 : vector<8x256xf32>
    %527 = arith.addf %523, %526 : vector<8x256xf32>
    %c0_238 = arith.constant 0 : index
    %c13_239 = arith.constant 13 : index
    %528 = vector.load %arg5[%c0_238, %c13_239] : memref<8x27xf32, #tpu.memory_space<vmem>>, vector<8x1xf32>
    %529 = vector.broadcast %528 : vector<8x1xf32> to vector<8x256xf32>
    %530 = arith.mulf %468, %529 : vector<8x256xf32>
    %531 = arith.addf %527, %530 : vector<8x256xf32>
    %c0_240 = arith.constant 0 : index
    %c14_241 = arith.constant 14 : index
    %532 = vector.load %arg5[%c0_240, %c14_241] : memref<8x27xf32, #tpu.memory_space<vmem>>, vector<8x1xf32>
    %533 = vector.broadcast %532 : vector<8x1xf32> to vector<8x256xf32>
    %534 = arith.mulf %471, %533 : vector<8x256xf32>
    %535 = arith.addf %531, %534 : vector<8x256xf32>
    %536 = arith.addf %516, %535 : vector<8x256xf32>
    %c0_242 = arith.constant 0 : index
    %c15_243 = arith.constant 15 : index
    %537 = vector.load %arg5[%c0_242, %c15_243] : memref<8x27xf32, #tpu.memory_space<vmem>>, vector<8x1xf32>
    %538 = vector.broadcast %537 : vector<8x1xf32> to vector<8x256xf32>
    %539 = arith.mulf %462, %538 : vector<8x256xf32>
    %c0_244 = arith.constant 0 : index
    %c16_245 = arith.constant 16 : index
    %540 = vector.load %arg5[%c0_244, %c16_245] : memref<8x27xf32, #tpu.memory_space<vmem>>, vector<8x1xf32>
    %541 = vector.broadcast %540 : vector<8x1xf32> to vector<8x256xf32>
    %542 = arith.mulf %465, %541 : vector<8x256xf32>
    %543 = arith.addf %539, %542 : vector<8x256xf32>
    %c0_246 = arith.constant 0 : index
    %c17_247 = arith.constant 17 : index
    %544 = vector.load %arg5[%c0_246, %c17_247] : memref<8x27xf32, #tpu.memory_space<vmem>>, vector<8x1xf32>
    %545 = vector.broadcast %544 : vector<8x1xf32> to vector<8x256xf32>
    %546 = arith.mulf %459, %545 : vector<8x256xf32>
    %547 = arith.addf %543, %546 : vector<8x256xf32>
    %c0_248 = arith.constant 0 : index
    %c18_249 = arith.constant 18 : index
    %548 = vector.load %arg5[%c0_248, %c18_249] : memref<8x27xf32, #tpu.memory_space<vmem>>, vector<8x1xf32>
    %549 = vector.broadcast %548 : vector<8x1xf32> to vector<8x256xf32>
    %550 = arith.mulf %468, %549 : vector<8x256xf32>
    %551 = arith.addf %547, %550 : vector<8x256xf32>
    %c0_250 = arith.constant 0 : index
    %c19_251 = arith.constant 19 : index
    %552 = vector.load %arg5[%c0_250, %c19_251] : memref<8x27xf32, #tpu.memory_space<vmem>>, vector<8x1xf32>
    %553 = vector.broadcast %552 : vector<8x1xf32> to vector<8x256xf32>
    %554 = arith.mulf %471, %553 : vector<8x256xf32>
    %555 = arith.addf %551, %554 : vector<8x256xf32>
    %c240_i32_252 = arith.constant 240 : i32
    %556 = tpu.dynamic_rotate %555 by %c240_i32_252 dim 1 : vector<8x256xf32>, i32 -> vector<8x256xf32>
    %557 = vector.broadcast %6 : vector<1x256xf32> to vector<8x256xf32>
    %558 = arith.mulf %556, %557 : vector<8x256xf32>
    %559 = arith.addf %536, %558 : vector<8x256xf32>
    %c0_253 = arith.constant 0 : index
    %c20_254 = arith.constant 20 : index
    %560 = vector.load %arg5[%c0_253, %c20_254] : memref<8x27xf32, #tpu.memory_space<vmem>>, vector<8x1xf32>
    %561 = vector.broadcast %560 : vector<8x1xf32> to vector<8x256xf32>
    %562 = arith.mulf %462, %561 : vector<8x256xf32>
    %c0_255 = arith.constant 0 : index
    %c21_256 = arith.constant 21 : index
    %563 = vector.load %arg5[%c0_255, %c21_256] : memref<8x27xf32, #tpu.memory_space<vmem>>, vector<8x1xf32>
    %564 = vector.broadcast %563 : vector<8x1xf32> to vector<8x256xf32>
    %565 = arith.mulf %465, %564 : vector<8x256xf32>
    %566 = arith.addf %562, %565 : vector<8x256xf32>
    %c0_257 = arith.constant 0 : index
    %c22_258 = arith.constant 22 : index
    %567 = vector.load %arg5[%c0_257, %c22_258] : memref<8x27xf32, #tpu.memory_space<vmem>>, vector<8x1xf32>
    %568 = vector.broadcast %567 : vector<8x1xf32> to vector<8x256xf32>
    %569 = arith.mulf %459, %568 : vector<8x256xf32>
    %570 = arith.addf %566, %569 : vector<8x256xf32>
    %c0_259 = arith.constant 0 : index
    %c23_260 = arith.constant 23 : index
    %571 = vector.load %arg5[%c0_259, %c23_260] : memref<8x27xf32, #tpu.memory_space<vmem>>, vector<8x1xf32>
    %572 = vector.broadcast %571 : vector<8x1xf32> to vector<8x256xf32>
    %573 = arith.mulf %468, %572 : vector<8x256xf32>
    %574 = arith.addf %570, %573 : vector<8x256xf32>
    %c0_261 = arith.constant 0 : index
    %c24_262 = arith.constant 24 : index
    %575 = vector.load %arg5[%c0_261, %c24_262] : memref<8x27xf32, #tpu.memory_space<vmem>>, vector<8x1xf32>
    %576 = vector.broadcast %575 : vector<8x1xf32> to vector<8x256xf32>
    %577 = arith.mulf %471, %576 : vector<8x256xf32>
    %578 = arith.addf %574, %577 : vector<8x256xf32>
    %c224_i32_263 = arith.constant 224 : i32
    %579 = tpu.dynamic_rotate %578 by %c224_i32_263 dim 1 : vector<8x256xf32>, i32 -> vector<8x256xf32>
    %580 = vector.broadcast %7 : vector<1x256xf32> to vector<8x256xf32>
    %581 = arith.mulf %579, %580 : vector<8x256xf32>
    %582 = arith.addf %559, %581 : vector<8x256xf32>
    %c0_264 = arith.constant 0 : index
    %c26_265 = arith.constant 26 : index
    %583 = vector.load %arg5[%c0_264, %c26_265] : memref<8x27xf32, #tpu.memory_space<vmem>>, vector<8x1xf32>
    %584 = vector.broadcast %583 : vector<8x1xf32> to vector<8x256xf32>
    %585 = arith.addf %582, %584 : vector<8x256xf32>
    %586 = vector.extract_strided_slice %303 {offsets = [0, 0], sizes = [8, 256], strides = [1, 1]} : vector<16x256xf32> to vector<8x256xf32>
    %587 = arith.addf %459, %586 : vector<8x256xf32>
    %c1_266 = arith.constant 1 : index
    %c0_267 = arith.constant 0 : index
    %c0_268 = arith.constant 0 : index
    %588 = vector.load %arg7[%c1_266, %c0_267, %c0_268] : memref<2x16x256xf32, #tpu.memory_space<vmem>>, vector<1x8x256xf32>
    %589 = vector.shape_cast %588 : vector<1x8x256xf32> to vector<8x256xf32>
    %590 = vector.shape_cast %587 : vector<8x256xf32> to vector<1x8x256xf32>
    tpu.vector_store %arg7[%c1_266, %c0_267, %c0_268], %590 {strides = array<i32>} : memref<2x16x256xf32, #tpu.memory_space<vmem>>, vector<1x8x256xf32>,
    %591 = vector.extract_strided_slice %303 {offsets = [8, 0], sizes = [8, 256], strides = [1, 1]} : vector<16x256xf32> to vector<8x256xf32>
    %592 = arith.addf %585, %591 : vector<8x256xf32>
    %c1_269 = arith.constant 1 : index
    %c8_270 = arith.constant 8 : index
    %c0_271 = arith.constant 0 : index
    %593 = vector.load %arg7[%c1_269, %c8_270, %c0_271] : memref<2x16x256xf32, #tpu.memory_space<vmem>>, vector<1x8x256xf32>
    %594 = vector.shape_cast %593 : vector<1x8x256xf32> to vector<8x256xf32>
    %595 = vector.shape_cast %592 : vector<8x256xf32> to vector<1x8x256xf32>
    tpu.vector_store %arg7[%c1_269, %c8_270, %c0_271], %595 {strides = array<i32>} : memref<2x16x256xf32, #tpu.memory_space<vmem>>, vector<1x8x256xf32>,
    return
  }
  func.func @transform_0(%arg0: i32) -> (i32, i32, i32) {
    %c0_i32 = arith.constant 0 : i32
    %c0_i32_0 = arith.constant 0 : i32
    %c0_i32_1 = arith.constant 0 : i32
    return %arg0, %c0_i32, %c0_i32_0 : i32, i32, i32
  }
  func.func @transform_1(%arg0: i32) -> (i32, i32) {
    %c0_i32 = arith.constant 0 : i32
    %c0_i32_0 = arith.constant 0 : i32
    %c0_i32_1 = arith.constant 0 : i32
    return %c0_i32, %c0_i32_0 : i32, i32
  }
  func.func @transform_2(%arg0: i32) -> (i32, i32, i32) {
    %c0_i32 = arith.constant 0 : i32
    %c0_i32_0 = arith.constant 0 : i32
    %c0_i32_1 = arith.constant 0 : i32
    %c0_i32_2 = arith.constant 0 : i32
    return %c0_i32, %c0_i32_0, %c0_i32_1 : i32, i32, i32
  }
  func.func @transform_3(%arg0: i32) -> (i32, i32) {
    %c0_i32 = arith.constant 0 : i32
    %c0_i32_0 = arith.constant 0 : i32
    %c0_i32_1 = arith.constant 0 : i32
    return %c0_i32, %c0_i32_0 : i32, i32
  }
  func.func @transform_4(%arg0: i32) -> (i32, i32) {
    %c0_i32 = arith.constant 0 : i32
    %c0_i32_0 = arith.constant 0 : i32
    %c0_i32_1 = arith.constant 0 : i32
    return %c0_i32, %c0_i32_0 : i32, i32
  }
  func.func @transform_5(%arg0: i32) -> (i32, i32) {
    %c0_i32 = arith.constant 0 : i32
    %c0_i32_0 = arith.constant 0 : i32
    %c0_i32_1 = arith.constant 0 : i32
    return %c0_i32, %c0_i32_0 : i32, i32
  }
  func.func @transform_6(%arg0: i32) -> (i32, i32, i32) {
    %c0_i32 = arith.constant 0 : i32
    %c0_i32_0 = arith.constant 0 : i32
    %c0_i32_1 = arith.constant 0 : i32
    return %arg0, %c0_i32, %c0_i32_0 : i32, i32, i32
  }
}

</mosaic_0001>

<bundles_post_ra>
// kernel: ghost_bottleneck.1
= control target key start
LH: loop header
LB: loop body
LE: loop exit
PB: predicated region body
PF: predicated region fallthrough
CT: control target
= control target key end

     0   :  { %s2240_s21 = smov 0   ;;  %s3412_s0 = inlined_call_operand.vmem [shape: f32[4,16,256], index: 0, kind: input, shape index: {}]   ;;  %s3413_s1 = inlined_call_operand.vmem [shape: bf16[4,16], index: 1, kind: input, shape index: {}]   ;;  %s3414_s2 = inlined_call_operand.vmem [shape: bf16[2,8,4], index: 2, kind: input, shape index: {}]   ;;  %s3415_s3 = inlined_call_operand.vmem [shape: f32[4,27], index: 3, kind: input, shape index: {}]   ;;  %s3416_s4 = inlined_call_operand.vmem [shape: f32[8,27], index: 4, kind: input, shape index: {}]   ;;  %s3417_s5 = inlined_call_operand.vmem [shape: f32[8,256], index: 5, kind: input, shape index: {}]   ;;  %s3418_s6 = inlined_call_operand.vmem [shape: f32[4,16,256], index: 6, kind: output, shape index: {}]  }
   0x1 LB: > { %s1924_s22 = sadd.s32 4294967295, %s2168_s21   ;;  %p1928_p0 = scmp.ge.s32.totalorder %s2168_s21, 1  ;;  %s2168_s21 = sphi %s2240_s21, %s16_s21  }
   0x2   : > { %p214_p1 = scmp.lt.s32.totalorder %s2168_s21, 3 }
   0x4   : > { %p215_p2 = pnand %p1928_p0, %p214_p1 }
   0x6   : > { %218 = sbr.rel (%p215_p2) target bundleno = 1925 (0x785), region = 44 }
   0xb   : > { %s1929_s23 = sshll.u32 %s1924_s22, 1  ;;  %v3471_v0 = vmov 0   ;;  %v3469_v1 = vmov 1   ;;  %v2253_v2 = vld [vmem:[%s3415_s3] sm:$0xf]  ;;  %v3419_v3 = vmov 25  }
   0xc   : > { %p247_p3 = scmp.lt.s32.totalorder %s1929_s23, 3  ;;  %325 = vmatprep.mubr.bf16.mxu0 %v3471_v0  ;;  %2019 = vset.pattern.permute.xlu1 %v3469_v1  ;;  %v3465_v4 = vmov 5   ;;  %v280_v11 = vld [vmem:[%s3413_s1] sm:$0x3]  ;;  %vm289_vm0 = vcmask 130048   ;;  %v3461_v12 = vmov 6  }
   0xd   : > { %437 = vperm.xlu1 %2019, %v2253_v2   ;;  %2017 = vset.pattern.permute.xlu0 %v3419_v3  ;;  %v3467_v13 = vmov 2   ;;  %v3457_v14 = vmov 7   ;;  %v3463_v15 = vmov 8   ;;  %v3453_v16 = vmov 3   ;;  %s2191_s8 = smov 126   ;;  %s2192_s9 = smov 2  }
   0xe   : > { %s3584_s23 = smov (!%p247_p3, %s1929_s23), 3  ;;  %286 = vperm.xlu0 %2017, %v2253_v2   ;;  %778 = vmatprep.mubr.bf16.mxu1 %v3471_v0  ;;  %v3459_v17 = vmov 4   ;;  %v3449_v18 = vmov 15   ;;  %v3455_v19 = vmov 20   ;;  %v3445_v20 = vmov 16   ;;  %s2193_s10 = smov 1  }
   0xf   : > { %s1972_s26 = sshll.u32 %s3584_s23, 5  ;;  %v3451_v21 = vmov 22   ;;  %v3443_v22 = vmov 9   ;;  %v3441_v23 = vmov 17   ;;  %v3439_v24 = vmov 21   ;;  %s2194_s11 = smov 127  }
  0x10   : > { %s2267_s29 = scalar_lea.vmem %s3412_s0, %s1972_s26  ;;  %v3437_v25 = vmov 18   ;;  %v3435_v26 = vmov 19   ;;  %v3433_v27 = vmov 23   ;;  %v3447_v28 = vmov 24   ;;  %s2201_s20 = smov 32  }
  0x11   : > { %2020 = vset.pattern.permute.xlu1 %v3465_v4  ;;  %v277_v5 = vld [vmem:[%s2267_s29 + $0x8] sm:$0xff]  ;;  %v279_v6 = vld [vmem:[%s2267_s29 + $0x18] sm:$0xff]  ;;  %v276_v7 = vld [vmem:[%s2267_s29] sm:$0xff]  ;;  %vm739_vm1 = vcmask 1041408   ;;  %v3431_v49 = vmov 10   ;;  %v3429_v50 = vmov 12   ;;  %s2918_s16 = scalar_lea.vmem %s3418_s6, %s1972_s26 }
  0x12   : > { %489 = vperm.xlu1 %2020, %v2253_v2   ;;  %2018 = vset.pattern.permute.xlu0 %v3471_v0  ;;  %v282_v8 = vpack.c.bf16 %v279_v6, %v277_v5  ;;  %v278_v9 = vld [vmem:[%s2267_s29 + $0x10] sm:$0xff]  ;;  %v3427_v51 = vmov 11   ;;  %v3425_v52 = vmov 26   ;;  %v3423_v53 = vmov 13   ;;  %s2202_s22 = smov 16   ;;  %s2203_s24 = smov 112  }
  0x13   : > { %431 = vperm.xlu0 %2018, %v2253_v2   ;;  %v281_v10 = vpack.c.bf16 %v278_v9, %v276_v7  ;;  %v3421_v54 = vmov 14   ;;  %s2204_s25 = smov 96   ;;  %vm735_vm6 = vcmask 31744  }
  0x14   : > { %307 = vmatprep.subr.bf16.mxu0 %v282_v8 }
  0x15   : > { %308 = vmatpush1.bf16.msra.mxu0 %v281_v10 }
  0x16   : > { %2021 = vset.pattern.permute.xlu1 %v3461_v12 }
  0x17   : > { %495 = vperm.xlu1 %2021, %v2253_v2   ;;  %2022 = vset.pattern.permute.xlu0 %v3467_v13 }
  0x18   : > { %445 = vperm.xlu0 %2022, %v2253_v2   ;;  %1942 = vmatmul.mubr.msk.bf16.vlgmr.msra.gmra.mxu0 %vm289_vm0, %v280_v11 }
  0x19   : > { %828 = vmatprep.mubr.bf16.mxu0 %v3471_v0 }
  0x1b   : > { %2023 = vset.pattern.permute.xlu1 %v3457_v14 }
  0x1c   : > { %503 = vperm.xlu1 %2023, %v2253_v2   ;;  %2025 = vset.pattern.permute.xlu0 %v3463_v15 }
  0x1d   : > { %511 = vperm.xlu0 %2025, %v2253_v2  }
  0x20   : > { %2024 = vset.pattern.permute.xlu1 %v3453_v16 }
  0x21   : > { %453 = vperm.xlu1 %2024, %v2253_v2   ;;  %2028 = vset.pattern.permute.xlu0 %v3459_v17 }
  0x22   : > { %461 = vperm.xlu0 %2028, %v2253_v2  }
  0x25   : > { %2026 = vset.pattern.permute.xlu1 %v3449_v18 }
  0x26   : > { %589 = vperm.xlu1 %2026, %v2253_v2   ;;  %2031 = vset.pattern.permute.xlu0 %v3455_v19 }
  0x27   : > { %649 = vperm.xlu0 %2031, %v2253_v2  }
  0x2a   : > { %2027 = vset.pattern.permute.xlu1 %v3445_v20 }
  0x2b   : > { %595 = vperm.xlu1 %2027, %v2253_v2   ;;  %2034 = vset.pattern.permute.xlu0 %v3451_v21 }
  0x2c   : > { %663 = vperm.xlu0 %2034, %v2253_v2  }
  0x2f   : > { %2029 = vset.pattern.permute.xlu1 %v3443_v22 }
  0x30   : > { %519 = vperm.xlu1 %2029, %v2253_v2   ;;  %2037 = vset.pattern.permute.xlu0 %v3447_v28 }
  0x34   : > { %2030 = vset.pattern.permute.xlu1 %v3441_v23 }
  0x35   : > { %603 = vperm.xlu1 %2030, %v2253_v2  }
  0x39   : > { %2032 = vset.pattern.permute.xlu1 %v3439_v24 }
  0x3a   : > { %655 = vperm.xlu1 %2032, %v2253_v2  }
  0x3e   : > { %2033 = vset.pattern.permute.xlu1 %v3437_v25 }
  0x3f   : > { %611 = vperm.xlu1 %2033, %v2253_v2  }
  0x43   : > { %2035 = vset.pattern.permute.xlu1 %v3435_v26 }
  0x44   : > { %619 = vperm.xlu1 %2035, %v2253_v2  }
  0x48   : > { %2036 = vset.pattern.permute.xlu1 %v3433_v27 }
  0x88   : > { %v2354_v55 = vpop.permute.xlu1 %437 }
  0x89   : > { %v287_v29 = vpop.permute.xlu0 %286 }
  0x8d   : > { %v2356_v56 = vpop.permute.xlu1 %489 }
  0x8e   : > { %v432_v62 = vpop.permute.xlu0 %431 }
  0x92   : > { %v2358_v57 = vpop.permute.xlu1 %495 }
  0x93   : > { %v446_v5 = vpop.permute.xlu0 %445 }
  0x97   : > { %v504_v58 = vpop.permute.xlu1 %503 }
  0x98   : > { %v2368_v7 = vpop.permute.xlu0 %511 }
  0x9c   : > { %v2360_v59 = vpop.permute.xlu1 %453 }
  0x9d   : > { %v2372_v9 = vpop.permute.xlu0 %461 }
  0xa1   : > { %v2362_v60 = vpop.permute.xlu1 %589 }
  0xa2   : > { %v650_v11 = vpop.permute.xlu0 %649 }
  0xa6   : > { %v2364_v61 = vpop.permute.xlu1 %595 }
  0xab   : > { %v2366_v63 = vpop.permute.xlu1 %519 }
  0xb0   : > { %v604_v6 = vpop.permute.xlu1 %603 }
  0xb5   : > { %v2370_v8 = vpop.permute.xlu1 %655 }
  0xba   : > { %v2374_v10 = vpop.permute.xlu1 %611 }
  0xd8   : > { %v327_v30 = vpop.f32.mrf.mxu0 }
  0xd9   : > { %v328_v31 = vadd.f32 %v327_v30, %v287_v29  ;;  %v2376_v30 = vpop.permute.xlu1 %619 }
  0xda   : > { %v329_v32 = vpop.f32.mrf.mxu0 }
  0xdb   : > { %v1943_v33 = vmul.f32 -1.442695, %v328_v31  ;;  %v330_v34 = vadd.f32 %v329_v32, %v287_v29  ;;  %v352_v29 = vlaneseq  ;;  %v2378_v32 = vpop.permute.xlu0 %663 }
  0xdc   : > { %v331_v35 = vpop.f32.mrf.mxu0 }
  0xdd   : > { %2123 = vpow2.f32 %v1943_v33  ;;  %v1944_v36 = vmul.f32 -1.442695, %v330_v34  ;;  %v2380_v33 = vand.u32 127, %v352_v29 }
  0xde   : > { %v332_v37 = vpop.f32.mrf.mxu0 }
  0xdf   : > { %2125 = vpow2.f32 %v1944_v36  ;;  %v261_v37 = vld [vmem:[%s3417_s5] ss:$8 sm:$0x3]  ;;  %vm354_vm2 = vcmp.lt.s32.totalorder %v2380_v33, 2  ;;  %vm374_vm3 = vcmp.lt.s32.totalorder %v2380_v33, 1  ;;  %vm394_vm4 = vcmp.lt.s32.totalorder %v2380_v33, 127 }
  0xe0   : > { %vm414_vm5 = vcmp.lt.s32.totalorder %v2380_v33, 126  ;;  %vm530_vm7 = vcmp.lt.s32.totalorder %v2380_v33, 16  ;;  %vm472_vm8 = vcmp.lt.s32.totalorder %v2380_v33, 32  ;;  %vm630_vm9 = vcmp.lt.s32.totalorder %v2380_v33, 112 }
  0xe1   : > { %vm690_vm10 = vcmp.lt.s32.totalorder %v2380_v33, 96 }
  0xea   : > { %v2124_v38 = vpop.eup %2123 }
  0xeb   : > { %v340_v39 = vadd.f32 1.0, %v2124_v38 }
  0xec   : > { %v2126_v40 = vpop.eup %2125 }
  0xed   : > { %2127 = vrcp.f32 %v340_v39  ;;  %v341_v41 = vadd.f32 1.0, %v2126_v40 }
  0xef   : > { %2129 = vrcp.f32 %v341_v41  ;;  %v1935_v41 = vld [vmem:[%s3417_s5 + $0x1] ss:$8 sm:$0x3] }
  0xfa   : > { %v2128_v42 = vpop.eup %2127 }
  0xfb   : > { %v2314_v43 = vmul.f32 %v2128_v42, %v328_v31  ;;  %v359_v31 = vshrl.u32 %v352_v29, 7  ;;  %v1937_v29 = vld [vmem:[%s3417_s5 + $0x3] ss:$8 sm:$0x3] }
  0xfc   : > { %v2130_v44 = vpop.eup %2129 }
  0xfd   : > { %v2316_v45 = vmul.f32 %v2130_v44, %v330_v34  ;;  %410 = vrot.lane.b32.xlu1 %v2314_v43, %s2191_s8  ;;  %348 = vrot.lane.b32.xlu0 %v2314_v43, %s2192_s9  ;;  %v729_v46 = vpack.c.bf16 %v2314_v43, %v2314_v43  ;;  %v2382_v34 = vsub.s32 0, %v359_v31  ;;  %v2384_v35 = vsub.s32 1, %v359_v31  ;;  %v1936_v44 = vld [vmem:[%s3417_s5 + $0x2] ss:$8 sm:$0x3] }
  0xfe   : > { %v2444_v27 = vmul.f32 %v604_v6, %v2314_v43 }
  0xff   : > { %v730_v47 = vpack.c.bf16 %v2316_v45, %v2316_v45  ;;  %v791_v48 = vsel %vm739_vm1, %v729_v46, 0  ;;  %v2391_v39 = vrot.slane %v261_v37, %v2382_v34  ;;  %v2394_v40 = vrot.slane %v261_v37, %v2384_v35 }
 0x100   : > { %v2411_v31 = vrot.slane %v1935_v41, %v2382_v34  ;;  %v2414_v37 = vrot.slane %v1935_v41, %v2384_v35  ;;  %v2431_v41 = vrot.slane %v1937_v29, %v2382_v34  ;;  %v449_v25 = vmul.f32 %v446_v5, %v2316_v45 }
 0x101   : > { %350 = vrot.lane.b32.xlu1 %v2316_v45, %s2192_s9  ;;  %1950 = vmatprep.subr.msk.bf16.mxu0 %vm739_vm1, %v730_v47  ;;  %3499 = vst [vmem:[#allocation2_spill] sm:$0xff] %v2391_v39  ;;  %3500 = vst [vmem:[#allocation3_spill] sm:$0xff] %v2394_v40  ;;  %v607_v24 = vmul.f32 %v604_v6, %v2316_v45 }
 0x102   : > { %370 = vrot.lane.b32.xlu0 %v2314_v43, %s2193_s10  ;;  %811 = vmatpush1.bf16.msra.mxu0 %v791_v48  ;;  %3501 = vst [vmem:[#allocation4_spill] sm:$0xff] %v2411_v31  ;;  %3502 = vst [vmem:[#allocation5_spill] sm:$0xff] %v2414_v37 }
 0x103   : > { %3505 = vst [vmem:[#allocation8_spill] sm:$0xff] %v2431_v41 }
 0x105   : > { %372 = vrot.lane.b32.xlu1 %v2316_v45, %s2193_s10 }
 0x106   : > { %390 = vrot.lane.b32.xlu0 %v2314_v43, %s2194_s11 }
 0x109   : > { %392 = vrot.lane.b32.xlu1 %v2316_v45, %s2194_s11 }
 0x10a   : > { %412 = vrot.lane.b32.xlu0 %v2316_v45, %s2191_s8 }
 0x10d   : > { %671 = vperm.xlu1 %2036, %v2253_v2  }
 0x10e   : > { %679 = vperm.xlu0 %2037, %v2253_v2  }
 0x111   : > { %2038 = vset.pattern.permute.xlu1 %v3431_v49  ;;  %v507_v49 = vmul.f32 %v504_v58, %v2316_v45 }
 0x112   : > { %2040 = vset.pattern.permute.xlu0 %v3429_v50  ;;  %549 = vperm.xlu1 %2038, %v2253_v2  }
 0x113   : > { %563 = vperm.xlu0 %2040, %v2253_v2  }
 0x116   : > { %2039 = vset.pattern.permute.xlu1 %v3427_v51 }
 0x117   : > { %555 = vperm.xlu1 %2039, %v2253_v2   ;;  %2043 = vset.pattern.permute.xlu0 %v3425_v52  ;;  %v448_v52 = vmul.f32 %v446_v5, %v2314_v43 }
 0x11b   : > { %2041 = vset.pattern.permute.xlu1 %v3423_v53  ;;  %v2427_v53 = vrot.slane %v1936_v44, %v2384_v35 }
 0x11c   : > { %571 = vperm.xlu1 %2041, %v2253_v2  }
 0x11d   : > { %3504 = vst [vmem:[#allocation7_spill] sm:$0xff] %v2427_v53 }
 0x120   : > { %2042 = vset.pattern.permute.xlu1 %v3421_v54 }
 0x121   : > { %579 = vperm.xlu1 %2042, %v2253_v2  }
 0x125   : > { %2044 = vset.pattern.permute.xlu1 %v3419_v3 }
 0x16f   : > { %v411_v36 = vpop.permute.xlu1 %410  ;;  %v349_v38 = vpop.permute.xlu0 %348 }
 0x173   : > { %v351_v42 = vpop.permute.xlu1 %350 }
 0x174   : > { %v355_v46 = vsel %vm354_vm2, %v349_v38, %v351_v42  ;;  %v356_v47 = vsel %vm354_vm2, %v351_v42, %v349_v38  ;;  %v371_v48 = vpop.permute.xlu0 %370  ;;  %v2424_v38 = vrot.slane %v1936_v44, %v2382_v34 }
 0x175   : > { %v2417_v3 = vmul.f32 %v2391_v39, %v356_v47  ;;  %v2420_v54 = vmul.f32 %v2394_v40, %v355_v46  ;;  %v2434_v47 = vrot.slane %v1937_v29, %v2384_v35  ;;  %v506_v46 = vmul.f32 %v504_v58, %v2314_v43 }
 0x176   : > { %3503 = vst [vmem:[#allocation6_spill] sm:$0xff] %v2424_v38 }
 0x177   : > { %v373_v42 = vpop.permute.xlu1 %372  ;;  %3506 = vst [vmem:[#allocation9_spill] sm:$0xff] %v2434_v47  ;;  %v435_v23 = vmul.f32 %v432_v62, %v2420_v54  ;;  %v493_v19 = vmul.f32 %v2356_v56, %v2420_v54 }
 0x178   : > { %v375_v51 = vsel %vm374_vm3, %v371_v48, %v373_v42  ;;  %v376_v50 = vsel %vm374_vm3, %v373_v42, %v371_v48  ;;  %v391_v44 = vpop.permute.xlu0 %390  ;;  %v434_v48 = vmul.f32 %v432_v62, %v2417_v3 }
 0x179   : > { %v2447_v26 = vmul.f32 %v2411_v31, %v376_v50  ;;  %v2450_v29 = vmul.f32 %v2414_v37, %v375_v51  ;;  %v652_v50 = vmul.f32 %v650_v11, %v2417_v3  ;;  %v653_v51 = vmul.f32 %v650_v11, %v2420_v54 }
 0x17b   : > { %v393_v42 = vpop.permute.xlu1 %392  ;;  %v441_v58 = vmul.f32 %v2354_v55, %v2450_v29  ;;  %v440_v22 = vmul.f32 %v2354_v55, %v2447_v26  ;;  %v499_v62 = vmul.f32 %v2358_v57, %v2450_v29  ;;  %v498_v28 = vmul.f32 %v2358_v57, %v2447_v26 }
 0x17c   : > { %v395_v5 = vsel %vm394_vm4, %v391_v44, %v393_v42  ;;  %v396_v6 = vsel %vm394_vm4, %v393_v42, %v391_v44  ;;  %v413_v20 = vpop.permute.xlu0 %412 }
 0x17d   : > { %v2471_v18 = vmul.f32 %v2424_v38, %v395_v5  ;;  %v2474_v55 = vmul.f32 %v2427_v53, %v396_v6  ;;  %v415_v11 = vsel %vm414_vm5, %v411_v36, %v413_v20  ;;  %v416_v21 = vsel %vm414_vm5, %v413_v20, %v411_v36 }
 0x17e   : > { %v2481_v44 = vmul.f32 %v2431_v41, %v415_v11  ;;  %v2484_v42 = vmul.f32 %v2434_v47, %v416_v21  ;;  %v443_v16 = vadd.f32 %v441_v58, %v435_v23  ;;  %v442_v57 = vadd.f32 %v440_v22, %v434_v48 }
 0x17f   : > { %v457_v5 = vmul.f32 %v2360_v59, %v2474_v55  ;;  %v456_v6 = vmul.f32 %v2360_v59, %v2471_v18  ;;  %v492_v20 = vmul.f32 %v2356_v56, %v2417_v3  ;;  %v659_v21 = vmul.f32 %v2370_v8, %v2450_v29 }
 0x180   : > { %v451_v36 = vadd.f32 %v449_v25, %v443_v16  ;;  %v450_v11 = vadd.f32 %v448_v52, %v442_v57  ;;  %v593_v22 = vmul.f32 %v2362_v60, %v2420_v54  ;;  %v465_v23 = vmul.f32 %v2372_v9, %v2484_v42 }
 0x181   : > { %v501_v48 = vadd.f32 %v499_v62, %v493_v19  ;;  %v515_v59 = vmul.f32 %v2368_v7, %v2474_v55  ;;  %v592_v58 = vmul.f32 %v2362_v60, %v2417_v3  ;;  %v464_v16 = vmul.f32 %v2372_v9, %v2481_v44 }
 0x182   : > { %v459_v14 = vadd.f32 %v457_v5, %v451_v36  ;;  %v458_v56 = vadd.f32 %v456_v6, %v450_v11  ;;  %v500_v25 = vadd.f32 %v498_v28, %v492_v20  ;;  %v658_v52 = vmul.f32 %v2370_v8, %v2447_v26 }
 0x183   : > { %v509_v57 = vadd.f32 %v507_v49, %v501_v48  ;;  %v514_v17 = vmul.f32 %v2368_v7, %v2471_v18  ;;  %v599_v19 = vmul.f32 %v2364_v61, %v2450_v29  ;;  %v661_v15 = vadd.f32 %v659_v21, %v653_v51 }
 0x184   : > { %v467_v62 = vadd.f32 %v465_v23, %v459_v14  ;;  %v466_v12 = vadd.f32 %v464_v16, %v458_v56  ;;  %v508_v60 = vadd.f32 %v506_v46, %v500_v25  ;;  %v615_v9 = vmul.f32 %v2374_v10, %v2474_v55 }
 0x185   : > { %v517_v5 = vadd.f32 %v515_v59, %v509_v57  ;;  %v601_v6 = vadd.f32 %v599_v19, %v593_v22  ;;  %v598_v28 = vmul.f32 %v2364_v61, %v2447_v26  ;;  %v523_v49 = vmul.f32 %v2366_v63, %v2484_v42 }
 0x186   : > { %470 = vrot.lane.b32.xlu1 %v467_v62, %s2201_s20  ;;  %468 = vrot.lane.b32.xlu0 %v466_v12, %s2201_s20  ;;  %v516_v14 = vadd.f32 %v514_v17, %v508_v60  ;;  %v522_v7 = vmul.f32 %v2366_v63, %v2481_v44  ;;  %v660_v8 = vadd.f32 %v658_v52, %v652_v50 }
 0x187   : > { %v609_v46 = vadd.f32 %v607_v24, %v601_v6  ;;  %v600_v51 = vadd.f32 %v598_v28, %v592_v58  ;;  %v614_v20 = vmul.f32 %v2374_v10, %v2471_v18  ;;  %v666_v61 = vmul.f32 %v2378_v32, %v2314_v43 }
 0x188   : > { %v667_v36 = vmul.f32 %v2378_v32, %v2316_v45  ;;  %v672_v12 = vpop.permute.xlu1 %671  ;;  %v525_v11 = vadd.f32 %v523_v49, %v517_v5  ;;  %v524_v21 = vadd.f32 %v522_v7, %v516_v14  ;;  %v623_v10 = vmul.f32 %v2376_v30, %v2484_v42 }
 0x189   : > { %v674_v17 = vmul.f32 %v672_v12, %v2471_v18  ;;  %v675_v22 = vmul.f32 %v672_v12, %v2474_v55  ;;  %v617_v63 = vadd.f32 %v615_v9, %v609_v46  ;;  %v608_v24 = vadd.f32 %v2444_v27, %v600_v51  ;;  %v680_v23 = vpop.permute.xlu0 %679 }
 0x18a   : > { %v669_v50 = vadd.f32 %v667_v36, %v661_v15  ;;  %528 = vrot.lane.b32.xlu1 %v525_v11, %s2202_s22  ;;  %526 = vrot.lane.b32.xlu0 %v524_v21, %s2202_s22  ;;  %v668_v32 = vadd.f32 %v666_v61, %v660_v8  ;;  %v622_v59 = vmul.f32 %v2376_v30, %v2481_v44  ;;  %v3510_v12 = vmov 7  }
 0x18b   : > { %v616_v48 = vadd.f32 %v614_v20, %v608_v24  ;;  %v625_v56 = vadd.f32 %v623_v10, %v617_v63  ;;  %v683_v15 = vmul.f32 %v680_v23, %v2484_v42  ;;  %v682_v52 = vmul.f32 %v680_v23, %v2481_v44 }
 0x18c   : > { %v677_v58 = vadd.f32 %v675_v22, %v669_v50  ;;  %v676_v16 = vadd.f32 %v674_v17, %v668_v32  ;;  %v3511_v11 = vmov 20   ;;  %v3512_v21 = vmov 3  }
 0x18d   : > { %v550_v25 = vpop.permute.xlu1 %549  ;;  %v624_v27 = vadd.f32 %v622_v59, %v616_v48  ;;  %v3513_v17 = vmov 22   ;;  %v3514_v22 = vmov 15   ;;  %v3515_v63 = vmov 24  }
 0x18e   : > { %628 = vrot.lane.b32.xlu1 %v625_v56, %s2203_s24  ;;  %v685_v57 = vadd.f32 %v683_v15, %v677_v58  ;;  %v684_v19 = vadd.f32 %v682_v52, %v676_v16  ;;  %v564_v62 = vpop.permute.xlu0 %563  ;;  %v552_v60 = vmul.f32 %v550_v25, %v2417_v3  ;;  %v553_v5 = vmul.f32 %v550_v25, %v2420_v54  ;;  %v1939_v58 = vld [vmem:[%s3417_s5 + $0x5] ss:$8 sm:$0x3]  ;;  %v1938_v25 = vld [vmem:[%s3417_s5 + $0x4] ss:$8 sm:$0x3] }
 0x18f   : > { %626 = vrot.lane.b32.xlu0 %v624_v27, %s2203_s24  ;;  %v566_v28 = vmul.f32 %v564_v62, %v2314_v43  ;;  %v567_v49 = vmul.f32 %v564_v62, %v2316_v45  ;;  %v3516_v24 = vmov 16   ;;  %v3517_v50 = vmov 9  }
 0x190   : > { %v3518_v10 = vmov 17   ;;  %v3519_v48 = vmov 21   ;;  %v3520_v16 = vmov 18   ;;  %v2613_v27 = vrot.slane %v1939_v58, %v2382_v34 }
 0x191   : > { %v2616_v15 = vrot.slane %v1939_v58, %v2384_v35  ;;  %v2626_v62 = vrot.slane %v1938_v25, %v2384_v35 }
 0x192   : > { %688 = vrot.lane.b32.xlu1 %v685_v57, %s2204_s25  ;;  %v556_v30 = vpop.permute.xlu1 %555  ;;  %3521 = vst [vmem:[#allocation10_spill] sm:$0xff] %v2613_v27 }
 0x193   : > { %686 = vrot.lane.b32.xlu0 %v684_v19, %s2204_s25  ;;  %v558_v6 = vmul.f32 %v556_v30, %v2447_v26  ;;  %v559_v9 = vmul.f32 %v556_v30, %v2450_v29  ;;  %3522 = vst [vmem:[#allocation11_spill] sm:$0xff] %v2616_v15  ;;  %v2623_v19 = vrot.slane %v1938_v25, %v2382_v34  ;;  %3524 = vst [vmem:[#allocation13_spill] sm:$0xff] %v2626_v62 }
 0x195   : > { %v560_v14 = vadd.f32 %v558_v6, %v552_v60  ;;  %v561_v7 = vadd.f32 %v559_v9, %v553_v5  ;;  %3523 = vst [vmem:[#allocation12_spill] sm:$0xff] %v2623_v19  ;;  %v3525_v9 = vmov 19  }
 0x197   : > { %709 = vperm.xlu0 %2043, %v2253_v2   ;;  %v572_v8 = vpop.permute.xlu1 %571  ;;  %v568_v46 = vadd.f32 %v566_v28, %v560_v14  ;;  %v569_v51 = vadd.f32 %v567_v49, %v561_v7  ;;  %v728_v2 = vld [vmem:[%s3414_s2] sm:$0xf]  ;;  %v1940_v14 = vld [vmem:[%s3417_s5 + $0x6] ss:$8 sm:$0x3] }
 0x198   : > { %v574_v3 = vmul.f32 %v572_v8, %v2471_v18  ;;  %v575_v54 = vmul.f32 %v572_v8, %v2474_v55  ;;  %1951 = vmatmul.mubr.msk.bf16.vlgmr.msra.gmra.mxu0 %vm735_vm6, %v728_v2  ;;  %v2567_v18 = vld [vmem:[%s3415_s3] sm:$0xf]  ;;  %v3507_v55 = vmov 8  }
 0x199   : > { %1522 = vmatprep.mubr.bf16.mxu0 %v3471_v0  ;;  %1132 = vperm.xlu1 %2044, %v2567_v18  }
 0x19a   : > { %v576_v20 = vadd.f32 %v574_v3, %v568_v46  ;;  %v577_v61 = vadd.f32 %v575_v54, %v569_v51  ;;  %v2643_v46 = vrot.slane %v1940_v14, %v2382_v34  ;;  %v1941_v51 = vld [vmem:[%s3417_s5 + $0x7] ss:$8 sm:$0x3] }
 0x19b   : > { %2046 = vset.pattern.permute.xlu0 %v3469_v1 }
 0x19c   : > { %v580_v26 = vpop.permute.xlu1 %579  ;;  %1232 = vperm.xlu0 %2046, %v2567_v18  }
 0x19d   : > { %v582_v43 = vmul.f32 %v580_v26, %v2481_v44  ;;  %v583_v45 = vmul.f32 %v580_v26, %v2484_v42  ;;  %2045 = vset.pattern.permute.xlu1 %v3471_v0  ;;  %v3508_v44 = vmov 6   ;;  %v3509_v42 = vmov 4  }
 0x19e   : > { %1226 = vperm.xlu1 %2045, %v2567_v18  }
 0x19f   : > { %v2555_v29 = vadd.f32 %v582_v43, %v576_v20  ;;  %v2557_v36 = vadd.f32 %v583_v45, %v577_v61  ;;  %v2649_v20 = vrot.slane %v1940_v14, %v2384_v35  ;;  %v3526_v43 = vmov 23  }
 0x1a0   : > { %2049 = vset.pattern.permute.xlu0 %v3467_v13 }
 0x1a1   : > { %1240 = vperm.xlu0 %2049, %v2567_v18  }
 0x1a2   : > { %2047 = vset.pattern.permute.xlu1 %v3465_v4 }
 0x1a3   : > { %1272 = vperm.xlu1 %2047, %v2567_v18  }
 0x1a5   : > { %2052 = vset.pattern.permute.xlu0 %v3507_v55 }
 0x1a6   : > { %1294 = vperm.xlu0 %2052, %v2567_v18  }
 0x1a7   : > { %2048 = vset.pattern.permute.xlu1 %v3508_v44 }
 0x1a8   : > { %1278 = vperm.xlu1 %2048, %v2567_v18  }
 0x1aa   : > { %2055 = vset.pattern.permute.xlu0 %v3509_v42 }
 0x1ab   : > { %1256 = vperm.xlu0 %2055, %v2567_v18  }
 0x1ac   : > { %2050 = vset.pattern.permute.xlu1 %v3510_v12 }
 0x1ad   : > { %1286 = vperm.xlu1 %2050, %v2567_v18  }
 0x1af   : > { %2058 = vset.pattern.permute.xlu0 %v3511_v11 }
 0x1b0   : > { %1408 = vperm.xlu0 %2058, %v2567_v18  }
 0x1b1   : > { %2051 = vset.pattern.permute.xlu1 %v3512_v21 }
 0x1b2   : > { %1248 = vperm.xlu1 %2051, %v2567_v18  }
 0x1b4   : > { %2061 = vset.pattern.permute.xlu0 %v3513_v17 }
 0x1b5   : > { %1422 = vperm.xlu0 %2061, %v2567_v18  }
 0x1b6   : > { %2053 = vset.pattern.permute.xlu1 %v3514_v22 }
 0x1b7   : > { %1360 = vperm.xlu1 %2053, %v2567_v18  }
 0x1b9   : > { %2064 = vset.pattern.permute.xlu0 %v3515_v63 }
 0x1bb   : > { %2054 = vset.pattern.permute.xlu1 %v3516_v24 }
 0x1bc   : > { %1366 = vperm.xlu1 %2054, %v2567_v18  }
 0x1c0   : > { %2056 = vset.pattern.permute.xlu1 %v3517_v50 }
 0x1c1   : > { %1302 = vperm.xlu1 %2056, %v2567_v18  }
 0x1c5   : > { %2057 = vset.pattern.permute.xlu1 %v3518_v10 }
 0x1c6   : > { %1374 = vperm.xlu1 %2057, %v2567_v18  }
 0x1ca   : > { %2059 = vset.pattern.permute.xlu1 %v3519_v48 }
 0x1cb   : > { %1414 = vperm.xlu1 %2059, %v2567_v18  }
 0x1cf   : > { %2060 = vset.pattern.permute.xlu1 %v3520_v16 }
 0x1d0   : > { %1382 = vperm.xlu1 %2060, %v2567_v18  }
 0x1d4   : > { %2062 = vset.pattern.permute.xlu1 %v3525_v9 }
 0x1d5   : > { %1390 = vperm.xlu1 %2062, %v2567_v18  }
 0x1d9   : > { %2063 = vset.pattern.permute.xlu1 %v3526_v43 }
 0x1f8   : > { %v471_v32 = vpop.permute.xlu1 %470  ;;  %v469_v23 = vpop.permute.xlu0 %468 }
 0x1f9   : > { %v473_v5 = vsel %vm472_vm8, %v469_v23, %v471_v32  ;;  %v474_v6 = vsel %vm472_vm8, %v471_v32, %v469_v23  ;;  %v2658_v32 = vrot.slane %v1941_v51, %v2382_v34  ;;  %v2661_v23 = vrot.slane %v1941_v51, %v2384_v35 }
 0x1fa   : > { %v486_v7 = vmul.f32 %v2623_v19, %v474_v6  ;;  %v487_v8 = vmul.f32 %v2626_v62, %v473_v5 }
 0x1fb   : > { %3527 = vst [vmem:[#allocation14_spill] sm:$0xff] %v2658_v32  ;;  %3528 = vst [vmem:[#allocation15_spill] sm:$0xff] %v2661_v23 }
 0x1fc   : > { %v529_v59 = vpop.permute.xlu1 %528  ;;  %v527_v56 = vpop.permute.xlu0 %526 }
 0x1fd   : > { %v531_v52 = vsel %vm530_vm7, %v527_v56, %v529_v59  ;;  %v532_v57 = vsel %vm530_vm7, %v529_v59, %v527_v56 }
 0x1fe   : > { %v544_v28 = vmul.f32 %v2613_v27, %v532_v57  ;;  %v545_v49 = vmul.f32 %v2616_v15, %v531_v52 }
 0x200   : > { %v629_v30 = vpop.permute.xlu1 %628  ;;  %v546_v3 = vadd.f32 %v544_v28, %v486_v7  ;;  %v547_v54 = vadd.f32 %v545_v49, %v487_v8 }
 0x201   : > { %v627_v60 = vpop.permute.xlu0 %626 }
 0x202   : > { %v631_v45 = vsel %vm630_vm9, %v627_v60, %v629_v30  ;;  %v632_v2 = vsel %vm630_vm9, %v629_v30, %v627_v60  ;;  %v586_v56 = vadd.f32 %v2555_v29, %v546_v3  ;;  %v587_v25 = vadd.f32 %v2557_v36, %v547_v54 }
 0x203   : > { %v644_v52 = vmul.f32 %v2643_v46, %v631_v45  ;;  %v645_v57 = vmul.f32 %v2649_v20, %v632_v2  ;;  %v2674_v45 = vld [vmem:[%s2267_s29 + $0x28] sm:$0xff]  ;;  %v1955_v2 = vld [vmem:[%s2267_s29 + $0x38] sm:$0xff] }
 0x204   : > { %v689_v61 = vpop.permute.xlu1 %688  ;;  %3529 = vst [vmem:[#allocation16_spill] sm:$0xff] %v2674_v45 }
 0x205   : > { %v687_v26 = vpop.permute.xlu0 %686  ;;  %v646_v35 = vadd.f32 %v644_v52, %v586_v56  ;;  %v647_v60 = vadd.f32 %v645_v57, %v587_v25  ;;  %v1128_v25 = vpack.c.bf16 %v1955_v2, %v2674_v45  ;;  %v2679_v52 = vld [vmem:[%s2267_s29 + $0x20] sm:$0xff]  ;;  %v1954_v57 = vld [vmem:[%s2267_s29 + $0x30] sm:$0xff] }
 0x206   : > { %v691_v59 = vsel %vm690_vm10, %v687_v26, %v689_v61  ;;  %v692_v58 = vsel %vm690_vm10, %v689_v61, %v687_v26  ;;  %3530 = vst [vmem:[#allocation17_spill] sm:$0xff] %v2679_v52 }
 0x207   : > { %v704_v34 = vmul.f32 %v2658_v32, %v691_v59  ;;  %v705_v30 = vmul.f32 %v2661_v23, %v692_v58 }
 0x209   : > { %v706_v5 = vadd.f32 %v704_v34, %v646_v35  ;;  %v707_v6 = vadd.f32 %v705_v30, %v647_v60  ;;  %v1947_v30 = vld [vmem:[%s3414_s2 + $0x4] sm:$0xf]  ;;  %v1127_v35 = vpack.c.bf16 %v1954_v57, %v2679_v52  ;;  %v1126_v60 = vld [vmem:[%s3413_s1] sm:$0x3] }
 0x212   : > { %v710_v28 = vpop.permute.xlu0 %709 }
 0x213   : > { %v712_v49 = vadd.f32 %v710_v28, %v706_v5  ;;  %v713_v14 = vadd.f32 %v710_v28, %v707_v6 }
 0x215   : > { %v1945_v29 = vmul.f32 -1.442695, %v712_v49  ;;  %v1946_v7 = vmul.f32 -1.442695, %v713_v14 }
 0x217   : > { %2131 = vpow2.f32 %v1945_v29 }
 0x218   : > { %2133 = vpow2.f32 %v1946_v7 }
 0x224   : > { %v2132_v36 = vpop.eup %2131 }
 0x225   : > { %v2134_v8 = vpop.eup %2133  ;;  %v720_v51 = vadd.f32 1.0, %v2132_v36 }
 0x226   : > { %v721_v3 = vadd.f32 1.0, %v2134_v8  ;;  %v1133_v8 = vpop.permute.xlu1 %1132 }
 0x227   : > { %2135 = vrcp.f32 %v720_v51 }
 0x228   : > { %2137 = vrcp.f32 %v721_v3 }
 0x234   : > { %v2136_v54 = vpop.eup %2135 }
 0x235   : > { %v2138_v61 = vpop.eup %2137  ;;  %v726_v26 = vmul.f32 %v2136_v54, %v712_v49 }
 0x236   : > { %v727_v59 = vmul.f32 %v2138_v61, %v713_v14 }
 0x237   : > { %v733_v58 = vpack.c.bf16 %v726_v26, %v726_v26 }
 0x238   : > { %v734_v56 = vpack.c.bf16 %v727_v59, %v727_v59 }
 0x239   : > { %v741_v34 = vsel %vm739_vm1, %v733_v58, 0 }
 0x23a   : > { %1948 = vmatprep.subr.msk.bf16.mxu1 %vm739_vm1, %v734_v56 }
 0x23b   : > { %761 = vmatpush1.bf16.msra.mxu1 %v741_v34 }
 0x23c   : > { %1152 = vmatprep.subr.bf16.mxu1 %v1128_v25 }
 0x23e   : > { %1949 = vmatmul.mubr.msk.bf16.vlgmr.msra.gmra.mxu1 %vm735_vm6, %v1947_v30 }
 0x23f   : > { %1153 = vmatpush1.bf16.msra.mxu1 %v1127_v35  ;;  %1170 = vmatprep.mubr.bf16.mxu1 %v3471_v0 }
 0x246   : > { %1956 = vmatmul.mubr.msk.bf16.vlgmr.msra.gmra.mxu1 %vm289_vm0, %v1126_v60 }
 0x247   : > { %1572 = vmatprep.mubr.bf16.mxu1 %v3471_v0 }
 0x258   : > { %v2695_v5 = vpop.f32.mrf.mxu0 }
 0x25a   : > { %v2697_v6 = vpop.f32.mrf.mxu0 }
 0x25c   : > { %v834_v28 = vpop.f32.mrf.mxu0 }
 0x25e   : > { %v835_v49 = vpop.f32.mrf.mxu0 }
 0x2fe   : > { %v2699_v14 = vpop.f32.mrf.mxu1 }
 0x300   : > { %v2701_v29 = vpop.f32.mrf.mxu1 }
 0x302   : > { %v784_v7 = vpop.f32.mrf.mxu1 }
 0x304   : > { %v785_v36 = vpop.f32.mrf.mxu1 }
 0x306   : > { %v1172_v51 = vpop.f32.mrf.mxu1 }
 0x307   : > { %v1173_v3 = vadd.f32 %v1172_v51, %v1133_v8  ;;  %v3532_v51 = vmov 12  }
 0x308   : > { %v1174_v54 = vpop.f32.mrf.mxu1 }
 0x309   : > { %v1957_v61 = vmul.f32 -1.442695, %v1173_v3  ;;  %v1175_v26 = vadd.f32 %v1174_v54, %v1133_v8  ;;  %v3531_v8 = vmov 10   ;;  %v3534_v54 = vmov 26  }
 0x30a   : > { %v1176_v2 = vpop.f32.mrf.mxu1 }
 0x30b   : > { %2139 = vpow2.f32 %v1957_v61  ;;  %v1958_v59 = vmul.f32 -1.442695, %v1175_v26  ;;  %v3535_v61 = vmov 13   ;;  %v3537_v2 = vmov 25  }
 0x30c   : > { %v1177_v58 = vpop.f32.mrf.mxu1 }
 0x30d   : > { %2141 = vpow2.f32 %v1958_v59  ;;  %v1227_v59 = vpop.permute.xlu1 %1226 }
 0x311   : > { %v1273_v58 = vpop.permute.xlu1 %1272 }
 0x318   : > { %v2140_v56 = vpop.eup %2139 }
 0x319   : > { %v1185_v25 = vadd.f32 1.0, %v2140_v56  ;;  %v1279_v56 = vpop.permute.xlu1 %1278 }
 0x31a   : > { %v2142_v57 = vpop.eup %2141 }
 0x31b   : > { %2143 = vrcp.f32 %v1185_v25  ;;  %v1186_v34 = vadd.f32 1.0, %v2142_v57 }
 0x31d   : > { %2145 = vrcp.f32 %v1186_v34  ;;  %v1287_v25 = vpop.permute.xlu1 %1286 }
 0x321   : > { %v1249_v57 = vpop.permute.xlu1 %1248 }
 0x325   : > { %v2743_v34 = vpop.permute.xlu1 %1360 }
 0x328   : > { %v2144_v30 = vpop.eup %2143 }
 0x329   : > { %v2703_v35 = vmul.f32 %v2144_v30, %v1173_v3  ;;  %v3533_v3 = vmov 11   ;;  %v2745_v30 = vpop.permute.xlu1 %1366 }
 0x32a   : > { %v2146_v60 = vpop.eup %2145 }
 0x32b   : > { %v2705_v28 = vmul.f32 %v2146_v60, %v1175_v26  ;;  %1217 = vrot.lane.b32.xlu1 %v2703_v35, %s2191_s8  ;;  %1193 = vrot.lane.b32.xlu0 %v2703_v35, %s2192_s9  ;;  %v1476_v49 = vpack.c.bf16 %v2703_v35, %v2703_v35  ;;  %v3536_v26 = vmov 14   ;;  %v1233_v60 = vpop.permute.xlu0 %1232  ;;  %v1289_v9 = vmul.f32 %v1287_v25, %v2703_v35 }
 0x32d   : > { %v1477_v7 = vpack.c.bf16 %v2705_v28, %v2705_v28  ;;  %v1535_v36 = vsel %vm739_vm1, %v1476_v49, 0  ;;  %v2747_v49 = vpop.permute.xlu1 %1302 }
 0x32f   : > { %1195 = vrot.lane.b32.xlu1 %v2705_v28, %s2192_s9  ;;  %1964 = vmatprep.subr.msk.bf16.mxu1 %vm739_vm1, %v1477_v7  ;;  %v1241_v7 = vpop.permute.xlu0 %1240 }
 0x330   : > { %1201 = vrot.lane.b32.xlu0 %v2703_v35, %s2193_s10  ;;  %1555 = vmatpush1.bf16.msra.mxu1 %v1535_v36 }
 0x331   : > { %v1375_v36 = vpop.permute.xlu1 %1374 }
 0x332   : > { %v1378_v50 = vmul.f32 %v1375_v36, %v2705_v28 }
 0x333   : > { %1203 = vrot.lane.b32.xlu1 %v2705_v28, %s2193_s10  ;;  %v2749_v4 = vpop.permute.xlu0 %1294 }
 0x334   : > { %1209 = vrot.lane.b32.xlu0 %v2703_v35, %s2194_s11 }
 0x335   : > { %v1415_v13 = vpop.permute.xlu1 %1414 }
 0x337   : > { %1211 = vrot.lane.b32.xlu1 %v2705_v28, %s2194_s11  ;;  %v1257_v1 = vpop.permute.xlu0 %1256 }
 0x338   : > { %1219 = vrot.lane.b32.xlu0 %v2705_v28, %s2191_s8 }
 0x339   : > { %v2751_v0 = vpop.permute.xlu1 %1382 }
 0x33b   : > { %1430 = vperm.xlu1 %2063, %v2567_v18  }
 0x33c   : > { %1438 = vperm.xlu0 %2064, %v2567_v18  }
 0x33d   : > { %v2753_v45 = vpop.permute.xlu1 %1390 }
 0x33f   : > { %2065 = vset.pattern.permute.xlu1 %v3531_v8  ;;  %v1244_v8 = vmul.f32 %v1241_v7, %v2705_v28 }
 0x340   : > { %2067 = vset.pattern.permute.xlu0 %v3532_v51  ;;  %1320 = vperm.xlu1 %2065, %v2567_v18   ;;  %v1243_v51 = vmul.f32 %v1241_v7, %v2703_v35 }
 0x341   : > { %1334 = vperm.xlu0 %2067, %v2567_v18  }
 0x344   : > { %2066 = vset.pattern.permute.xlu1 %v3533_v3 }
 0x345   : > { %1326 = vperm.xlu1 %2066, %v2567_v18   ;;  %2070 = vset.pattern.permute.xlu0 %v3534_v54  ;;  %v1409_v54 = vpop.permute.xlu0 %1408 }
 0x349   : > { %2068 = vset.pattern.permute.xlu1 %v3535_v61  ;;  %v2755_v52 = vpop.permute.xlu0 %1422 }
 0x34a   : > { %1342 = vperm.xlu1 %2068, %v2567_v18  }
 0x34e   : > { %2069 = vset.pattern.permute.xlu1 %v3536_v26 }
 0x34f   : > { %1350 = vperm.xlu1 %2069, %v2567_v18  }
 0x353   : > { %2071 = vset.pattern.permute.xlu1 %v3537_v2 }
 0x39d   : > { %v1218_v63 = vpop.permute.xlu1 %1217  ;;  %v1194_v17 = vpop.permute.xlu0 %1193 }
 0x3a1   : > { %v1196_v11 = vpop.permute.xlu1 %1195 }
 0x3a2   : > { %v1197_v48 = vsel %vm354_vm2, %v1194_v17, %v1196_v11  ;;  %v1198_v16 = vsel %vm354_vm2, %v1196_v11, %v1194_v17  ;;  %v1202_v10 = vpop.permute.xlu0 %1201  ;;  %v1290_v11 = vmul.f32 %v1287_v25, %v2705_v28  ;;  %v2775_v17 = vmul.f32 %v1375_v36, %v2703_v35 }
 0x3a3   : > { %v2762_v22 = vmul.f32 %v1198_v16, %v2391_v39  ;;  %v2765_v43 = vmul.f32 %v1197_v48, %v2394_v40 }
 0x3a5   : > { %v1204_v26 = vpop.permute.xlu1 %1203  ;;  %v1230_v12 = vmul.f32 %v1227_v59, %v2765_v43  ;;  %v1411_v39 = vmul.f32 %v1409_v54, %v2762_v22 }
 0x3a6   : > { %v1205_v24 = vsel %vm374_vm3, %v1202_v10, %v1204_v26  ;;  %v1206_v3 = vsel %vm374_vm3, %v1204_v26, %v1202_v10  ;;  %v1210_v61 = vpop.permute.xlu0 %1209  ;;  %v1229_v10 = vmul.f32 %v1227_v59, %v2762_v22 }
 0x3a7   : > { %v2778_v48 = vmul.f32 %v1206_v3, %v2411_v31  ;;  %v2781_v16 = vmul.f32 %v1205_v24, %v2414_v37  ;;  %v1412_v3 = vmul.f32 %v1409_v54, %v2765_v43 }
 0x3a9   : > { %v1212_v26 = vpop.permute.xlu1 %1211  ;;  %v1236_v25 = vmul.f32 %v1233_v60, %v2781_v16  ;;  %v1235_v40 = vmul.f32 %v1233_v60, %v2778_v48  ;;  %v1282_v37 = vmul.f32 %v1279_v56, %v2781_v16  ;;  %v1281_v59 = vmul.f32 %v1279_v56, %v2778_v48 }
 0x3aa   : > { %v1213_v24 = vsel %vm394_vm4, %v1210_v61, %v1212_v26  ;;  %v1214_v7 = vsel %vm394_vm4, %v1212_v26, %v1210_v61  ;;  %v1220_v36 = vpop.permute.xlu0 %1219 }
 0x3ab   : > { %v2798_v31 = vmul.f32 %v1213_v24, %v2424_v38  ;;  %v2801_v60 = vmul.f32 %v1214_v7, %v2427_v53  ;;  %v1221_v54 = vsel %vm414_vm5, %v1218_v63, %v1220_v36  ;;  %v1222_v2 = vsel %vm414_vm5, %v1220_v36, %v1218_v63 }
 0x3ac   : > { %v2808_v44 = vmul.f32 %v1221_v54, %v2431_v41  ;;  %v2811_v61 = vmul.f32 %v1222_v2, %v2434_v47  ;;  %v1238_v26 = vadd.f32 %v1236_v25, %v1230_v12  ;;  %v1237_v56 = vadd.f32 %v1235_v40, %v1229_v10 }
 0x3ad   : > { %v1252_v24 = vmul.f32 %v1249_v57, %v2801_v60  ;;  %v1251_v38 = vmul.f32 %v1249_v57, %v2798_v31  ;;  %v1276_v7 = vmul.f32 %v1273_v58, %v2765_v43  ;;  %v1275_v53 = vmul.f32 %v1273_v58, %v2762_v22 }
 0x3ae   : > { %v1246_v55 = vadd.f32 %v1244_v8, %v1238_v26  ;;  %v1245_v21 = vadd.f32 %v1243_v51, %v1237_v56  ;;  %v1418_v63 = vmul.f32 %v1415_v13, %v2781_v16  ;;  %v1364_v36 = vmul.f32 %v2743_v34, %v2765_v43 }
 0x3af   : > { %v1260_v2 = vmul.f32 %v1257_v1, %v2811_v61  ;;  %v1284_v54 = vadd.f32 %v1282_v37, %v1276_v7  ;;  %v1298_v40 = vmul.f32 %v2749_v4, %v2801_v60  ;;  %v1363_v12 = vmul.f32 %v2743_v34, %v2762_v22 }
 0x3b0   : > { %v1254_v57 = vadd.f32 %v1252_v24, %v1246_v55  ;;  %v1253_v10 = vadd.f32 %v1251_v38, %v1245_v21  ;;  %v1259_v58 = vmul.f32 %v1257_v1, %v2808_v44  ;;  %v1283_v8 = vadd.f32 %v1281_v59, %v1275_v53 }
 0x3b1   : > { %v1417_v51 = vmul.f32 %v1415_v13, %v2778_v48  ;;  %v1292_v25 = vadd.f32 %v1290_v11, %v1284_v54  ;;  %v1297_v26 = vmul.f32 %v2749_v4, %v2798_v31  ;;  %v1370_v37 = vmul.f32 %v2745_v30, %v2781_v16 }
 0x3b2   : > { %v1262_v56 = vadd.f32 %v1260_v2, %v1254_v57  ;;  %v1261_v7 = vadd.f32 %v1259_v58, %v1253_v10  ;;  %v1420_v47 = vadd.f32 %v1418_v63, %v1412_v3  ;;  %v1291_v41 = vadd.f32 %v1289_v9, %v1283_v8 }
 0x3b3   : > { %v1300_v42 = vadd.f32 %v1298_v40, %v1292_v25  ;;  %v1372_v34 = vadd.f32 %v1370_v37, %v1364_v36  ;;  %v1386_v38 = vmul.f32 %v2751_v0, %v2801_v60  ;;  %v1369_v1 = vmul.f32 %v2745_v30, %v2778_v48 }
 0x3b4   : > { %1265 = vrot.lane.b32.xlu1 %v1262_v56, %s2201_s20  ;;  %1263 = vrot.lane.b32.xlu0 %v1261_v7, %s2201_s20  ;;  %v1306_v4 = vmul.f32 %v2747_v49, %v2811_v61  ;;  %v1299_v13 = vadd.f32 %v1297_v26, %v1291_v41  ;;  %v1305_v53 = vmul.f32 %v2747_v49, %v2808_v44 }
 0x3b5   : > { %v1419_v55 = vadd.f32 %v1417_v51, %v1411_v39  ;;  %v1380_v21 = vadd.f32 %v1378_v50, %v1372_v34  ;;  %v1371_v9 = vadd.f32 %v1369_v1, %v1363_v12  ;;  %v1385_v11 = vmul.f32 %v2751_v0, %v2798_v31  ;;  %v2869_v34 = vld [vmem:[%s3416_s4] sm:$0xff] }
 0x3b6   : > { %v1425_v30 = vmul.f32 %v2755_v52, %v2703_v35  ;;  %v1426_v3 = vmul.f32 %v2755_v52, %v2705_v28  ;;  %v1431_v59 = vpop.permute.xlu1 %1430  ;;  %v1308_v24 = vadd.f32 %v1306_v4, %v1300_v42  ;;  %v1307_v63 = vadd.f32 %v1305_v53, %v1299_v13 }
 0x3b7   : > { %v1433_v41 = vmul.f32 %v1431_v59, %v2798_v31  ;;  %v1434_v36 = vmul.f32 %v1431_v59, %v2801_v60  ;;  %v1388_v49 = vadd.f32 %v1386_v38, %v1380_v21  ;;  %v1379_v39 = vadd.f32 %v2775_v17, %v1371_v9  ;;  %v1439_v52 = vpop.permute.xlu0 %1438 }
 0x3b8   : > { %v1428_v50 = vadd.f32 %v1426_v3, %v1420_v47  ;;  %1311 = vrot.lane.b32.xlu1 %v1308_v24, %s2202_s22  ;;  %1309 = vrot.lane.b32.xlu0 %v1307_v63, %s2202_s22  ;;  %v1394_v0 = vmul.f32 %v2753_v45, %v2811_v61  ;;  %v1427_v2 = vadd.f32 %v1425_v30, %v1419_v55  ;;  %v3538_v9 = vmov 0  }
 0x3b9   : > { %v1387_v54 = vadd.f32 %v1385_v11, %v1379_v39  ;;  %v1393_v42 = vmul.f32 %v2753_v45, %v2808_v44  ;;  %v1442_v47 = vmul.f32 %v1439_v52, %v2811_v61  ;;  %v1441_v17 = vmul.f32 %v1439_v52, %v2808_v44 }
 0x3ba   : > { %v1436_v40 = vadd.f32 %v1434_v36, %v1428_v50  ;;  %v1396_v12 = vadd.f32 %v1394_v0, %v1388_v49  ;;  %v1435_v57 = vadd.f32 %v1433_v41, %v1427_v2 }
 0x3bb   : > { %v1321_v10 = vpop.permute.xlu1 %1320  ;;  %v1395_v58 = vadd.f32 %v1393_v42, %v1387_v54 }
 0x3bc   : > { %1399 = vrot.lane.b32.xlu1 %v1396_v12, %s2203_s24  ;;  %v1444_v8 = vadd.f32 %v1442_v47, %v1436_v40  ;;  %v1443_v51 = vadd.f32 %v1441_v17, %v1435_v57  ;;  %v1335_v25 = vpop.permute.xlu0 %1334  ;;  %v1323_v45 = vmul.f32 %v1321_v10, %v2762_v22  ;;  %v1324_v37 = vmul.f32 %v1321_v10, %v2765_v43 }
 0x3bd   : > { %1397 = vrot.lane.b32.xlu0 %v1395_v58, %s2203_s24  ;;  %v1337_v38 = vmul.f32 %v1335_v25, %v2703_v35  ;;  %v1338_v1 = vmul.f32 %v1335_v25, %v2705_v28  ;;  %v3539_v35 = vmov 1  }
 0x3c0   : > { %1447 = vrot.lane.b32.xlu1 %v1444_v8, %s2204_s25  ;;  %v1327_v26 = vpop.permute.xlu1 %1326 }
 0x3c1   : > { %1445 = vrot.lane.b32.xlu0 %v1443_v51, %s2204_s25  ;;  %v1329_v56 = vmul.f32 %v1327_v26, %v2778_v48  ;;  %v1330_v7 = vmul.f32 %v1327_v26, %v2781_v16 }
 0x3c3   : > { %v1331_v4 = vadd.f32 %v1329_v56, %v1323_v45  ;;  %v1332_v13 = vadd.f32 %v1330_v7, %v1324_v37  ;;  %v831_v56 = vadd.f32 %v2695_v5, %v2699_v14  ;;  %v833_v7 = vadd.f32 %v2697_v6, %v2701_v29  ;;  %v2156_v29 = vld [vmem:[%s2267_s29 + $0x8] sm:$0xff] }
 0x3c4   : > { %840 = vperm.xlu1 %2071, %v2869_v34  }
 0x3c5   : > { %1456 = vperm.xlu0 %2070, %v2567_v18   ;;  %v1343_v22 = vpop.permute.xlu1 %1342  ;;  %v1339_v43 = vadd.f32 %v1337_v38, %v1331_v4  ;;  %v1340_v48 = vadd.f32 %v1338_v1, %v1332_v13 }
 0x3c6   : > { %v1345_v16 = vmul.f32 %v1343_v22, %v2798_v31  ;;  %v1346_v53 = vmul.f32 %v1343_v22, %v2801_v60 }
 0x3c8   : > { %v1347_v55 = vadd.f32 %v1345_v16, %v1339_v43  ;;  %v1348_v21 = vadd.f32 %v1346_v53, %v1340_v48  ;;  %2072 = vset.pattern.permute.xlu1 %v3538_v9  ;;  %v2155_v48 = vld [vmem:[%s2267_s29] sm:$0xff] }
 0x3c9   : > { %2073 = vset.pattern.permute.xlu0 %v3539_v35 }
 0x3ca   : > { %v1351_v28 = vpop.permute.xlu1 %1350 }
 0x3cb   : > { %v1353_v11 = vmul.f32 %v1351_v28, %v2808_v44  ;;  %v1354_v30 = vmul.f32 %v1351_v28, %v2811_v61 }
 0x3cd   : > { %v1355_v3 = vadd.f32 %v1353_v11, %v1347_v55  ;;  %v1356_v18 = vadd.f32 %v1354_v30, %v1348_v21 }
 0x426   : > { %v1266_v59 = vpop.permute.xlu1 %1265  ;;  %v1264_v24 = vpop.permute.xlu0 %1263 }
 0x427   : > { %v1267_v39 = vsel %vm472_vm8, %v1264_v24, %v1266_v59  ;;  %v1268_v44 = vsel %vm472_vm8, %v1266_v59, %v1264_v24  ;;  %v3542_v59 = vmov 3   ;;  %v3543_v24 = vmov 5  }
 0x428   : > { %v1269_v0 = vmul.f32 %v1268_v44, %v2623_v19  ;;  %v1270_v2 = vmul.f32 %v1267_v39, %v2626_v62  ;;  %v3546_v44 = vmov 25  }
 0x42a   : > { %v1312_v63 = vpop.permute.xlu1 %1311  ;;  %v1310_v41 = vpop.permute.xlu0 %1309 }
 0x42b   : > { %v1313_v31 = vsel %vm530_vm7, %v1310_v41, %v1312_v63  ;;  %v1314_v60 = vsel %vm530_vm7, %v1312_v63, %v1310_v41  ;;  %v3544_v63 = vmov 8   ;;  %v3545_v41 = vmov 6  }
 0x42c   : > { %v1315_v61 = vmul.f32 %v1314_v60, %v2613_v27  ;;  %v1316_v50 = vmul.f32 %v1313_v31, %v2616_v15 }
 0x42e   : > { %v1400_v36 = vpop.permute.xlu1 %1399  ;;  %v1317_v52 = vadd.f32 %v1315_v61, %v1269_v0  ;;  %v1318_v54 = vadd.f32 %v1316_v50, %v1270_v2  ;;  %v1961_v0 = vld [vmem:[%s3414_s2 + $0x4] sm:$0xf]  ;;  %v1475_v2 = vld [vmem:[%s3414_s2] sm:$0xf] }
 0x42f   : > { %v1398_v49 = vpop.permute.xlu0 %1397  ;;  %1965 = vmatmul.mubr.msk.bf16.vlgmr.msra.gmra.mxu1 %vm735_vm6, %v1475_v2 }
 0x430   : > { %v1401_v12 = vsel %vm630_vm9, %v1398_v49, %v1400_v36  ;;  %v1402_v57 = vsel %vm630_vm9, %v1400_v36, %v1398_v49  ;;  %v1357_v47 = vadd.f32 %v1355_v3, %v1317_v52  ;;  %v1358_v17 = vadd.f32 %v1356_v18, %v1318_v54 }
 0x431   : > { %v1403_v8 = vmul.f32 %v1401_v12, %v2643_v46  ;;  %v1404_v51 = vmul.f32 %v1402_v57, %v2649_v20  ;;  %v3540_v3 = vmov 2   ;;  %v3541_v18 = vmov 4  }
 0x432   : > { %v1448_v42 = vpop.permute.xlu1 %1447 }
 0x433   : > { %v1446_v40 = vpop.permute.xlu0 %1445  ;;  %v1405_v45 = vadd.f32 %v1403_v8, %v1357_v47  ;;  %v1406_v37 = vadd.f32 %v1404_v51, %v1358_v17 }
 0x434   : > { %v1449_v10 = vsel %vm690_vm10, %v1446_v40, %v1448_v42  ;;  %v1450_v58 = vsel %vm690_vm10, %v1448_v42, %v1446_v40 }
 0x435   : > { %v1451_v25 = vmul.f32 %v1449_v10, %v2658_v32  ;;  %v1452_v26 = vmul.f32 %v1450_v58, %v2661_v23 }
 0x437   : > { %v1453_v1 = vadd.f32 %v1451_v25, %v1405_v45  ;;  %v1454_v4 = vadd.f32 %v1452_v26, %v1406_v37  ;;  %v3547_v45 = vld [vmem:[#allocation2_spill] sm:$0xff] }
 0x43f   : > { %v841_v38 = vpop.permute.xlu1 %840 }
 0x440   : > { %v2909_v13 = vadd.f32 %v841_v38, %v831_v56  ;;  %v2911_v22 = vadd.f32 %v841_v38, %v833_v7  ;;  %v1457_v43 = vpop.permute.xlu0 %1456  ;;  %v3548_v56 = vld [vmem:[#allocation4_spill] sm:$0xff]  ;;  %v3549_v38 = vld [vmem:[#allocation3_spill] sm:$0xff] }
 0x441   : > { %v1459_v5 = vadd.f32 %v1457_v43, %v1453_v1  ;;  %v1460_v14 = vadd.f32 %v1457_v43, %v1454_v4  ;;  %v3550_v4 = vld [vmem:[#allocation5_spill] sm:$0xff] }
 0x442   : > { %v1113_v6 = vadd.f32 %v2155_v48, %v2909_v13  ;;  %v1114_v16 = vadd.f32 %v2156_v29, %v2911_v22  ;;  %845 = vrot.lane.b32.xlu1 %v2909_v13, %s2192_s9  ;;  %847 = vrot.lane.b32.xlu0 %v2911_v22, %s2192_s9 }
 0x443   : > { %v1959_v53 = vmul.f32 -1.442695, %v1459_v5  ;;  %v1960_v55 = vmul.f32 -1.442695, %v1460_v14 }
 0x444   : > { %1115 = vst [vmem:[%s2918_s16] sm:$0xff] %v1113_v6  ;;  %1116 = vst [vmem:[%s2918_s16 + $0x8] sm:$0xff] %v1114_v16 }
 0x445   : > { %2147 = vpow2.f32 %v1959_v53 }
 0x446   : > { %2149 = vpow2.f32 %v1960_v55  ;;  %853 = vrot.lane.b32.xlu1 %v2909_v13, %s2193_s10  ;;  %855 = vrot.lane.b32.xlu0 %v2911_v22, %s2193_s10 }
 0x44a   : > { %861 = vrot.lane.b32.xlu1 %v2909_v13, %s2194_s11  ;;  %863 = vrot.lane.b32.xlu0 %v2911_v22, %s2194_s11 }
 0x44e   : > { %869 = vrot.lane.b32.xlu1 %v2909_v13, %s2191_s8  ;;  %871 = vrot.lane.b32.xlu0 %v2911_v22, %s2191_s8 }
 0x452   : > { %v2148_v21 = vpop.eup %2147  ;;  %878 = vperm.xlu1 %2072, %v2869_v34   ;;  %884 = vperm.xlu0 %2073, %v2869_v34  }
 0x453   : > { %v2150_v28 = vpop.eup %2149  ;;  %v1467_v11 = vadd.f32 1.0, %v2148_v21 }
 0x454   : > { %v1468_v30 = vadd.f32 1.0, %v2150_v28  ;;  %v3551_v28 = vld [vmem:[#allocation6_spill] sm:$0xff] }
 0x455   : > { %2151 = vrcp.f32 %v1467_v11 }
 0x456   : > { %2153 = vrcp.f32 %v1468_v30  ;;  %2074 = vset.pattern.permute.xlu1 %v3540_v3  ;;  %2076 = vset.pattern.permute.xlu0 %v3541_v18  ;;  %v3552_v30 = vld [vmem:[#allocation7_spill] sm:$0xff] }
 0x457   : > { %892 = vperm.xlu1 %2074, %v2869_v34   ;;  %908 = vperm.xlu0 %2076, %v2869_v34  }
 0x45b   : > { %2075 = vset.pattern.permute.xlu1 %v3542_v59  ;;  %2077 = vset.pattern.permute.xlu0 %v3543_v24 }
 0x45c   : > { %900 = vperm.xlu1 %2075, %v2869_v34   ;;  %924 = vperm.xlu0 %2077, %v2869_v34  }
 0x460   : > { %2080 = vset.pattern.permute.xlu0 %v3544_v63  ;;  %2078 = vset.pattern.permute.xlu1 %v3545_v41 }
 0x461   : > { %946 = vperm.xlu0 %2080, %v2869_v34  }
 0x462   : > { %v2152_v31 = vpop.eup %2151 }
 0x463   : > { %v2154_v60 = vpop.eup %2153  ;;  %v1473_v36 = vmul.f32 %v2152_v31, %v1459_v5 }
 0x464   : > { %v1474_v49 = vmul.f32 %v2154_v60, %v1460_v14 }
 0x465   : > { %v1479_v39 = vpack.c.bf16 %v1473_v36, %v1473_v36  ;;  %2083 = vset.pattern.permute.xlu0 %v3546_v44 }
 0x466   : > { %v1480_v61 = vpack.c.bf16 %v1474_v49, %v1474_v49  ;;  %v3553_v49 = vld [vmem:[#allocation8_spill] sm:$0xff] }
 0x467   : > { %v1485_v50 = vsel %vm739_vm1, %v1479_v39, 0 }
 0x468   : > { %1962 = vmatprep.subr.msk.bf16.mxu0 %vm739_vm1, %v1480_v61 }
 0x469   : > { %1505 = vmatpush1.bf16.msra.mxu0 %v1485_v50 }
 0x46c   : > { %1963 = vmatmul.mubr.msk.bf16.vlgmr.msra.gmra.mxu0 %vm735_vm6, %v1961_v0 }
 0x4b4   : > { %v846_v52 = vpop.permute.xlu1 %845  ;;  %v848_v54 = vpop.permute.xlu0 %847 }
 0x4b5   : > { %v850_v47 = vsel %vm354_vm2, %v848_v54, %v846_v52  ;;  %v849_v51 = vsel %vm354_vm2, %v846_v52, %v848_v54 }
 0x4b6   : > { %v2975_v37 = vmul.f32 %v850_v47, %v3547_v45  ;;  %v2981_v1 = vmul.f32 %v849_v51, %v3549_v38 }
 0x4b8   : > { %v854_v42 = vpop.permute.xlu1 %853  ;;  %v856_v40 = vpop.permute.xlu0 %855 }
 0x4b9   : > { %v858_v17 = vsel %vm374_vm3, %v856_v40, %v854_v42  ;;  %v857_v25 = vsel %vm374_vm3, %v854_v42, %v856_v40 }
 0x4ba   : > { %v2978_v7 = vmul.f32 %v858_v17, %v3548_v56  ;;  %v2984_v43 = vmul.f32 %v857_v25, %v3550_v4 }
 0x4bc   : > { %v862_v12 = vpop.permute.xlu1 %861  ;;  %v864_v57 = vpop.permute.xlu0 %863 }
 0x4bd   : > { %v865_v6 = vsel %vm394_vm4, %v862_v12, %v864_v57  ;;  %v866_v29 = vsel %vm394_vm4, %v864_v57, %v862_v12  ;;  %v3554_v57 = vld [vmem:[#allocation9_spill] sm:$0xff] }
 0x4be   : > { %v2998_v11 = vmul.f32 %v865_v6, %v3551_v28  ;;  %v3001_v31 = vmul.f32 %v866_v29, %v3552_v30 }
 0x4c0   : > { %v870_v10 = vpop.permute.xlu1 %869  ;;  %v872_v58 = vpop.permute.xlu0 %871 }
 0x4c1   : > { %v873_v16 = vsel %vm414_vm5, %v870_v10, %v872_v58  ;;  %v874_v54 = vsel %vm414_vm5, %v872_v58, %v870_v10  ;;  %v3556_v10 = vmov 9   ;;  %v3557_v58 = vmov 10  }
 0x4c2   : > { %v3005_v39 = vmul.f32 %v873_v16, %v3553_v49  ;;  %v3013_v47 = vmul.f32 %v874_v54, %v3554_v57 }
 0x4cd   : > { %v879_v8 = vpop.permute.xlu1 %878  ;;  %v885_v26 = vpop.permute.xlu0 %884 }
 0x4ce   : > { %v881_v5 = vmul.f32 %v879_v8, %v2975_v37  ;;  %v887_v14 = vmul.f32 %v885_v26, %v2978_v7  ;;  %v882_v53 = vmul.f32 %v879_v8, %v2981_v1  ;;  %v888_v55 = vmul.f32 %v885_v26, %v2984_v43 }
 0x4cf   : > { %v3555_v26 = vmov 7  }
 0x4d0   : > { %v889_v60 = vadd.f32 %v887_v14, %v881_v5  ;;  %v890_v50 = vadd.f32 %v888_v55, %v882_v53 }
 0x4d2   : > { %v893_v48 = vpop.permute.xlu1 %892  ;;  %v909_v44 = vpop.permute.xlu0 %908 }
 0x4d3   : > { %v895_v21 = vmul.f32 %v893_v48, %v2909_v13  ;;  %v896_v36 = vmul.f32 %v893_v48, %v2911_v22  ;;  %v911_v40 = vmul.f32 %v909_v44, %v3005_v39  ;;  %v912_v51 = vmul.f32 %v909_v44, %v3013_v47 }
 0x4d5   : > { %v897_v0 = vadd.f32 %v895_v21, %v889_v60  ;;  %v898_v42 = vadd.f32 %v896_v36, %v890_v50 }
 0x4d7   : > { %v901_v61 = vpop.permute.xlu1 %900  ;;  %v925_v29 = vpop.permute.xlu0 %924 }
 0x4d8   : > { %v903_v2 = vmul.f32 %v901_v61, %v2998_v11  ;;  %v904_v52 = vmul.f32 %v901_v61, %v3001_v31  ;;  %v927_v21 = vmul.f32 %v925_v29, %v2975_v37  ;;  %v928_v60 = vmul.f32 %v925_v29, %v2981_v1 }
 0x4da   : > { %v905_v12 = vadd.f32 %v903_v2, %v897_v0  ;;  %v906_v17 = vadd.f32 %v904_v52, %v898_v42 }
 0x4dc   : > { %v913_v8 = vadd.f32 %v911_v40, %v905_v12  ;;  %v914_v25 = vadd.f32 %v912_v51, %v906_v17  ;;  %v947_v36 = vpop.permute.xlu0 %946 }
 0x4dd   : > { %v949_v40 = vmul.f32 %v947_v36, %v2998_v11  ;;  %v950_v12 = vmul.f32 %v947_v36, %v3001_v31  ;;  %v3559_v36 = vmov 11  }
 0x4de   : > { %915 = vrot.lane.b32.xlu1 %v913_v8, %s2201_s20 }
 0x4e2   : > { %917 = vrot.lane.b32.xlu1 %v914_v25, %s2201_s20 }
 0x4e6   : > { %930 = vperm.xlu1 %2078, %v2869_v34  }
 0x4ea   : > { %2079 = vset.pattern.permute.xlu1 %v3555_v26 }
 0x4eb   : > { %938 = vperm.xlu1 %2079, %v2869_v34  }
 0x4ef   : > { %2081 = vset.pattern.permute.xlu1 %v3556_v10  ;;  %v1574_v54 = vpop.f32.mrf.mxu1 }
 0x4f0   : > { %954 = vperm.xlu1 %2081, %v2869_v34  }
 0x4f4   : > { %2082 = vset.pattern.permute.xlu1 %v3557_v58 }
 0x52c   : > { %v1524_v61 = vpop.f32.mrf.mxu0 }
 0x52d   : > { %v3038_v42 = vadd.f32 %v1574_v54, %v1524_v61  ;;  %v3561_v54 = vmov 12  }
 0x550   : > { %v916_v5 = vpop.permute.xlu1 %915 }
 0x554   : > { %v918_v14 = vpop.permute.xlu1 %917 }
 0x555   : > { %v3026_v48 = vsel %vm472_vm8, %v916_v5, %v918_v14  ;;  %v3030_v6 = vsel %vm472_vm8, %v918_v14, %v916_v5 }
 0x561   : > { %v931_v16 = vpop.permute.xlu1 %930 }
 0x562   : > { %v933_v53 = vmul.f32 %v931_v16, %v2978_v7  ;;  %v934_v55 = vmul.f32 %v931_v16, %v2984_v43 }
 0x564   : > { %v935_v50 = vadd.f32 %v933_v53, %v927_v21  ;;  %v936_v0 = vadd.f32 %v934_v55, %v928_v60  ;;  %v1526_v55 = vpop.f32.mrf.mxu0  ;;  %v1576_v21 = vpop.f32.mrf.mxu1  ;;  %v3558_v60 = vmov 13  }
 0x566   : > { %v939_v44 = vpop.permute.xlu1 %938  ;;  %v1528_v61 = vpop.f32.mrf.mxu0 }
 0x567   : > { %v941_v2 = vmul.f32 %v939_v44, %v2909_v13  ;;  %v942_v52 = vmul.f32 %v939_v44, %v2911_v22  ;;  %v1577_v44 = vadd.f32 %v1576_v21, %v1526_v55  ;;  %v922_v55 = vmul.f32 %v3026_v48, %v2626_v62  ;;  %v3573_v48 = vld [vmem:[#allocation16_spill] sm:$0xff] }
 0x569   : > { %v943_v17 = vadd.f32 %v941_v2, %v935_v50  ;;  %v944_v8 = vadd.f32 %v942_v52, %v936_v0  ;;  %v1578_v50 = vpop.f32.mrf.mxu1  ;;  %v1529_v0 = vpop.f32.mrf.mxu0  ;;  %v3560_v52 = vmov 16  }
 0x56b   : > { %v955_v51 = vpop.permute.xlu1 %954  ;;  %v951_v25 = vadd.f32 %v949_v40, %v943_v17  ;;  %v952_v5 = vadd.f32 %v950_v12, %v944_v8  ;;  %v1579_v2 = vpop.f32.mrf.mxu1  ;;  %v3562_v40 = vmov 19   ;;  %v3563_v12 = vmov 14  }
 0x56c   : > { %v957_v14 = vmul.f32 %v955_v51, %v3005_v39  ;;  %v958_v29 = vmul.f32 %v955_v51, %v3013_v47  ;;  %v3564_v17 = vmov 23   ;;  %v3565_v8 = vmov 15  }
 0x56d   : > { %v3566_v51 = vmov 17  }
 0x56e   : > { %v959_v16 = vadd.f32 %v957_v14, %v951_v25  ;;  %v960_v53 = vadd.f32 %v958_v29, %v952_v5  ;;  %v3567_v25 = vmov 18   ;;  %v3568_v5 = vmov 21  }
 0x56f   : > { %v3571_v14 = vmov 24  }
 0x570   : > { %963 = vrot.lane.b32.xlu0 %v960_v53, %s2202_s22  ;;  %961 = vrot.lane.b32.xlu1 %v959_v16, %s2202_s22  ;;  %v921_v53 = vmul.f32 %v3030_v6, %v2623_v19 }
 0x574   : > { %1584 = vperm.xlu0 %2083, %v2869_v34   ;;  %972 = vperm.xlu1 %2082, %v2869_v34  }
 0x578   : > { %2086 = vset.pattern.permute.xlu0 %v3558_v60  ;;  %2084 = vset.pattern.permute.xlu1 %v3559_v36 }
 0x579   : > { %994 = vperm.xlu0 %2086, %v2869_v34   ;;  %978 = vperm.xlu1 %2084, %v2869_v34  }
 0x57d   : > { %2089 = vset.pattern.permute.xlu0 %v3560_v52  ;;  %2085 = vset.pattern.permute.xlu1 %v3561_v54 }
 0x57e   : > { %1018 = vperm.xlu0 %2089, %v2869_v34   ;;  %986 = vperm.xlu1 %2085, %v2869_v34  }
 0x582   : > { %2092 = vset.pattern.permute.xlu0 %v3562_v40  ;;  %2087 = vset.pattern.permute.xlu1 %v3563_v12 }
 0x583   : > { %1042 = vperm.xlu0 %2092, %v2869_v34   ;;  %1002 = vperm.xlu1 %2087, %v2869_v34  }
 0x587   : > { %2095 = vset.pattern.permute.xlu0 %v3564_v17  ;;  %2088 = vset.pattern.permute.xlu1 %v3565_v8 }
 0x588   : > { %1082 = vperm.xlu0 %2095, %v2869_v34   ;;  %1012 = vperm.xlu1 %2088, %v2869_v34  }
 0x58c   : > { %2098 = vset.pattern.permute.xlu0 %v3539_v35  ;;  %2090 = vset.pattern.permute.xlu1 %v3566_v51  ;;  %v3569_v35 = vmov 20  }
 0x58d   : > { %1628 = vperm.xlu0 %2098, %v2869_v34   ;;  %1026 = vperm.xlu1 %2090, %v2869_v34  }
 0x591   : > { %2101 = vset.pattern.permute.xlu0 %v3540_v3  ;;  %2091 = vset.pattern.permute.xlu1 %v3567_v25  ;;  %v3570_v3 = vmov 22  }
 0x592   : > { %1636 = vperm.xlu0 %2101, %v2869_v34   ;;  %1034 = vperm.xlu1 %2091, %v2869_v34  }
 0x596   : > { %2104 = vset.pattern.permute.xlu0 %v3544_v63  ;;  %2093 = vset.pattern.permute.xlu1 %v3568_v5 }
 0x597   : > { %1690 = vperm.xlu0 %2104, %v2869_v34  }
 0x59b   : > { %2107 = vset.pattern.permute.xlu0 %v3541_v18 }
 0x59c   : > { %1652 = vperm.xlu0 %2107, %v2869_v34  }
 0x5a0   : > { %2108 = vset.pattern.permute.xlu0 %v3569_v35 }
 0x5a1   : > { %1060 = vperm.xlu0 %2108, %v2869_v34  }
 0x5a5   : > { %1804 = vperm.xlu0 %2108, %v2869_v34  }
 0x5a9   : > { %2113 = vset.pattern.permute.xlu0 %v3570_v3 }
 0x5aa   : > { %1818 = vperm.xlu0 %2113, %v2869_v34  }
 0x5ae   : > { %2116 = vset.pattern.permute.xlu0 %v3571_v14 }
 0x5e2   : > { %v964_v63 = vpop.permute.xlu0 %963  ;;  %v962_v29 = vpop.permute.xlu1 %961 }
 0x5e3   : > { %v965_v18 = vsel %vm530_vm7, %v962_v29, %v964_v63  ;;  %v966_v16 = vsel %vm530_vm7, %v964_v63, %v962_v29  ;;  %v3572_v63 = vld [vmem:[#allocation17_spill] sm:$0xff] }
 0x5e4   : > { %v967_v21 = vmul.f32 %v966_v16, %v2613_v27  ;;  %v968_v61 = vmul.f32 %v965_v18, %v2616_v15 }
 0x5e6   : > { %v969_v50 = vadd.f32 %v967_v21, %v921_v53  ;;  %v970_v0 = vadd.f32 %v968_v61, %v922_v55 }
 0x5ef   : > { %v1585_v2 = vpop.permute.xlu0 %1584  ;;  %v973_v35 = vpop.permute.xlu1 %972 }
 0x5f0   : > { %v3094_v23 = vadd.f32 %v1585_v2, %v3038_v42  ;;  %v3096_v32 = vadd.f32 %v1585_v2, %v1577_v44  ;;  %v975_v16 = vmul.f32 %v973_v35, %v2975_v37  ;;  %v976_v53 = vmul.f32 %v973_v35, %v2981_v1 }
 0x5f2   : > { %v1857_v29 = vadd.f32 %v3572_v63, %v3094_v23  ;;  %1589 = vrot.lane.b32.xlu0 %v3094_v23, %s2192_s9  ;;  %v1858_v6 = vadd.f32 %v3573_v48, %v3096_v32 }
 0x5f4   : > { %1966 = vst [vmem:[%s2918_s16 + $0x20] sm:$0xff] %v1857_v29  ;;  %v979_v18 = vpop.permute.xlu1 %978  ;;  %1967 = vst [vmem:[%s2918_s16 + $0x28] sm:$0xff] %v1858_v6  ;;  %v995_v61 = vpop.permute.xlu0 %994 }
 0x5f5   : > { %v981_v42 = vmul.f32 %v979_v18, %v2978_v7  ;;  %v982_v44 = vmul.f32 %v979_v18, %v2984_v43  ;;  %v997_v35 = vmul.f32 %v995_v61, %v2998_v11  ;;  %v998_v48 = vmul.f32 %v995_v61, %v3001_v31 }
 0x5f6   : > { %1597 = vrot.lane.b32.xlu0 %v3094_v23, %s2193_s10 }
 0x5f7   : > { %v983_v55 = vadd.f32 %v981_v42, %v975_v16  ;;  %v984_v21 = vadd.f32 %v982_v44, %v976_v53 }
 0x5f9   : > { %v987_v2 = vpop.permute.xlu1 %986 }
 0x5fa   : > { %v989_v63 = vmul.f32 %v987_v2, %v2909_v13  ;;  %v990_v29 = vmul.f32 %v987_v2, %v2911_v22  ;;  %1605 = vrot.lane.b32.xlu0 %v3094_v23, %s2194_s11 }
 0x5fc   : > { %v991_v6 = vadd.f32 %v989_v63, %v983_v55  ;;  %v992_v18 = vadd.f32 %v990_v29, %v984_v21  ;;  %v1019_v21 = vpop.permute.xlu0 %1018 }
 0x5fd   : > { %v1021_v29 = vmul.f32 %v1019_v21, %v2978_v7 }
 0x5fe   : > { %1615 = vrot.lane.b32.xlu0 %v3096_v32, %s2191_s8  ;;  %v999_v16 = vadd.f32 %v997_v35, %v991_v6  ;;  %v1000_v53 = vadd.f32 %v998_v48, %v992_v18  ;;  %v1003_v42 = vpop.permute.xlu1 %1002  ;;  %v3574_v48 = vmov 26  }
 0x5ff   : > { %v1005_v44 = vmul.f32 %v1003_v42, %v3005_v39  ;;  %v1006_v62 = vmul.f32 %v1003_v42, %v3013_v47 }
 0x601   : > { %v1007_v2 = vadd.f32 %v1005_v44, %v999_v16  ;;  %v1008_v19 = vadd.f32 %v1006_v62, %v1000_v53 }
 0x602   : > { %1834 = vperm.xlu0 %2116, %v2869_v34  }
 0x603   : > { %v3123_v15 = vadd.f32 %v1007_v2, %v969_v50  ;;  %v3125_v27 = vadd.f32 %v1008_v19, %v970_v0  ;;  %v1013_v55 = vpop.permute.xlu1 %1012  ;;  %v1022_v19 = vmul.f32 %v1019_v21, %v2984_v43 }
 0x604   : > { %v1015_v61 = vmul.f32 %v1013_v55, %v2975_v37  ;;  %v1016_v35 = vmul.f32 %v1013_v55, %v2981_v1 }
 0x606   : > { %2119 = vset.pattern.permute.xlu0 %v3561_v54  ;;  %v1023_v50 = vadd.f32 %v1021_v29, %v1015_v61  ;;  %v1043_v54 = vpop.permute.xlu0 %1042  ;;  %v1024_v18 = vadd.f32 %v1022_v19, %v1016_v35 }
 0x607   : > { %1730 = vperm.xlu0 %2119, %v2869_v34   ;;  %v1045_v44 = vmul.f32 %v1043_v54, %v3005_v39 }
 0x608   : > { %v1027_v63 = vpop.permute.xlu1 %1026 }
 0x609   : > { %v1029_v62 = vmul.f32 %v1027_v63, %v2909_v13  ;;  %v1030_v0 = vmul.f32 %v1027_v63, %v2911_v22 }
 0x60b   : > { %2122 = vset.pattern.permute.xlu0 %v3574_v48  ;;  %v1031_v16 = vadd.f32 %v1029_v62, %v1023_v50  ;;  %v1032_v2 = vadd.f32 %v1030_v0, %v1024_v18  ;;  %v1046_v48 = vmul.f32 %v1043_v54, %v3013_v47 }
 0x60d   : > { %v1035_v6 = vpop.permute.xlu1 %1034 }
 0x60e   : > { %v1037_v53 = vmul.f32 %v1035_v6, %v2998_v11  ;;  %v1038_v42 = vmul.f32 %v1035_v6, %v3001_v31 }
 0x610   : > { %v1039_v55 = vadd.f32 %v1037_v53, %v1031_v16  ;;  %v1040_v30 = vadd.f32 %v1038_v42, %v1032_v2 }
 0x612   : > { %v1047_v28 = vadd.f32 %v1045_v44, %v1039_v55  ;;  %v1048_v21 = vadd.f32 %v1046_v48, %v1040_v30 }
 0x614   : > { %1049 = vrot.lane.b32.xlu1 %v1047_v28, %s2203_s24 }
 0x618   : > { %1051 = vrot.lane.b32.xlu1 %v1048_v21, %s2203_s24 }
 0x61c   : > { %1066 = vperm.xlu1 %2093, %v2869_v34  }
 0x620   : > { %2094 = vset.pattern.permute.xlu1 %v3570_v3 }
 0x621   : > { %1074 = vperm.xlu1 %2094, %v2869_v34  }
 0x625   : > { %2096 = vset.pattern.permute.xlu1 %v3571_v14 }
 0x626   : > { %1090 = vperm.xlu1 %2096, %v2869_v34  }
 0x62a   : > { %2097 = vset.pattern.permute.xlu1 %v3538_v9  ;;  %v1083_v9 = vpop.permute.xlu0 %1082 }
 0x62b   : > { %1622 = vperm.xlu1 %2097, %v2869_v34   ;;  %v1085_v63 = vmul.f32 %v1083_v9, %v2998_v11  ;;  %v1086_v29 = vmul.f32 %v1083_v9, %v3001_v31 }
 0x62f   : > { %2099 = vset.pattern.permute.xlu1 %v3543_v24 }
 0x630   : > { %1668 = vperm.xlu1 %2099, %v2869_v34  }
 0x634   : > { %2100 = vset.pattern.permute.xlu1 %v3545_v41 }
 0x635   : > { %1674 = vperm.xlu1 %2100, %v2869_v34  }
 0x639   : > { %2102 = vset.pattern.permute.xlu1 %v3555_v26 }
 0x63a   : > { %1682 = vperm.xlu1 %2102, %v2869_v34  }
 0x63e   : > { %2103 = vset.pattern.permute.xlu1 %v3542_v59  ;;  %v3185_v59 = vpop.permute.xlu0 %1628 }
 0x63f   : > { %1644 = vperm.xlu1 %2103, %v2869_v34  }
 0x642   : > { %v3189_v41 = vpop.permute.xlu0 %1636 }
 0x643   : > { %2105 = vset.pattern.permute.xlu1 %v3565_v8 }
 0x644   : > { %1756 = vperm.xlu1 %2105, %v2869_v34  }
 0x648   : > { %2106 = vset.pattern.permute.xlu1 %v3560_v52 }
 0x649   : > { %1762 = vperm.xlu1 %2106, %v2869_v34  }
 0x64d   : > { %2109 = vset.pattern.permute.xlu1 %v3556_v10  ;;  %v3197_v10 = vpop.permute.xlu0 %1690 }
 0x64e   : > { %1698 = vperm.xlu1 %2109, %v2869_v34  }
 0x652   : > { %2110 = vset.pattern.permute.xlu1 %v3566_v51 }
 0x653   : > { %1770 = vperm.xlu1 %2110, %v2869_v34  }
 0x657   : > { %2111 = vset.pattern.permute.xlu1 %v3568_v5 }
 0x658   : > { %1810 = vperm.xlu1 %2111, %v2869_v34  }
 0x65c   : > { %2112 = vset.pattern.permute.xlu1 %v3567_v25 }
 0x65d   : > { %1778 = vperm.xlu1 %2112, %v2869_v34  }
 0x661   : > { %2114 = vset.pattern.permute.xlu1 %v3562_v40  ;;  %v3207_v40 = vpop.permute.xlu0 %1652 }
 0x662   : > { %1786 = vperm.xlu1 %2114, %v2869_v34  }
 0x666   : > { %1613 = vrot.lane.b32.xlu1 %v3094_v23, %s2191_s8 }
 0x667   : > { %2115 = vset.pattern.permute.xlu1 %v3564_v17  ;;  %v1061_v17 = vpop.permute.xlu0 %1060 }
 0x668   : > { %v1063_v25 = vmul.f32 %v1061_v17, %v2975_v37  ;;  %v1064_v5 = vmul.f32 %v1061_v17, %v2981_v1  ;;  %v1640_v17 = vmul.f32 %v3189_v41, %v3096_v32 }
 0x66a   : > { %1591 = vrot.lane.b32.xlu1 %v3096_v32, %s2192_s9 }
 0x66e   : > { %1599 = vrot.lane.b32.xlu1 %v3096_v32, %s2193_s10 }
 0x672   : > { %1607 = vrot.lane.b32.xlu1 %v3096_v32, %s2194_s11 }
 0x676   : > { %1826 = vperm.xlu1 %2115, %v2869_v34  }
 0x67a   : > { %2117 = vset.pattern.permute.xlu1 %v3557_v58 }
 0x67b   : > { %1716 = vperm.xlu1 %2117, %v2869_v34  }
 0x67f   : > { %2118 = vset.pattern.permute.xlu1 %v3559_v36 }
 0x680   : > { %1722 = vperm.xlu1 %2118, %v2869_v34  }
 0x684   : > { %2120 = vset.pattern.permute.xlu1 %v3558_v60 }
 0x685   : > { %1738 = vperm.xlu1 %2120, %v2869_v34  }
 0x686   : > { %v1050_v24 = vpop.permute.xlu1 %1049 }
 0x689   : > { %2121 = vset.pattern.permute.xlu1 %v3563_v12 }
 0x68a   : > { %1746 = vperm.xlu1 %2121, %v2869_v34   ;;  %v1052_v28 = vpop.permute.xlu1 %1051 }
 0x68b   : > { %v1053_v30 = vsel %vm630_vm9, %v1050_v24, %v1052_v28  ;;  %v1054_v26 = vsel %vm630_vm9, %v1052_v28, %v1050_v24 }
 0x68c   : > { %v1055_v58 = vmul.f32 %v1053_v30, %v2643_v46  ;;  %v1056_v60 = vmul.f32 %v1054_v26, %v2649_v20 }
 0x68e   : > { %v3202_v36 = vadd.f32 %v1055_v58, %v3123_v15  ;;  %v3205_v52 = vadd.f32 %v1056_v60, %v3125_v27 }
 0x697   : > { %v1067_v12 = vpop.permute.xlu1 %1066 }
 0x698   : > { %v1069_v8 = vmul.f32 %v1067_v12, %v2978_v7  ;;  %v1070_v51 = vmul.f32 %v1067_v12, %v2984_v43  ;;  %v1639_v12 = vmul.f32 %v3189_v41, %v3094_v23 }
 0x69a   : > { %v1071_v14 = vadd.f32 %v1069_v8, %v1063_v25  ;;  %v1072_v61 = vadd.f32 %v1070_v51, %v1064_v5 }
 0x69c   : > { %v1075_v3 = vpop.permute.xlu1 %1074 }
 0x69d   : > { %v1077_v15 = vmul.f32 %v1075_v3, %v2909_v13  ;;  %v1078_v27 = vmul.f32 %v1075_v3, %v2911_v22 }
 0x69f   : > { %v1079_v35 = vadd.f32 %v1077_v15, %v1071_v14  ;;  %v1080_v62 = vadd.f32 %v1078_v27, %v1072_v61 }
 0x6a1   : > { %v1087_v7 = vadd.f32 %v1085_v63, %v1079_v35  ;;  %v1088_v19 = vadd.f32 %v1086_v29, %v1080_v62  ;;  %v1091_v43 = vpop.permute.xlu1 %1090 }
 0x6a2   : > { %v1093_v37 = vmul.f32 %v1091_v43, %v3005_v39  ;;  %v1094_v1 = vmul.f32 %v1091_v43, %v3013_v47  ;;  %v3226_v39 = vpop.permute.xlu0 %1804 }
 0x6a4   : > { %v1095_v50 = vadd.f32 %v1093_v37, %v1087_v7  ;;  %v1096_v0 = vadd.f32 %v1094_v1, %v1088_v19  ;;  %v3575_v1 = vld [vmem:[#allocation6_spill] sm:$0xff] }
 0x6a6   : > { %1099 = vrot.lane.b32.xlu1 %v1096_v0, %s2204_s25  ;;  %1097 = vrot.lane.b32.xlu0 %v1095_v50, %s2204_s25  ;;  %v1623_v13 = vpop.permute.xlu1 %1622  ;;  %v3228_v53 = vpop.permute.xlu0 %1818 }
 0x6a7   : > { %v3256_v25 = vmul.f32 %v3228_v53, %v3094_v23 }
 0x6aa   : > { %1108 = vperm.xlu0 %2122, %v2869_v34   ;;  %v1590_v44 = vpop.permute.xlu0 %1589 }
 0x6ab   : > { %v1669_v22 = vpop.permute.xlu1 %1668 }
 0x6ae   : > { %v1598_v34 = vpop.permute.xlu0 %1597 }
 0x6b0   : > { %v1675_v11 = vpop.permute.xlu1 %1674 }
 0x6b2   : > { %v1606_v48 = vpop.permute.xlu0 %1605 }
 0x6b5   : > { %v1683_v31 = vpop.permute.xlu1 %1682 }
 0x6b6   : > { %v1616_v30 = vpop.permute.xlu0 %1615  ;;  %v1686_v3 = vmul.f32 %v1683_v31, %v3096_v32 }
 0x6ba   : > { %v1645_v54 = vpop.permute.xlu1 %1644 }
 0x6bf   : > { %v3222_v6 = vpop.permute.xlu1 %1756 }
 0x6c4   : > { %v1763_v18 = vpop.permute.xlu1 %1762 }
 0x6c9   : > { %v3224_v16 = vpop.permute.xlu1 %1698 }
 0x6ce   : > { %v1771_v47 = vpop.permute.xlu1 %1770 }
 0x6cf   : > { %v3274_v15 = vmul.f32 %v1771_v47, %v3094_v23  ;;  %v1774_v37 = vmul.f32 %v1771_v47, %v3096_v32 }
 0x6d3   : > { %v3230_v42 = vpop.permute.xlu1 %1810 }
 0x6d8   : > { %v3232_v2 = vpop.permute.xlu1 %1778 }
 0x6dd   : > { %v3234_v55 = vpop.permute.xlu1 %1786 }
 0x6e1   : > { %v1614_v21 = vpop.permute.xlu1 %1613 }
 0x6e2   : > { %v1618_v26 = vsel %vm414_vm5, %v1616_v30, %v1614_v21  ;;  %v1617_v8 = vsel %vm414_vm5, %v1614_v21, %v1616_v30 }
 0x6e3   : > { %v3265_v41 = vmul.f32 %v1618_v26, %v3554_v57  ;;  %v3277_v27 = vmul.f32 %v1617_v8, %v3553_v49 }
 0x6e5   : > { %v1592_v9 = vpop.permute.xlu1 %1591  ;;  %v1655_v8 = vmul.f32 %v3207_v40, %v3277_v27 }
 0x6e6   : > { %v1593_v24 = vsel %vm354_vm2, %v1590_v44, %v1592_v9  ;;  %v1594_v28 = vsel %vm354_vm2, %v1592_v9, %v1590_v44 }
 0x6e7   : > { %v3243_v58 = vmul.f32 %v1594_v28, %v3547_v45  ;;  %v3246_v60 = vmul.f32 %v1593_v24, %v3549_v38  ;;  %v1685_v45 = vmul.f32 %v1683_v31, %v3094_v23  ;;  %v3307_v24 = vpop.permute.xlu0 %1834 }
 0x6e9   : > { %v1600_v51 = vpop.permute.xlu1 %1599  ;;  %v1625_v63 = vmul.f32 %v1623_v13, %v3243_v58  ;;  %v1626_v29 = vmul.f32 %v1623_v13, %v3246_v60  ;;  %v1671_v7 = vmul.f32 %v1669_v22, %v3243_v58  ;;  %v1672_v49 = vmul.f32 %v1669_v22, %v3246_v60 }
 0x6ea   : > { %v1601_v38 = vsel %vm374_vm3, %v1598_v34, %v1600_v51  ;;  %v1602_v5 = vsel %vm374_vm3, %v1600_v51, %v1598_v34  ;;  %v1656_v13 = vmul.f32 %v3207_v40, %v3265_v41  ;;  %v1760_v28 = vmul.f32 %v3222_v6, %v3246_v60 }
 0x6eb   : > { %v3268_v14 = vmul.f32 %v1602_v5, %v3548_v56  ;;  %v3271_v61 = vmul.f32 %v1601_v38, %v3550_v4  ;;  %v1807_v38 = vmul.f32 %v3226_v39, %v3243_v58 }
 0x6ed   : > { %v1631_v57 = vmul.f32 %v3185_v59, %v3268_v14  ;;  %v1632_v56 = vmul.f32 %v3185_v59, %v3271_v61  ;;  %v1677_v35 = vmul.f32 %v1675_v11, %v3268_v14  ;;  %v1678_v4 = vmul.f32 %v1675_v11, %v3271_v61  ;;  %v1608_v62 = vpop.permute.xlu1 %1607  ;;  %v3576_v59 = vld [vmem:[#allocation7_spill] sm:$0xff] }
 0x6ee   : > { %v1609_v19 = vsel %vm394_vm4, %v1606_v48, %v1608_v62  ;;  %v1610_v43 = vsel %vm394_vm4, %v1608_v62, %v1606_v48  ;;  %v1766_v34 = vmul.f32 %v1763_v18, %v3271_v61  ;;  %v1813_v48 = vmul.f32 %v3230_v42, %v3268_v14 }
 0x6ef   : > { %v3295_v50 = vmul.f32 %v1609_v19, %v3575_v1  ;;  %v3298_v0 = vmul.f32 %v1610_v43, %v3576_v59  ;;  %v1634_v11 = vadd.f32 %v1632_v56, %v1626_v29  ;;  %v1633_v31 = vadd.f32 %v1631_v57, %v1625_v63  ;;  %v1731_v19 = vpop.permute.xlu0 %1730 }
 0x6f0   : > { %v1680_v22 = vadd.f32 %v1678_v4, %v1672_v49  ;;  %v1679_v44 = vadd.f32 %v1677_v35, %v1671_v7  ;;  %v1765_v51 = vmul.f32 %v1763_v18, %v3268_v14  ;;  %v1768_v35 = vadd.f32 %v1766_v34, %v1760_v28 }
 0x6f1   : > { %v1827_v21 = vpop.permute.xlu1 %1826  ;;  %v1648_v47 = vmul.f32 %v1645_v54, %v3298_v0  ;;  %v1647_v9 = vmul.f32 %v1645_v54, %v3295_v50  ;;  %v1642_v30 = vadd.f32 %v1640_v17, %v1634_v11  ;;  %v1641_v26 = vadd.f32 %v1639_v12, %v1633_v31 }
 0x6f2   : > { %v1688_v5 = vadd.f32 %v1686_v3, %v1680_v22  ;;  %v1694_v63 = vmul.f32 %v3197_v10, %v3298_v0  ;;  %v1687_v57 = vadd.f32 %v1685_v45, %v1679_v44  ;;  %v1693_v56 = vmul.f32 %v3197_v10, %v3295_v50 }
 0x6f3   : > { %v1650_v54 = vadd.f32 %v1648_v47, %v1642_v30  ;;  %v1649_v29 = vadd.f32 %v1647_v9, %v1641_v26  ;;  %v1814_v12 = vmul.f32 %v3230_v42, %v3271_v61  ;;  %v1815_v17 = vadd.f32 %v1813_v48, %v1807_v38 }
 0x6f4   : > { %v1696_v40 = vadd.f32 %v1694_v63, %v1688_v5  ;;  %v1695_v7 = vadd.f32 %v1693_v56, %v1687_v57  ;;  %v1782_v3 = vmul.f32 %v3232_v2, %v3298_v0  ;;  %v1759_v49 = vmul.f32 %v3222_v6, %v3243_v58  ;;  %v2157_v56 = vld [vmem:[%s3416_s4] sm:$0xff] }
 0x6f5   : > { %v1658_v4 = vadd.f32 %v1656_v13, %v1650_v54  ;;  %v1657_v62 = vadd.f32 %v1655_v8, %v1649_v29  ;;  %v1808_v45 = vmul.f32 %v3226_v39, %v3246_v60  ;;  %v1702_v43 = vmul.f32 %v3224_v16, %v3265_v41 }
 0x6f6   : > { %v1717_v18 = vpop.permute.xlu1 %1716  ;;  %v1701_v1 = vmul.f32 %v3224_v16, %v3277_v27  ;;  %v1776_v59 = vadd.f32 %v1774_v37, %v1768_v35  ;;  %v1829_v13 = vmul.f32 %v1827_v21, %v3295_v50  ;;  %v1767_v39 = vadd.f32 %v1765_v51, %v1759_v49 }
 0x6f7   : > { %v1719_v10 = vmul.f32 %v1717_v18, %v3243_v58  ;;  %v1720_v42 = vmul.f32 %v1717_v18, %v3246_v60  ;;  %1661 = vrot.lane.b32.xlu1 %v1658_v4, %s2201_s20  ;;  %1659 = vrot.lane.b32.xlu0 %v1657_v62, %s2201_s20  ;;  %v1816_v6 = vadd.f32 %v1814_v12, %v1808_v45 }
 0x6f8   : > { %v1781_v58 = vmul.f32 %v3232_v2, %v3295_v50  ;;  %v1823_v60 = vadd.f32 %v3256_v25, %v1815_v17  ;;  %v1704_v11 = vadd.f32 %v1702_v43, %v1696_v40  ;;  %v1703_v31 = vadd.f32 %v1701_v1, %v1695_v7  ;;  %v3577_v7 = vld [vmem:[#allocation14_spill] sm:$0xff]  ;;  %v2158_v43 = vld [vmem:[%s2267_s29 + $0x10] sm:$0xff] }
 0x6f9   : > { %v1784_v22 = vadd.f32 %v1782_v3, %v1776_v59  ;;  %v1822_v44 = vmul.f32 %v3228_v53, %v3096_v32  ;;  %v1733_v34 = vmul.f32 %v1731_v19, %v3094_v23  ;;  %v1734_v16 = vmul.f32 %v1731_v19, %v3096_v32  ;;  %v3578_v3 = vld [vmem:[#allocation15_spill] sm:$0xff]  ;;  %v2159_v59 = vld [vmem:[%s2267_s29 + $0x18] sm:$0xff] }
 0x6fa   : > { %v1775_v48 = vadd.f32 %v3274_v15, %v1767_v39  ;;  %v1790_v47 = vmul.f32 %v3234_v55, %v3265_v41  ;;  %v1830_v53 = vmul.f32 %v1827_v21, %v3298_v0  ;;  %v1789_v32 = vmul.f32 %v3234_v55, %v3277_v27 }
 0x6fb   : > { %v1723_v37 = vpop.permute.xlu1 %1722  ;;  %1707 = vrot.lane.b32.xlu1 %v1704_v11, %s2202_s22  ;;  %1705 = vrot.lane.b32.xlu0 %v1703_v31, %s2202_s22  ;;  %v1824_v9 = vadd.f32 %v1822_v44, %v1816_v6  ;;  %v1831_v28 = vadd.f32 %v1829_v13, %v1823_v60  ;;  %v1838_v57 = vmul.f32 %v3307_v24, %v3265_v41 }
 0x6fc   : > { %v1725_v2 = vmul.f32 %v1723_v37, %v3268_v14  ;;  %v1726_v25 = vmul.f32 %v1723_v37, %v3271_v61  ;;  %v1783_v23 = vadd.f32 %v1781_v58, %v1775_v48  ;;  %v1792_v26 = vadd.f32 %v1790_v47, %v1784_v22  ;;  %v3579_v22 = vld [vmem:[#allocation10_spill] sm:$0xff]  ;;  %v3581_v37 = vld [vmem:[#allocation12_spill] sm:$0xff] }
 0x6fd   : > { %v1837_v14 = vmul.f32 %v3307_v24, %v3277_v27  ;;  %v1832_v55 = vadd.f32 %v1830_v53, %v1824_v9 }
 0x6fe   : > { %v1727_v15 = vadd.f32 %v1725_v2, %v1719_v10  ;;  %v1728_v30 = vadd.f32 %v1726_v25, %v1720_v42  ;;  %v1791_v8 = vadd.f32 %v1789_v32, %v1783_v23  ;;  %v3582_v2 = vld [vmem:[#allocation13_spill] sm:$0xff] }
 0x6ff   : > { %1795 = vrot.lane.b32.xlu1 %v1792_v26, %s2203_s24  ;;  %v1839_v63 = vadd.f32 %v1837_v14, %v1831_v28  ;;  %v1840_v17 = vadd.f32 %v1838_v57, %v1832_v55 }
 0x700   : > { %v1735_v61 = vadd.f32 %v1733_v34, %v1727_v15  ;;  %v1736_v51 = vadd.f32 %v1734_v16, %v1728_v30  ;;  %v1739_v38 = vpop.permute.xlu1 %1738  ;;  %1793 = vrot.lane.b32.xlu0 %v1791_v8, %s2203_s24  ;;  %v3580_v34 = vld [vmem:[#allocation11_spill] sm:$0xff] }
 0x701   : > { %v1741_v21 = vmul.f32 %v1739_v38, %v3295_v50  ;;  %v1742_v5 = vmul.f32 %v1739_v38, %v3298_v0 }
 0x703   : > { %v1743_v54 = vadd.f32 %v1741_v21, %v1735_v61  ;;  %v1744_v29 = vadd.f32 %v1742_v5, %v1736_v51  ;;  %1841 = vrot.lane.b32.xlu1 %v1839_v63, %s2204_s25 }
 0x704   : > { %1852 = vperm.xlu0 %2122, %v2157_v56   ;;  %v2160_v56 = vld [vmem:[%s2267_s29 + $0x30] sm:$0xff] }
 0x705   : > { %v1747_v12 = vpop.permute.xlu1 %1746 }
 0x706   : > { %v1749_v50 = vmul.f32 %v1747_v12, %v3277_v27  ;;  %v1750_v0 = vmul.f32 %v1747_v12, %v3265_v41 }
 0x707   : > { %1843 = vrot.lane.b32.xlu1 %v1840_v17, %s2204_s25  ;;  %v2161_v17 = vld [vmem:[%s2267_s29 + $0x38] sm:$0xff] }
 0x708   : > { %v1751_v40 = vadd.f32 %v1749_v50, %v1743_v54  ;;  %v1752_v35 = vadd.f32 %v1750_v0, %v1744_v29 }
 0x718   : > { %v1098_v24 = vpop.permute.xlu0 %1097  ;;  %v1100_v18 = vpop.permute.xlu1 %1099 }
 0x719   : > { %v1101_v4 = vsel %vm690_vm10, %v1098_v24, %v1100_v18  ;;  %v1102_v62 = vsel %vm690_vm10, %v1100_v18, %v1098_v24 }
 0x71a   : > { %v1103_v27 = vmul.f32 %v1101_v4, %v3577_v7  ;;  %v1104_v49 = vmul.f32 %v1102_v62, %v3578_v3 }
 0x71c   : > { %v1105_v41 = vadd.f32 %v1103_v27, %v3202_v36  ;;  %v1106_v45 = vadd.f32 %v1104_v49, %v3205_v52 }
 0x725   : > { %v1109_v10 = vpop.permute.xlu0 %1108 }
 0x726   : > { %v1111_v42 = vadd.f32 %v1109_v10, %v1105_v41  ;;  %v1112_v19 = vadd.f32 %v1109_v10, %v1106_v45 }
 0x728   : > { %v1117_v1 = vadd.f32 %v2158_v43, %v1111_v42  ;;  %v1118_v6 = vadd.f32 %v2159_v59, %v1112_v19 }
 0x72a   : > { %1119 = vst [vmem:[%s2918_s16 + $0x10] sm:$0xff] %v1117_v1  ;;  %1120 = vst [vmem:[%s2918_s16 + $0x18] sm:$0xff] %v1118_v6 }
 0x769   : > { %v1660_v13 = vpop.permute.xlu0 %1659  ;;  %v1662_v39 = vpop.permute.xlu1 %1661 }
 0x76a   : > { %v1663_v11 = vsel %vm472_vm8, %v1660_v13, %v1662_v39  ;;  %v1664_v36 = vsel %vm472_vm8, %v1662_v39, %v1660_v13 }
 0x76b   : > { %v1665_v48 = vmul.f32 %v1664_v36, %v3581_v37  ;;  %v1666_v25 = vmul.f32 %v1663_v11, %v3582_v2 }
 0x76d   : > { %v1706_v58 = vpop.permute.xlu0 %1705  ;;  %v1708_v60 = vpop.permute.xlu1 %1707 }
 0x76e   : > { %v1709_v52 = vsel %vm530_vm7, %v1706_v58, %v1708_v60  ;;  %v1710_v31 = vsel %vm530_vm7, %v1708_v60, %v1706_v58 }
 0x76f   : > { %v1711_v44 = vmul.f32 %v1710_v31, %v3579_v22  ;;  %v1712_v16 = vmul.f32 %v1709_v52, %v3580_v34 }
 0x771   : > { %v1796_v47 = vpop.permute.xlu1 %1795  ;;  %v1713_v53 = vadd.f32 %v1711_v44, %v1665_v48  ;;  %v1714_v23 = vadd.f32 %v1712_v16, %v1666_v25 }
 0x772   : > { %v1794_v9 = vpop.permute.xlu0 %1793 }
 0x773   : > { %v1797_v32 = vsel %vm630_vm9, %v1794_v9, %v1796_v47  ;;  %v1798_v28 = vsel %vm630_vm9, %v1796_v47, %v1794_v9  ;;  %v1753_v8 = vadd.f32 %v1751_v40, %v1713_v53  ;;  %v1754_v14 = vadd.f32 %v1752_v35, %v1714_v23 }
 0x774   : > { %v1799_v30 = vmul.f32 %v1797_v32, %v2643_v46  ;;  %v1800_v26 = vmul.f32 %v1798_v28, %v2649_v20 }
 0x775   : > { %v1842_v15 = vpop.permute.xlu1 %1841 }
 0x776   : > { %v1801_v46 = vadd.f32 %v1799_v30, %v1753_v8  ;;  %v1802_v55 = vadd.f32 %v1800_v26, %v1754_v14 }
 0x779   : > { %v1844_v61 = vpop.permute.xlu1 %1843 }
 0x77a   : > { %v1845_v51 = vsel %vm690_vm10, %v1842_v15, %v1844_v61  ;;  %v1846_v38 = vsel %vm690_vm10, %v1844_v61, %v1842_v15 }
 0x77b   : > { %v1847_v21 = vmul.f32 %v1845_v51, %v3577_v7  ;;  %v1848_v5 = vmul.f32 %v1846_v38, %v3578_v3 }
 0x77d   : > { %v1849_v63 = vadd.f32 %v1847_v21, %v1801_v46  ;;  %v1850_v20 = vadd.f32 %v1848_v5, %v1802_v55 }
 0x77f   : > { %v1853_v54 = vpop.permute.xlu0 %1852 }
 0x780   : > { %v1855_v29 = vadd.f32 %v1853_v54, %v1849_v63  ;;  %v1856_v57 = vadd.f32 %v1853_v54, %v1850_v20 }
 0x782   : > { %v1862_v12 = vadd.f32 %v2160_v56, %v1855_v29  ;;  %v1863_v50 = vadd.f32 %v2161_v17, %v1856_v57 }
 0x784   : > { %1968 = vst [vmem:[%s2918_s16 + $0x30] sm:$0xff] %v1862_v12  ;;  %1969 = vst [vmem:[%s2918_s16 + $0x38] sm:$0xff] %v1863_v50 }
 0x785 PF: > { %s16_s21 = sadd.s32 1, %s2168_s21  }
 0x786   : > { %p13_p4 = scmp.ge.s32.totalorder %s16_s21, 4  }
 0x788   :  { %15 = sbr.rel (!%p13_p4) target bundleno = 1 (0x1), region = 84 }

</bundles_post_ra>
